<compile_context>
chip_gen: v7x
topology: tpu7x:2x2x1
jax: 0.10.0
libtpu: 0.0.40
codegen_flags: <defaults>
</compile_context>

<pallas_src>
import functools

import jax
import jax.numpy as jnp
from jax.experimental import pallas as pl
from jax.experimental.pallas import tpu as pltpu


def _pick_tb(batch):
    # Batch tile: multiple of 16 so LN = 16*TB is a multiple of 256 (full MXU
    # width), capped at 128 so flatten / output slices are whole 128-lane
    # groups and batches > 128 still give >= 2 grid steps (v7x megacore).
    return int(min(128, -(-batch // 16) * 16))


# ----------------------------------------------------------------------------
# Fused Pallas kernel: conv1 -> relu -> pool -> conv2 -> relu -> pool -> fc1/2/3
# ----------------------------------------------------------------------------
def _lenet5_kernel(xd_ref, wband_ref, b1r_ref, w2band_ref, b2_ref,
                   wf1_ref, bf1_ref, wf2_ref, bf2_ref, wf3_ref, bf3_ref,
                   o_ref, *, tb):
    f32 = jnp.float32
    bf16 = jnp.bfloat16
    patches = xd_ref[0]                       # (256, LN) bf16: rows kr*16+kc, lanes (P,Q,b)

    # conv1 over all needed output phases as a banded matmul, fused with
    # ReLU + 2x2 maxpool: band-matrix rows are grouped by pool-window position,
    # so pooling is an elementwise max of the four 288-row chunks.
    # (max-before-bias+ReLU is valid: bias is constant per channel over the
    #  pool window and ReLU is monotone.)
    m = jnp.dot(wband_ref[0:288, :], patches, preferred_element_type=f32)
    for k in range(1, 4):
        m = jnp.maximum(
            m, jnp.dot(wband_ref[k * 288:(k + 1) * 288, :], patches,
                       preferred_element_type=f32))
    z = jnp.maximum(m + b1r_ref[...], 0.0)    # (288, LN) f32: rows (a*6+b')*8 + c1(pad 8)
    z16 = z.astype(bf16)

    # conv2 fused with ReLU + 2x2 maxpool: ONE pre-scattered (64, 288) band
    # matmul (4 pool positions x 16 channels), then max over the 4 row groups.
    r = jnp.dot(w2band_ref[...], z16, preferred_element_type=f32)   # (64, LN) f32
    c2 = jnp.maximum(jnp.maximum(r[0:16, :], r[16:32, :]),
                     jnp.maximum(r[32:48, :], r[48:64, :]))
    pooled2 = jnp.maximum(c2 + b2_ref[...], 0.0)   # (16, LN) f32: rows c2, lanes s*tb+b

    # Flatten: regroup batch columns -> (256, tb) with rows ordered (s=P*4+Q, c2).
    # fc1's weight columns were pre-permuted to the same order.
    v = jnp.concatenate([pooled2[:, s * tb:(s + 1) * tb] for s in range(16)],
                        axis=0).astype(bf16)                        # (256, tb)

    h1 = jnp.maximum(jnp.dot(wf1_ref[...], v, preferred_element_type=f32)
                     + bf1_ref[...], 0.0).astype(bf16)              # (120, tb)
    h2 = jnp.maximum(jnp.dot(wf2_ref[...], h1, preferred_element_type=f32)
                     + bf2_ref[...], 0.0).astype(bf16)              # (84, tb)
    out = jnp.dot(wf3_ref[...], h2, preferred_element_type=f32) + bf3_ref[...]
    o_ref[0] = out.astype(o_ref.dtype)                              # (cls_pad, tb)


# ----------------------------------------------------------------------------
# One-time parameter preparation (torch layouts -> kernel-ready operands)
# ----------------------------------------------------------------------------
def prepare_params(params):
    f32 = jnp.float32
    bf16 = jnp.bfloat16

    # conv1 -> banded matrix mapping the 16x16 space-to-depth input phases to
    # every conv1 output needed by pool1, grouped by pool-window position.
    w1 = params["conv1_w"].reshape(6, 5, 5).astype(f32)             # (c1, i, j)
    row = jnp.arange(4 * 36 * 8)
    c1 = row % 8
    rest = row // 8
    bp = rest % 6
    a = (rest // 6) % 6
    widx = rest // 36                        # pool window index (dy*2+dx)
    dy = widx // 2
    dx = widx % 2
    col = jnp.arange(256)
    kr = col // 16
    kc = col % 16
    i1 = kr[None, :] - (2 * a + dy)[:, None]
    j1 = kc[None, :] - (2 * bp + dx)[:, None]
    valid = (i1 >= 0) & (i1 < 5) & (j1 >= 0) & (j1 < 5) & (c1[:, None] < 6)
    vals = w1[jnp.clip(c1, 0, 5)[:, None], jnp.clip(i1, 0, 4), jnp.clip(j1, 0, 4)]
    wband = jnp.where(valid, vals, 0.0).astype(bf16)                # (1152, 256)

    rr = jnp.arange(288) % 8
    b1r = jnp.where(rr < 6, params["conv1_b"][jnp.clip(rr, 0, 5)],
                    0.0).reshape(288, 1).astype(f32)

    # conv2 -> second band matrix (64, 288): rows widx2*16 + c2 (widx2=dy2*2+dx2),
    # columns indexed exactly like z's rows (a*6+b')*8 + c1.
    w2 = params["conv2_w"].astype(f32)                              # (16, 6, 5, 5)
    rows2 = jnp.arange(64)
    cc2 = rows2 % 16
    widx2 = rows2 // 16
    dy2 = widx2 // 2
    dx2 = widx2 % 2
    cols2 = jnp.arange(288)
    cin = cols2 % 8
    rest2 = cols2 // 8
    bpp = rest2 % 6
    aa = rest2 // 6
    i2 = aa[None, :] - dy2[:, None]
    j2 = bpp[None, :] - dx2[:, None]
    valid2 = (i2 >= 0) & (i2 < 5) & (j2 >= 0) & (j2 < 5) & (cin < 6)[None, :]
    vals2 = w2[cc2[:, None], jnp.clip(cin, 0, 5)[None, :],
               jnp.clip(i2, 0, 4), jnp.clip(j2, 0, 4)]
    w2band = jnp.where(valid2, vals2, 0.0).astype(bf16)             # (64, 288)
    b2c = params["conv2_b"].reshape(16, 1).astype(f32)

    # fc1: permute columns from torch (c2, P, Q) order to the kernel's (P, Q, c2).
    wf1 = params["fc1_w"].reshape(120, 16, 4, 4).astype(f32)
    wf1p = jnp.transpose(wf1, (0, 2, 3, 1)).reshape(120, 256).astype(bf16)
    bf1c = params["fc1_b"].reshape(120, 1).astype(f32)
    wf2 = params["fc2_w"].astype(bf16)                              # (84, 120)
    bf2c = params["fc2_b"].reshape(84, 1).astype(f32)

    ncls = params["fc3_w"].shape[0]
    cls_pad = max(8, 8 * ((ncls + 7) // 8))
    wf3p = jnp.zeros((cls_pad, 84), f32).at[:ncls].set(
        params["fc3_w"].astype(f32)).astype(bf16)
    bf3p = jnp.zeros((cls_pad, 1), f32).at[:ncls, 0].set(params["fc3_b"].astype(f32))

    return dict(wband=wband, b1r=b1r, w2band=w2band, b2=b2c, wf1=wf1p, bf1=bf1c,
                wf2=wf2, bf2=bf2c, wf3=wf3p, bf3=bf3p)


# ----------------------------------------------------------------------------
# Forward pass
# ----------------------------------------------------------------------------
@functools.partial(jax.jit, static_argnames=("num_classes",))
def lenet5_forward(prepped, x, *, num_classes=10):
    B = x.shape[0]
    assert x.shape[1:] == (1, 28, 28)
    TB = _pick_tb(B)
    LN = 16 * TB
    nt = -(-B // TB)
    bp = nt * TB
    x2 = x.reshape(B, 28, 28).astype(jnp.float32)
    if bp != B:
        x2 = jnp.pad(x2, ((0, bp - B), (0, 0), (0, 0)))

    # Space-to-depth(4) via 16 static overlapping 16x16 window slices + one
    # transpose (no XLA gather):
    #   xd[t, kr*16+kc, (P*4+Q)*TB + b] = x[t*TB+b, 4P+kr, 4Q+kc]
    parts = [x2[:, 4 * p:4 * p + 16, 4 * q:4 * q + 16]
             for p in range(4) for q in range(4)]                   # 16 x (bp,16,16)
    xg = jnp.stack(parts, axis=1).reshape(nt, TB, 16, 16, 16)       # (nt,TB,pq,kr,kc)
    xd = jnp.transpose(xg, (0, 3, 4, 2, 1)).reshape(nt, 256, LN)
    xd = xd.astype(jnp.bfloat16)

    cls_pad = prepped["wf3"].shape[0]
    kernel = functools.partial(_lenet5_kernel, tb=TB)

    flops = 2 * nt * (4 * 288 * 256 * LN + 64 * 288 * LN
                      + (120 * 256 + 84 * 120 + cls_pad * 84) * TB)
    bytes_accessed = (2 * int(xd.size)
                      + sum(int(v.size) * v.dtype.itemsize for v in prepped.values())
                      + 4 * nt * cls_pad * TB)

    out = pl.pallas_call(
        kernel,
        out_shape=jax.ShapeDtypeStruct((nt, cls_pad, TB), jnp.float32),
        grid=(nt,),
        in_specs=[
            pl.BlockSpec((1, 256, LN), lambda t: (t, 0, 0)),     # input phases (bf16)
            pl.BlockSpec((4 * 288, 256), lambda t: (0, 0)),      # conv1 band matrix (bf16)
            pl.BlockSpec((288, 1), lambda t: (0, 0)),            # conv1 bias (f32, tiled)
            pl.BlockSpec((64, 288), lambda t: (0, 0)),           # conv2 band matrix (bf16)
            pl.BlockSpec((16, 1), lambda t: (0, 0)),             # conv2 bias (f32)
            pl.BlockSpec((120, 256), lambda t: (0, 0)),          # fc1 weight (bf16, permuted)
            pl.BlockSpec((120, 1), lambda t: (0, 0)),            # fc1 bias
            pl.BlockSpec((84, 120), lambda t: (0, 0)),           # fc2 weight (bf16)
            pl.BlockSpec((84, 1), lambda t: (0, 0)),             # fc2 bias
            pl.BlockSpec((cls_pad, 84), lambda t: (0, 0)),       # fc3 weight (bf16, padded)
            pl.BlockSpec((cls_pad, 1), lambda t: (0, 0)),        # fc3 bias (padded)
        ],
        out_specs=pl.BlockSpec((1, cls_pad, TB), lambda t: (t, 0, 0)),
        compiler_params=pltpu.CompilerParams(
            dimension_semantics=("parallel",),
            vmem_limit_bytes=32 * 1024 * 1024,   # well within v7x's 64 MiB physical
        ),
        cost_estimate=pl.CostEstimate(
            flops=int(flops), transcendentals=0,
            bytes_accessed=int(bytes_accessed)),
    )(xd, prepped["wband"], prepped["b1r"], prepped["w2band"], prepped["b2"],
      prepped["wf1"], prepped["bf1"], prepped["wf2"], prepped["bf2"],
      prepped["wf3"], prepped["bf3"])

    out = jnp.transpose(out, (0, 2, 1)).reshape(bp, cls_pad)
    return out[:B, :num_classes]


# ----------------------------------------------------------------------------
# Pure-JAX f32 reference (mirrors the torch module) for a tolerance check
# ----------------------------------------------------------------------------
def _lenet5_reference(params, x):
    f32 = jnp.float32
    hi = jax.lax.Precision.HIGHEST
    dn = ("NCHW", "OIHW", "NCHW")

    def maxpool2(y):
        n, c, h, w = y.shape
        return y.reshape(n, c, h // 2, 2, w // 2, 2).max(axis=(3, 5))

    y = jax.lax.conv_general_dilated(x.astype(f32), params["conv1_w"].astype(f32),
                                     (1, 1), "VALID", dimension_numbers=dn,
                                     precision=hi)
    y = jnp.maximum(y + params["conv1_b"].reshape(1, -1, 1, 1), 0.0)
    y = maxpool2(y)
    y = jax.lax.conv_general_dilated(y, params["conv2_w"].astype(f32),
                                     (1, 1), "VALID", dimension_numbers=dn,
                                     precision=hi)
    y = jnp.maximum(y + params["conv2_b"].reshape(1, -1, 1, 1), 0.0)
    y = maxpool2(y)
    y = y.reshape(y.shape[0], -1)
    y = jnp.maximum(jnp.dot(y, params["fc1_w"].T.astype(f32), precision=hi)
                    + params["fc1_b"], 0.0)
    y = jnp.maximum(jnp.dot(y, params["fc2_w"].T.astype(f32), precision=hi)
                    + params["fc2_b"], 0.0)
    return jnp.dot(y, params["fc3_w"].T.astype(f32), precision=hi) + params["fc3_b"]


# ----------------------------------------------------------------------------
# Parameter init (deterministic, torch-style uniform(-1/sqrt(fan_in), +))
# ----------------------------------------------------------------------------
def _uniform(key, shape, fan_in):
    bound = 1.0 / jnp.sqrt(jnp.float32(fan_in))
    return jax.random.uniform(key, shape, jnp.float32, -bound, bound)


def init_params(key, num_classes=10):
    ks = jax.random.split(key, 10)
    p = {}
    p["conv1_w"] = _uniform(ks[0], (6, 1, 5, 5), 1 * 5 * 5)
    p["conv1_b"] = _uniform(ks[1], (6,), 1 * 5 * 5)
    p["conv2_w"] = _uniform(ks[2], (16, 6, 5, 5), 6 * 5 * 5)
    p["conv2_b"] = _uniform(ks[3], (16,), 6 * 5 * 5)
    p["fc1_w"] = _uniform(ks[4], (120, 256), 256)   # torch (out, in)
    p["fc1_b"] = _uniform(ks[5], (120,), 256)
    p["fc2_w"] = _uniform(ks[6], (84, 120), 120)
    p["fc2_b"] = _uniform(ks[7], (84,), 120)
    p["fc3_w"] = _uniform(ks[8], (num_classes, 84), 84)
    p["fc3_b"] = _uniform(ks[9], (num_classes,), 84)
    return p


if __name__ == "__main__":
    key = jax.random.PRNGKey(0)
    k_param, k_x = jax.random.split(key)
    params = init_params(k_param, num_classes=10)
    prepped = prepare_params(params)        # one-time weight preparation
    # LeNet5 with fc1(256, ...) implies a 28x28 single-channel input.
    x = jax.random.normal(k_x, (2, 1, 28, 28), dtype=jnp.float32)
    out = lenet5_forward(prepped, x, num_classes=10)
    out = jax.block_until_ready(out)
    assert out.shape == (2, 10), out.shape
    # Numerical check vs the f32 reference (bf16 matmul operands -> ~1e-2 tol).
    ref = _lenet5_reference(params, x)
    err = float(jnp.max(jnp.abs(out - ref)))
    assert err < 6e-2, f"max|pallas - reference| = {err}"
    print("KERNEL_OK")
</pallas_src>

<mosaic_0001>
module attributes {stable_mosaic.version = 11 : i64} {
  func.func @_lenet5_kernel(%arg0: i32, %arg1: memref<1x256x256xbf16, #tpu.memory_space<vmem>>, %arg2: memref<1152x256xbf16, #tpu.memory_space<vmem>>, %arg3: memref<288x1xf32, #tpu.memory_space<vmem>>, %arg4: memref<64x288xbf16, #tpu.memory_space<vmem>>, %arg5: memref<16x1xf32, #tpu.memory_space<vmem>>, %arg6: memref<120x256xbf16, #tpu.memory_space<vmem>>, %arg7: memref<120x1xf32, #tpu.memory_space<vmem>>, %arg8: memref<84x120xbf16, #tpu.memory_space<vmem>>, %arg9: memref<84x1xf32, #tpu.memory_space<vmem>>, %arg10: memref<16x84xbf16, #tpu.memory_space<vmem>>, %arg11: memref<16x1xf32, #tpu.memory_space<vmem>>, %arg12: memref<1x16x16xf32, #tpu.memory_space<vmem>>) attributes {dimension_semantics = [#tpu.dimension_semantics<parallel>], iteration_bounds = array<i64: 1>, scalar_prefetch = 0 : i64, scratch_operands = 0 : i64, tpu.core_type = #tpu.core_type<tc>, window_params = [{transform_indices = @transform_0, window_bounds = array<i64: 1, 256, 256>}, {pipeline_mode = #tpu.pipeline_mode<synchronous>, transform_indices = @transform_1, window_bounds = array<i64: 1152, 256>}, {pipeline_mode = #tpu.pipeline_mode<synchronous>, transform_indices = @transform_2, window_bounds = array<i64: 288, 1>}, {pipeline_mode = #tpu.pipeline_mode<synchronous>, transform_indices = @transform_3, window_bounds = array<i64: 64, 288>}, {pipeline_mode = #tpu.pipeline_mode<synchronous>, transform_indices = @transform_4, window_bounds = array<i64: 16, 1>}, {pipeline_mode = #tpu.pipeline_mode<synchronous>, transform_indices = @transform_5, window_bounds = array<i64: 120, 256>}, {pipeline_mode = #tpu.pipeline_mode<synchronous>, transform_indices = @transform_6, window_bounds = array<i64: 120, 1>}, {pipeline_mode = #tpu.pipeline_mode<synchronous>, transform_indices = @transform_7, window_bounds = array<i64: 84, 120>}, {pipeline_mode = #tpu.pipeline_mode<synchronous>, transform_indices = @transform_8, window_bounds = array<i64: 84, 1>}, {pipeline_mode = #tpu.pipeline_mode<synchronous>, transform_indices = @transform_9, window_bounds = array<i64: 16, 84>}, {pipeline_mode = #tpu.pipeline_mode<synchronous>, transform_indices = @transform_10, window_bounds = array<i64: 16, 1>}, {transform_indices = @transform_11, window_bounds = array<i64: 1, 16, 16>}]} {
    %c0 = arith.constant 0 : index
    %c0_0 = arith.constant 0 : index
    %c0_1 = arith.constant 0 : index
    %0 = vector.load %arg1[%c0, %c0_0, %c0_1] : memref<1x256x256xbf16, #tpu.memory_space<vmem>>, vector<1x256x256xbf16>
    %1 = vector.shape_cast %0 : vector<1x256x256xbf16> to vector<256x256xbf16>
    %c0_2 = arith.constant 0 : index
    %c0_3 = arith.constant 0 : index
    %2 = vector.load %arg2[%c0_2, %c0_3] : memref<1152x256xbf16, #tpu.memory_space<vmem>>, vector<288x256xbf16>
    %cst = arith.constant dense<0.000000e+00> : vector<288x256xf32>
    %3 = tpu.matmul %2, %1, %cst {dimension_numbers = #tpu.dot_dimension_numbers<[1], [0], [0], [1], [0, 0, 1, 1], [], []>} : vector<288x256xbf16>, vector<256x256xbf16>, vector<288x256xf32> -> vector<288x256xf32>
    %c288 = arith.constant 288 : index
    %c0_4 = arith.constant 0 : index
    %4 = vector.load %arg2[%c288, %c0_4] : memref<1152x256xbf16, #tpu.memory_space<vmem>>, vector<288x256xbf16>
    %cst_5 = arith.constant dense<0.000000e+00> : vector<288x256xf32>
    %5 = tpu.matmul %4, %1, %cst_5 {dimension_numbers = #tpu.dot_dimension_numbers<[1], [0], [0], [1], [0, 0, 1, 1], [], []>} : vector<288x256xbf16>, vector<256x256xbf16>, vector<288x256xf32> -> vector<288x256xf32>
    %6 = arith.maximumf %3, %5 : vector<288x256xf32>
    %c576 = arith.constant 576 : index
    %c0_6 = arith.constant 0 : index
    %7 = vector.load %arg2[%c576, %c0_6] : memref<1152x256xbf16, #tpu.memory_space<vmem>>, vector<288x256xbf16>
    %cst_7 = arith.constant dense<0.000000e+00> : vector<288x256xf32>
    %8 = tpu.matmul %7, %1, %cst_7 {dimension_numbers = #tpu.dot_dimension_numbers<[1], [0], [0], [1], [0, 0, 1, 1], [], []>} : vector<288x256xbf16>, vector<256x256xbf16>, vector<288x256xf32> -> vector<288x256xf32>
    %9 = arith.maximumf %6, %8 : vector<288x256xf32>
    %c864 = arith.constant 864 : index
    %c0_8 = arith.constant 0 : index
    %10 = vector.load %arg2[%c864, %c0_8] : memref<1152x256xbf16, #tpu.memory_space<vmem>>, vector<288x256xbf16>
    %cst_9 = arith.constant dense<0.000000e+00> : vector<288x256xf32>
    %11 = tpu.matmul %10, %1, %cst_9 {dimension_numbers = #tpu.dot_dimension_numbers<[1], [0], [0], [1], [0, 0, 1, 1], [], []>} : vector<288x256xbf16>, vector<256x256xbf16>, vector<288x256xf32> -> vector<288x256xf32>
    %12 = arith.maximumf %9, %11 : vector<288x256xf32>
    %c0_10 = arith.constant 0 : index
    %c0_11 = arith.constant 0 : index
    %13 = vector.load %arg3[%c0_10, %c0_11] : memref<288x1xf32, #tpu.memory_space<vmem>>, vector<288x1xf32>
    %14 = vector.broadcast %13 : vector<288x1xf32> to vector<288x256xf32>
    %15 = arith.addf %12, %14 : vector<288x256xf32>
    %cst_12 = arith.constant 0.000000e+00 : f32
    %16 = vector.broadcast %cst_12 : f32 to vector<288x256xf32>
    %17 = arith.maximumf %15, %16 : vector<288x256xf32>
    %18 = arith.truncf %17 : vector<288x256xf32> to vector<288x256xbf16>
    %c0_13 = arith.constant 0 : index
    %c0_14 = arith.constant 0 : index
    %19 = vector.load %arg4[%c0_13, %c0_14] : memref<64x288xbf16, #tpu.memory_space<vmem>>, vector<64x288xbf16>
    %cst_15 = arith.constant dense<0.000000e+00> : vector<64x256xf32>
    %20 = tpu.matmul %19, %18, %cst_15 {dimension_numbers = #tpu.dot_dimension_numbers<[1], [0], [0], [1], [0, 0, 1, 1], [], []>} : vector<64x288xbf16>, vector<288x256xbf16>, vector<64x256xf32> -> vector<64x256xf32>
    %21 = vector.extract_strided_slice %20 {offsets = [0, 0], sizes = [16, 256], strides = [1, 1]} : vector<64x256xf32> to vector<16x256xf32>
    %22 = vector.extract_strided_slice %20 {offsets = [16, 0], sizes = [16, 256], strides = [1, 1]} : vector<64x256xf32> to vector<16x256xf32>
    %23 = arith.maximumf %21, %22 : vector<16x256xf32>
    %24 = vector.extract_strided_slice %20 {offsets = [32, 0], sizes = [16, 256], strides = [1, 1]} : vector<64x256xf32> to vector<16x256xf32>
    %25 = vector.extract_strided_slice %20 {offsets = [48, 0], sizes = [16, 256], strides = [1, 1]} : vector<64x256xf32> to vector<16x256xf32>
    %26 = arith.maximumf %24, %25 : vector<16x256xf32>
    %27 = arith.maximumf %23, %26 : vector<16x256xf32>
    %c0_16 = arith.constant 0 : index
    %c0_17 = arith.constant 0 : index
    %28 = vector.load %arg5[%c0_16, %c0_17] : memref<16x1xf32, #tpu.memory_space<vmem>>, vector<16x1xf32>
    %29 = vector.broadcast %28 : vector<16x1xf32> to vector<16x256xf32>
    %30 = arith.addf %27, %29 : vector<16x256xf32>
    %cst_18 = arith.constant 0.000000e+00 : f32
    %31 = vector.broadcast %cst_18 : f32 to vector<16x256xf32>
    %32 = arith.maximumf %30, %31 : vector<16x256xf32>
    %33 = vector.extract_strided_slice %32 {offsets = [0, 0], sizes = [16, 16], strides = [1, 1]} : vector<16x256xf32> to vector<16x16xf32>
    %34 = vector.extract_strided_slice %32 {offsets = [0, 16], sizes = [16, 16], strides = [1, 1]} : vector<16x256xf32> to vector<16x16xf32>
    %35 = vector.extract_strided_slice %32 {offsets = [0, 32], sizes = [16, 16], strides = [1, 1]} : vector<16x256xf32> to vector<16x16xf32>
    %36 = vector.extract_strided_slice %32 {offsets = [0, 48], sizes = [16, 16], strides = [1, 1]} : vector<16x256xf32> to vector<16x16xf32>
    %37 = vector.extract_strided_slice %32 {offsets = [0, 64], sizes = [16, 16], strides = [1, 1]} : vector<16x256xf32> to vector<16x16xf32>
    %38 = vector.extract_strided_slice %32 {offsets = [0, 80], sizes = [16, 16], strides = [1, 1]} : vector<16x256xf32> to vector<16x16xf32>
    %39 = vector.extract_strided_slice %32 {offsets = [0, 96], sizes = [16, 16], strides = [1, 1]} : vector<16x256xf32> to vector<16x16xf32>
    %40 = vector.extract_strided_slice %32 {offsets = [0, 112], sizes = [16, 16], strides = [1, 1]} : vector<16x256xf32> to vector<16x16xf32>
    %41 = vector.extract_strided_slice %32 {offsets = [0, 128], sizes = [16, 16], strides = [1, 1]} : vector<16x256xf32> to vector<16x16xf32>
    %42 = vector.extract_strided_slice %32 {offsets = [0, 144], sizes = [16, 16], strides = [1, 1]} : vector<16x256xf32> to vector<16x16xf32>
    %43 = vector.extract_strided_slice %32 {offsets = [0, 160], sizes = [16, 16], strides = [1, 1]} : vector<16x256xf32> to vector<16x16xf32>
    %44 = vector.extract_strided_slice %32 {offsets = [0, 176], sizes = [16, 16], strides = [1, 1]} : vector<16x256xf32> to vector<16x16xf32>
    %45 = vector.extract_strided_slice %32 {offsets = [0, 192], sizes = [16, 16], strides = [1, 1]} : vector<16x256xf32> to vector<16x16xf32>
    %46 = vector.extract_strided_slice %32 {offsets = [0, 208], sizes = [16, 16], strides = [1, 1]} : vector<16x256xf32> to vector<16x16xf32>
    %47 = vector.extract_strided_slice %32 {offsets = [0, 224], sizes = [16, 16], strides = [1, 1]} : vector<16x256xf32> to vector<16x16xf32>
    %48 = vector.extract_strided_slice %32 {offsets = [0, 240], sizes = [16, 16], strides = [1, 1]} : vector<16x256xf32> to vector<16x16xf32>
    %49 = tpu.concatenate %33, %34, %35, %36, %37, %38, %39, %40, %41, %42, %43, %44, %45, %46, %47, %48 in 0 : vector<16x16xf32>, vector<16x16xf32>, vector<16x16xf32>, vector<16x16xf32>, vector<16x16xf32>, vector<16x16xf32>, vector<16x16xf32>, vector<16x16xf32>, vector<16x16xf32>, vector<16x16xf32>, vector<16x16xf32>, vector<16x16xf32>, vector<16x16xf32>, vector<16x16xf32>, vector<16x16xf32>, vector<16x16xf32> -> vector<256x16xf32>
    %50 = arith.truncf %49 : vector<256x16xf32> to vector<256x16xbf16>
    %c0_19 = arith.constant 0 : index
    %c0_20 = arith.constant 0 : index
    %51 = vector.load %arg6[%c0_19, %c0_20] : memref<120x256xbf16, #tpu.memory_space<vmem>>, vector<120x256xbf16>
    %cst_21 = arith.constant dense<0.000000e+00> : vector<120x16xf32>
    %52 = tpu.matmul %51, %50, %cst_21 {dimension_numbers = #tpu.dot_dimension_numbers<[1], [0], [0], [1], [0, 0, 1, 1], [], []>} : vector<120x256xbf16>, vector<256x16xbf16>, vector<120x16xf32> -> vector<120x16xf32>
    %c0_22 = arith.constant 0 : index
    %c0_23 = arith.constant 0 : index
    %53 = vector.load %arg7[%c0_22, %c0_23] : memref<120x1xf32, #tpu.memory_space<vmem>>, vector<120x1xf32>
    %54 = vector.broadcast %53 : vector<120x1xf32> to vector<120x16xf32>
    %55 = arith.addf %52, %54 : vector<120x16xf32>
    %cst_24 = arith.constant 0.000000e+00 : f32
    %56 = vector.broadcast %cst_24 : f32 to vector<120x16xf32>
    %57 = arith.maximumf %55, %56 : vector<120x16xf32>
    %58 = arith.truncf %57 : vector<120x16xf32> to vector<120x16xbf16>
    %c0_25 = arith.constant 0 : index
    %c0_26 = arith.constant 0 : index
    %59 = vector.load %arg8[%c0_25, %c0_26] : memref<84x120xbf16, #tpu.memory_space<vmem>>, vector<84x120xbf16>
    %cst_27 = arith.constant dense<0.000000e+00> : vector<84x16xf32>
    %60 = tpu.matmul %59, %58, %cst_27 {dimension_numbers = #tpu.dot_dimension_numbers<[1], [0], [0], [1], [0, 0, 1, 1], [], []>} : vector<84x120xbf16>, vector<120x16xbf16>, vector<84x16xf32> -> vector<84x16xf32>
    %c0_28 = arith.constant 0 : index
    %c0_29 = arith.constant 0 : index
    %61 = vector.load %arg9[%c0_28, %c0_29] : memref<84x1xf32, #tpu.memory_space<vmem>>, vector<84x1xf32>
    %62 = vector.broadcast %61 : vector<84x1xf32> to vector<84x16xf32>
    %63 = arith.addf %60, %62 : vector<84x16xf32>
    %cst_30 = arith.constant 0.000000e+00 : f32
    %64 = vector.broadcast %cst_30 : f32 to vector<84x16xf32>
    %65 = arith.maximumf %63, %64 : vector<84x16xf32>
    %66 = arith.truncf %65 : vector<84x16xf32> to vector<84x16xbf16>
    %c0_31 = arith.constant 0 : index
    %c0_32 = arith.constant 0 : index
    %67 = vector.load %arg10[%c0_31, %c0_32] : memref<16x84xbf16, #tpu.memory_space<vmem>>, vector<16x84xbf16>
    %cst_33 = arith.constant dense<0.000000e+00> : vector<16x16xf32>
    %68 = tpu.matmul %67, %66, %cst_33 {dimension_numbers = #tpu.dot_dimension_numbers<[1], [0], [0], [1], [0, 0, 1, 1], [], []>} : vector<16x84xbf16>, vector<84x16xbf16>, vector<16x16xf32> -> vector<16x16xf32>
    %c0_34 = arith.constant 0 : index
    %c0_35 = arith.constant 0 : index
    %69 = vector.load %arg11[%c0_34, %c0_35] : memref<16x1xf32, #tpu.memory_space<vmem>>, vector<16x1xf32>
    %70 = vector.broadcast %69 : vector<16x1xf32> to vector<16x16xf32>
    %71 = arith.addf %68, %70 : vector<16x16xf32>
    %c0_36 = arith.constant 0 : index
    %c0_37 = arith.constant 0 : index
    %c0_38 = arith.constant 0 : index
    %72 = vector.load %arg12[%c0_36, %c0_37, %c0_38] : memref<1x16x16xf32, #tpu.memory_space<vmem>>, vector<1x16x16xf32>
    %73 = vector.shape_cast %72 : vector<1x16x16xf32> to vector<16x16xf32>
    %74 = vector.shape_cast %71 : vector<16x16xf32> to vector<1x16x16xf32>
    tpu.vector_store %arg12[%c0_36, %c0_37, %c0_38], %74 {strides = array<i32>} : memref<1x16x16xf32, #tpu.memory_space<vmem>>, vector<1x16x16xf32>,
    return
  }
  func.func @transform_0(%arg0: i32) -> (i32, i32, i32) {
    %c0_i32 = arith.constant 0 : i32
    %c0_i32_0 = arith.constant 0 : i32
    %c0_i32_1 = arith.constant 0 : i32
    return %arg0, %c0_i32, %c0_i32_0 : i32, i32, i32
  }
  func.func @transform_1(%arg0: i32) -> (i32, i32) {
    %c0_i32 = arith.constant 0 : i32
    %c0_i32_0 = arith.constant 0 : i32
    %c0_i32_1 = arith.constant 0 : i32
    return %c0_i32, %c0_i32_0 : i32, i32
  }
  func.func @transform_2(%arg0: i32) -> (i32, i32) {
    %c0_i32 = arith.constant 0 : i32
    %c0_i32_0 = arith.constant 0 : i32
    %c0_i32_1 = arith.constant 0 : i32
    return %c0_i32, %c0_i32_0 : i32, i32
  }
  func.func @transform_3(%arg0: i32) -> (i32, i32) {
    %c0_i32 = arith.constant 0 : i32
    %c0_i32_0 = arith.constant 0 : i32
    %c0_i32_1 = arith.constant 0 : i32
    return %c0_i32, %c0_i32_0 : i32, i32
  }
  func.func @transform_4(%arg0: i32) -> (i32, i32) {
    %c0_i32 = arith.constant 0 : i32
    %c0_i32_0 = arith.constant 0 : i32
    %c0_i32_1 = arith.constant 0 : i32
    return %c0_i32, %c0_i32_0 : i32, i32
  }
  func.func @transform_5(%arg0: i32) -> (i32, i32) {
    %c0_i32 = arith.constant 0 : i32
    %c0_i32_0 = arith.constant 0 : i32
    %c0_i32_1 = arith.constant 0 : i32
    return %c0_i32, %c0_i32_0 : i32, i32
  }
  func.func @transform_6(%arg0: i32) -> (i32, i32) {
    %c0_i32 = arith.constant 0 : i32
    %c0_i32_0 = arith.constant 0 : i32
    %c0_i32_1 = arith.constant 0 : i32
    return %c0_i32, %c0_i32_0 : i32, i32
  }
  func.func @transform_7(%arg0: i32) -> (i32, i32) {
    %c0_i32 = arith.constant 0 : i32
    %c0_i32_0 = arith.constant 0 : i32
    %c0_i32_1 = arith.constant 0 : i32
    return %c0_i32, %c0_i32_0 : i32, i32
  }
  func.func @transform_8(%arg0: i32) -> (i32, i32) {
    %c0_i32 = arith.constant 0 : i32
    %c0_i32_0 = arith.constant 0 : i32
    %c0_i32_1 = arith.constant 0 : i32
    return %c0_i32, %c0_i32_0 : i32, i32
  }
  func.func @transform_9(%arg0: i32) -> (i32, i32) {
    %c0_i32 = arith.constant 0 : i32
    %c0_i32_0 = arith.constant 0 : i32
    %c0_i32_1 = arith.constant 0 : i32
    return %c0_i32, %c0_i32_0 : i32, i32
  }
  func.func @transform_10(%arg0: i32) -> (i32, i32) {
    %c0_i32 = arith.constant 0 : i32
    %c0_i32_0 = arith.constant 0 : i32
    %c0_i32_1 = arith.constant 0 : i32
    return %c0_i32, %c0_i32_0 : i32, i32
  }
  func.func @transform_11(%arg0: i32) -> (i32, i32, i32) {
    %c0_i32 = arith.constant 0 : i32
    %c0_i32_0 = arith.constant 0 : i32
    %c0_i32_1 = arith.constant 0 : i32
    return %arg0, %c0_i32, %c0_i32_0 : i32, i32, i32
  }
}

</mosaic_0001>

<bundles_post_ra>
// kernel: lenet5_forward.1
= control target key start
LH: loop header
LB: loop body
LE: loop exit
PB: predicated region body
PF: predicated region fallthrough
CT: control target
= control target key end

     0   :  { %vm2635_vm0 = vcmask 261120   ;;  %s4293_s17 = smov 96   ;;  %s4294_s18 = smov 80   ;;  %vm3336_vm1 = vcmask 982016   ;;  %vm3355_vm2 = vcmask 1043456   ;;  %vm4300_vm3 = vmmov 0   ;;  %s6054_s0 = inlined_call_operand.vmem [shape: bf16[1,256,256], index: 0, kind: input, shape index: {}]   ;;  %s6055_s1 = inlined_call_operand.vmem [shape: bf16[1152,256], index: 1, kind: input, shape index: {}]   ;;  %s6056_s2 = inlined_call_operand.vmem [shape: f32[288,1], index: 2, kind: input, shape index: {}]   ;;  %s6057_s4 = inlined_call_operand.vmem [shape: f32[16,1], index: 4, kind: input, shape index: {}]   ;;  %s6058_s3 = inlined_call_operand.vmem [shape: bf16[64,288], index: 3, kind: input, shape index: {}]   ;;  %s6059_s5 = inlined_call_operand.vmem [shape: bf16[120,256], index: 5, kind: input, shape index: {}]   ;;  %s6060_s6 = inlined_call_operand.vmem [shape: f32[120,1], index: 6, kind: input, shape index: {}]   ;;  %s6061_s8 = inlined_call_operand.vmem [shape: f32[84,1], index: 8, kind: input, shape index: {}]   ;;  %s6062_s10 = inlined_call_operand.vmem [shape: f32[16,1], index: 10, kind: input, shape index: {}]   ;;  %s6063_s7 = inlined_call_operand.vmem [shape: bf16[84,120], index: 7, kind: input, shape index: {}]   ;;  %s6064_s9 = inlined_call_operand.vmem [shape: bf16[16,84], index: 9, kind: input, shape index: {}]   ;;  %s6065_s11 = inlined_call_operand.vmem [shape: f32[1,16,16], index: 11, kind: output, shape index: {}]  }
   0x1   :  { %v4364_v0 = vld [vmem:[%s6054_s0 + $0x4] ss:$8 sps:$4 sm:$0xff]   ;;  %v4369_v1 = vld [vmem:[%s6054_s0] ss:$8 sps:$4 sm:$0xff]   ;;  %v4376_v2 = vld [vmem:[%s6054_s0 + $0x14] ss:$8 sps:$4 sm:$0xff]  }
   0x2   :  { %447 = vmatprep.subr.bf16.mxu0 %v4364_v0  ;;  %876 = vmatprep.subr.bf16.mxu1 %v4364_v0  ;;  %v4383_v3 = vld [vmem:[%s6054_s0 + $0x10] ss:$8 sps:$4 sm:$0xff]   ;;  %v4390_v4 = vld [vmem:[%s6054_s0 + $0x24] ss:$8 sps:$4 sm:$0xff]   ;;  %v4397_v5 = vld [vmem:[%s6054_s0 + $0x20] ss:$8 sps:$4 sm:$0xff]  }
   0x3   :  { %448 = vmatpush1.bf16.msra.mxu0 %v4369_v1  ;;  %877 = vmatpush1.bf16.msra.mxu1 %v4369_v1  ;;  %v4404_v6 = vld [vmem:[%s6054_s0 + $0x34] ss:$8 sps:$4 sm:$0xff]   ;;  %v4411_v7 = vld [vmem:[%s6054_s0 + $0x30] ss:$8 sps:$4 sm:$0xff]   ;;  %v4418_v8 = vld [vmem:[%s6054_s0 + $0x44] ss:$8 sps:$4 sm:$0xff]  }
   0x4   :  { %449 = vmatprep.subr.bf16.mxu0 %v4376_v2  ;;  %878 = vmatprep.subr.bf16.mxu1 %v4376_v2  ;;  %v4425_v9 = vld [vmem:[%s6054_s0 + $0x40] ss:$8 sps:$4 sm:$0xff]   ;;  %v4432_v10 = vld [vmem:[%s6054_s0 + $0x54] ss:$8 sps:$4 sm:$0xff]   ;;  %v4439_v11 = vld [vmem:[%s6054_s0 + $0x50] ss:$8 sps:$4 sm:$0xff]  }
   0x5   :  { %v4446_v12 = vld [vmem:[%s6054_s0 + $0x64] ss:$8 sps:$4 sm:$0xff]   ;;  %v4456_v14 = vld [vmem:[%s6054_s0 + $0x60] ss:$8 sps:$4 sm:$0xff]   ;;  %v4466_v16 = vld [vmem:[%s6054_s0 + $0x74] ss:$8 sps:$4 sm:$0xff]  }
   0x6   :  { %v4031_v13 = vld [vmem:[%s6055_s1 + $0x4] ss:$8 sps:$4 sm:$0xff]   ;;  %v4473_v17 = vld [vmem:[%s6054_s0 + $0x70] ss:$8 sps:$4 sm:$0xff]   ;;  %v4487_v19 = vld [vmem:[%s6054_s0 + $0x80] ss:$8 sps:$4 sm:$0xff]  }
   0x7   :  { %450 = vmatpush1.bf16.msra.mxu0 %v4383_v3  ;;  %879 = vmatpush1.bf16.msra.mxu1 %v4383_v3  ;;  %v4034_v15 = vld [vmem:[%s6055_s1 + $0x124] ss:$8 sps:$4 sm:$0xff]   ;;  %v4494_v20 = vld [vmem:[%s6054_s0 + $0x94] ss:$8 sps:$4 sm:$0xff]   ;;  %v4501_v21 = vld [vmem:[%s6054_s0 + $0x90] ss:$8 sps:$4 sm:$0xff]  }
   0x8   :  { %451 = vmatprep.subr.bf16.mxu0 %v4390_v4  ;;  %880 = vmatprep.subr.bf16.mxu1 %v4390_v4  ;;  %v4480_v18 = vld [vmem:[%s6054_s0 + $0x84] ss:$8 sps:$4 sm:$0xff]   ;;  %v4515_v23 = vld [vmem:[%s6054_s0 + $0xa0] ss:$8 sps:$4 sm:$0xff]   ;;  %v4522_v24 = vld [vmem:[%s6054_s0 + $0xb4] ss:$8 sps:$4 sm:$0xff]  }
   0x9   :  { %479 = vmatprep.mubr.bf16.mxu0 %v4031_v13  ;;  %908 = vmatprep.mubr.bf16.mxu1 %v4034_v15  ;;  %v4508_v22 = vld [vmem:[%s6054_s0 + $0xa4] ss:$8 sps:$4 sm:$0xff]   ;;  %v4529_v25 = vld [vmem:[%s6054_s0 + $0xb0] ss:$8 sps:$4 sm:$0xff]   ;;  %v4543_v27 = vld [vmem:[%s6054_s0 + $0xc0] ss:$8 sps:$4 sm:$0xff]  }
   0xa   :  { %v4536_v26 = vld [vmem:[%s6054_s0 + $0xc4] ss:$8 sps:$4 sm:$0xff]   ;;  %v4550_v28 = vld [vmem:[%s6054_s0 + $0xd4] ss:$8 sps:$4 sm:$0xff]   ;;  %v4557_v29 = vld [vmem:[%s6054_s0 + $0xd0] ss:$8 sps:$4 sm:$0xff]  }
   0xb   :  { %452 = vmatpush1.bf16.msra.mxu0 %v4397_v5  ;;  %881 = vmatpush1.bf16.msra.mxu1 %v4397_v5  ;;  %v4564_v30 = vld [vmem:[%s6054_s0 + $0xe4] ss:$8 sps:$4 sm:$0xff]   ;;  %v4571_v31 = vld [vmem:[%s6054_s0 + $0xe0] ss:$8 sps:$4 sm:$0xff]   ;;  %v4578_v32 = vld [vmem:[%s6054_s0 + $0xf4] ss:$8 sps:$4 sm:$0xff]  }
   0xc   :  { %453 = vmatprep.subr.bf16.mxu0 %v4404_v6  ;;  %882 = vmatprep.subr.bf16.mxu1 %v4404_v6  ;;  %v4585_v33 = vld [vmem:[%s6054_s0 + $0xf0] ss:$8 sps:$4 sm:$0xff]   ;;  %v4029_v34 = vld [vmem:[%s6055_s1] ss:$8 sps:$4 sm:$0xff]   ;;  %v4035_v36 = vld [vmem:[%s6055_s1 + $0x14] ss:$8 sps:$4 sm:$0xff]  }
   0xd   :  { %v4032_v35 = vld [vmem:[%s6055_s1 + $0x120] ss:$8 sps:$4 sm:$0xff]   ;;  %v4037_v37 = vld [vmem:[%s6055_s1 + $0x134] ss:$8 sps:$4 sm:$0xff]   ;;  %v4039_v38 = vld [vmem:[%s6055_s1 + $0x10] ss:$8 sps:$4 sm:$0xff]  }
   0xe   :  { %v4040_v39 = vld [vmem:[%s6055_s1 + $0x130] ss:$8 sps:$4 sm:$0xff]   ;;  %v4041_v40 = vld [vmem:[%s6055_s1 + $0x24] ss:$8 sps:$4 sm:$0xff]   ;;  %v4045_v42 = vld [vmem:[%s6055_s1 + $0x20] ss:$8 sps:$4 sm:$0xff]  }
   0xf   :  { %454 = vmatpush1.bf16.msra.mxu0 %v4411_v7  ;;  %883 = vmatpush1.bf16.msra.mxu1 %v4411_v7  ;;  %v4043_v41 = vld [vmem:[%s6055_s1 + $0x144] ss:$8 sps:$4 sm:$0xff]   ;;  %v4046_v43 = vld [vmem:[%s6055_s1 + $0x140] ss:$8 sps:$4 sm:$0xff]   ;;  %v4047_v44 = vld [vmem:[%s6055_s1 + $0x34] ss:$8 sps:$4 sm:$0xff]  }
  0x10   :  { %455 = vmatprep.subr.bf16.mxu0 %v4418_v8  ;;  %884 = vmatprep.subr.bf16.mxu1 %v4418_v8  ;;  %v4049_v45 = vld [vmem:[%s6055_s1 + $0x154] ss:$8 sps:$4 sm:$0xff]   ;;  %v4051_v46 = vld [vmem:[%s6055_s1 + $0x30] ss:$8 sps:$4 sm:$0xff]   ;;  %v4053_v48 = vld [vmem:[%s6055_s1 + $0x44] ss:$8 sps:$4 sm:$0xff]  }
  0x11   :  { %v4052_v47 = vld [vmem:[%s6055_s1 + $0x150] ss:$8 sps:$4 sm:$0xff]   ;;  %v4055_v49 = vld [vmem:[%s6055_s1 + $0x164] ss:$8 sps:$4 sm:$0xff]   ;;  %v4057_v50 = vld [vmem:[%s6055_s1 + $0x40] ss:$8 sps:$4 sm:$0xff]  }
  0x12   :  { %v4058_v51 = vld [vmem:[%s6055_s1 + $0x160] ss:$8 sps:$4 sm:$0xff]   ;;  %v4059_v52 = vld [vmem:[%s6055_s1 + $0x54] ss:$8 sps:$4 sm:$0xff]   ;;  %v4063_v54 = vld [vmem:[%s6055_s1 + $0x50] ss:$8 sps:$4 sm:$0xff]  }
  0x13   :  { %456 = vmatpush1.bf16.msra.mxu0 %v4425_v9  ;;  %885 = vmatpush1.bf16.msra.mxu1 %v4425_v9  ;;  %v4061_v53 = vld [vmem:[%s6055_s1 + $0x174] ss:$8 sps:$4 sm:$0xff]   ;;  %v4064_v55 = vld [vmem:[%s6055_s1 + $0x170] ss:$8 sps:$4 sm:$0xff]   ;;  %v4065_v56 = vld [vmem:[%s6055_s1 + $0x64] ss:$8 sps:$4 sm:$0xff]  }
  0x14   :  { %457 = vmatprep.subr.bf16.mxu0 %v4432_v10  ;;  %886 = vmatprep.subr.bf16.mxu1 %v4432_v10  ;;  %v4067_v57 = vld [vmem:[%s6055_s1 + $0x184] ss:$8 sps:$4 sm:$0xff]   ;;  %v4069_v58 = vld [vmem:[%s6055_s1 + $0x60] ss:$8 sps:$4 sm:$0xff]   ;;  %v4071_v60 = vld [vmem:[%s6055_s1 + $0x74] ss:$8 sps:$4 sm:$0xff]  }
  0x15   :  { %v4070_v59 = vld [vmem:[%s6055_s1 + $0x180] ss:$8 sps:$4 sm:$0xff]   ;;  %v4073_v61 = vld [vmem:[%s6055_s1 + $0x194] ss:$8 sps:$4 sm:$0xff]   ;;  %v4075_v62 = vld [vmem:[%s6055_s1 + $0x70] ss:$8 sps:$4 sm:$0xff]  }
  0x16   :  { %v4076_v63 = vld [vmem:[%s6055_s1 + $0x190] ss:$8 sps:$4 sm:$0xff]   ;;  %v4097_v13 = vld [vmem:[%s6055_s1 + $0x1d4] ss:$8 sps:$4 sm:$0xff]   ;;  %s4295_s19 = smov 64   ;;  %s4296_s20 = smov 48  }
  0x17   :  { %458 = vmatpush1.bf16.msra.mxu0 %v4439_v11  ;;  %887 = vmatpush1.bf16.msra.mxu1 %v4439_v11  ;;  %v4100_v15 = vld [vmem:[%s6055_s1 + $0x1d0] ss:$8 sps:$4 sm:$0xff]   ;;  %s4297_s23 = smov 32   ;;  %s4298_s24 = smov 16   ;;  %vm3479_vm4 = vcmask 1041408   ;;  %vm3475_vm5 = vcmask 687104  }
  0x18   :  { %459 = vmatprep.subr.bf16.mxu0 %v4446_v12  ;;  %888 = vmatprep.subr.bf16.mxu1 %v4446_v12  ;;  %vm3524_vm6 = vcmask 130048  }
  0x1b   :  { %460 = vmatpush1.bf16.msra.mxu0 %v4456_v14  ;;  %889 = vmatpush1.bf16.msra.mxu1 %v4456_v14 }
  0x1c   :  { %461 = vmatprep.subr.bf16.mxu0 %v4466_v16  ;;  %890 = vmatprep.subr.bf16.mxu1 %v4466_v16 }
  0x1f   :  { %462 = vmatpush1.bf16.msra.mxu0 %v4473_v17  ;;  %891 = vmatpush1.bf16.msra.mxu1 %v4473_v17 }
  0x20   :  { %463 = vmatprep.subr.bf16.mxu0 %v4480_v18  ;;  %892 = vmatprep.subr.bf16.mxu1 %v4480_v18 }
  0x23   :  { %464 = vmatpush1.bf16.msra.mxu0 %v4487_v19  ;;  %893 = vmatpush1.bf16.msra.mxu1 %v4487_v19 }
  0x24   :  { %465 = vmatprep.subr.bf16.mxu0 %v4494_v20  ;;  %894 = vmatprep.subr.bf16.mxu1 %v4494_v20 }
  0x27   :  { %466 = vmatpush1.bf16.msra.mxu0 %v4501_v21  ;;  %895 = vmatpush1.bf16.msra.mxu1 %v4501_v21 }
  0x28   :  { %467 = vmatprep.subr.bf16.mxu0 %v4508_v22  ;;  %896 = vmatprep.subr.bf16.mxu1 %v4508_v22 }
  0x2b   :  { %468 = vmatpush1.bf16.msra.mxu0 %v4515_v23  ;;  %897 = vmatpush1.bf16.msra.mxu1 %v4515_v23 }
  0x2c   :  { %469 = vmatprep.subr.bf16.mxu0 %v4522_v24  ;;  %898 = vmatprep.subr.bf16.mxu1 %v4522_v24 }
  0x2f   :  { %470 = vmatpush1.bf16.msra.mxu0 %v4529_v25  ;;  %899 = vmatpush1.bf16.msra.mxu1 %v4529_v25 }
  0x30   :  { %471 = vmatprep.subr.bf16.mxu0 %v4536_v26  ;;  %900 = vmatprep.subr.bf16.mxu1 %v4536_v26 }
  0x33   :  { %472 = vmatpush1.bf16.msra.mxu0 %v4543_v27  ;;  %901 = vmatpush1.bf16.msra.mxu1 %v4543_v27 }
  0x34   :  { %473 = vmatprep.subr.bf16.mxu0 %v4550_v28  ;;  %902 = vmatprep.subr.bf16.mxu1 %v4550_v28 }
  0x37   :  { %474 = vmatpush1.bf16.msra.mxu0 %v4557_v29  ;;  %903 = vmatpush1.bf16.msra.mxu1 %v4557_v29 }
  0x38   :  { %475 = vmatprep.subr.bf16.mxu0 %v4564_v30  ;;  %904 = vmatprep.subr.bf16.mxu1 %v4564_v30 }
  0x3b   :  { %476 = vmatpush1.bf16.msra.mxu0 %v4571_v31  ;;  %905 = vmatpush1.bf16.msra.mxu1 %v4571_v31 }
  0x3c   :  { %477 = vmatprep.subr.bf16.mxu0 %v4578_v32  ;;  %906 = vmatprep.subr.bf16.mxu1 %v4578_v32 }
  0x3f   :  { %478 = vmatpush1.bf16.msra.mxu0 %v4585_v33  ;;  %907 = vmatpush1.bf16.msra.mxu1 %v4585_v33 }
  0x40   :  { %1377 = vmatprep.subr.bf16.mxu0 %v4364_v0  ;;  %1878 = vmatprep.subr.bf16.mxu1 %v4364_v0  ;;  %v4077_v0 = vld [vmem:[%s6055_s1 + $0x84] ss:$8 sps:$4 sm:$0xff]  }
  0x42   :  { %480 = vmatmul.mubr.bf16.vlgmr.msra.gmra.mrb[0].mxu0 %v4029_v34  ;;  %909 = vmatmul.mubr.bf16.vlgmr.msra.gmra.mrb[0].mxu1 %v4032_v35  ;;  %v2170_v34 = vld [vmem:[%s6056_s2 + $0x38] sm:$0xff]  ;;  %v2171_v35 = vld [vmem:[%s6056_s2 + $0x40] sm:$0xff] }
  0x43   :  { %489 = vmatprep.mubr.bf16.mxu0 %v4035_v36  ;;  %918 = vmatprep.mubr.bf16.mxu1 %v4037_v37  ;;  %v4117_v36 = vld [vmem:[%s6055_s1 + $0xe0] ss:$8 sps:$4 sm:$0xff]  }
  0x44   :  { %1378 = vmatpush1.bf16.msra.mxu0 %v4369_v1  ;;  %1879 = vmatpush1.bf16.msra.mxu1 %v4369_v1  ;;  %v4079_v1 = vld [vmem:[%s6055_s1 + $0x1a4] ss:$8 sps:$4 sm:$0xff]   ;;  %v4118_v37 = vld [vmem:[%s6055_s1 + $0x200] ss:$8 sps:$4 sm:$0xff]  }
  0x45   :  { %1379 = vmatprep.subr.bf16.mxu0 %v4376_v2  ;;  %1880 = vmatprep.subr.bf16.mxu1 %v4376_v2  ;;  %v4081_v2 = vld [vmem:[%s6055_s1 + $0x80] ss:$8 sps:$4 sm:$0xff]  }
  0x48   :  { %1380 = vmatpush1.bf16.msra.mxu0 %v4383_v3  ;;  %1881 = vmatpush1.bf16.msra.mxu1 %v4383_v3  ;;  %v4082_v3 = vld [vmem:[%s6055_s1 + $0x1a0] ss:$8 sps:$4 sm:$0xff]  }
  0x49   :  { %1381 = vmatprep.subr.bf16.mxu0 %v4390_v4  ;;  %1882 = vmatprep.subr.bf16.mxu1 %v4390_v4  ;;  %v4083_v4 = vld [vmem:[%s6055_s1 + $0x94] ss:$8 sps:$4 sm:$0xff]  }
  0x4a   :  { %490 = vmatmul.mubr.bf16.gmra.mrb[4].mxu0 %v4039_v38  ;;  %919 = vmatmul.mubr.bf16.gmra.mrb[4].mxu1 %v4040_v39  ;;  %v4119_v38 = vld [vmem:[%s6055_s1 + $0xf4] ss:$8 sps:$4 sm:$0xff]  }
  0x4b   :  { %499 = vmatprep.mubr.bf16.mxu0 %v4041_v40  ;;  %928 = vmatprep.mubr.bf16.mxu1 %v4043_v41  ;;  %v4121_v39 = vld [vmem:[%s6055_s1 + $0x214] ss:$8 sps:$4 sm:$0xff]   ;;  %v2172_v40 = vld [vmem:[%s6056_s2 + $0x48] sm:$0xff] }
  0x4c   :  { %1382 = vmatpush1.bf16.msra.mxu0 %v4397_v5  ;;  %1883 = vmatpush1.bf16.msra.mxu1 %v4397_v5  ;;  %v4085_v5 = vld [vmem:[%s6055_s1 + $0x1b4] ss:$8 sps:$4 sm:$0xff]  }
  0x4d   :  { %1383 = vmatprep.subr.bf16.mxu0 %v4404_v6  ;;  %1884 = vmatprep.subr.bf16.mxu1 %v4404_v6  ;;  %v4087_v6 = vld [vmem:[%s6055_s1 + $0x90] ss:$8 sps:$4 sm:$0xff]  }
  0x4e   :  { %v2173_v41 = vld [vmem:[%s6056_s2 + $0x50] sm:$0xff] }
  0x50   :  { %1384 = vmatpush1.bf16.msra.mxu0 %v4411_v7  ;;  %1885 = vmatpush1.bf16.msra.mxu1 %v4411_v7  ;;  %v4088_v7 = vld [vmem:[%s6055_s1 + $0x1b0] ss:$8 sps:$4 sm:$0xff]  }
  0x51   :  { %1385 = vmatprep.subr.bf16.mxu0 %v4418_v8  ;;  %1886 = vmatprep.subr.bf16.mxu1 %v4418_v8  ;;  %v4089_v8 = vld [vmem:[%s6055_s1 + $0xa4] ss:$8 sps:$4 sm:$0xff]  }
  0x52   :  { %500 = vmatmul.mubr.bf16.gmra.mrb[8].mxu0 %v4045_v42  ;;  %929 = vmatmul.mubr.bf16.gmra.mrb[8].mxu1 %v4046_v43  ;;  %v2174_v42 = vld [vmem:[%s6056_s2 + $0x58] sm:$0xff]  ;;  %v2175_v43 = vld [vmem:[%s6056_s2 + $0x60] sm:$0xff] }
  0x53   :  { %509 = vmatprep.mubr.bf16.mxu0 %v4047_v44  ;;  %938 = vmatprep.mubr.bf16.mxu1 %v4049_v45  ;;  %v4123_v44 = vld [vmem:[%s6055_s1 + $0xf0] ss:$8 sps:$4 sm:$0xff]  }
  0x54   :  { %1386 = vmatpush1.bf16.msra.mxu0 %v4425_v9  ;;  %1887 = vmatpush1.bf16.msra.mxu1 %v4425_v9  ;;  %v4091_v9 = vld [vmem:[%s6055_s1 + $0x1c4] ss:$8 sps:$4 sm:$0xff]   ;;  %v4124_v45 = vld [vmem:[%s6055_s1 + $0x210] ss:$8 sps:$4 sm:$0xff]  }
  0x55   :  { %1387 = vmatprep.subr.bf16.mxu0 %v4432_v10  ;;  %1888 = vmatprep.subr.bf16.mxu1 %v4432_v10  ;;  %v4093_v10 = vld [vmem:[%s6055_s1 + $0xa0] ss:$8 sps:$4 sm:$0xff]  }
  0x58   :  { %1388 = vmatpush1.bf16.msra.mxu0 %v4439_v11  ;;  %1889 = vmatpush1.bf16.msra.mxu1 %v4439_v11  ;;  %v4094_v11 = vld [vmem:[%s6055_s1 + $0x1c0] ss:$8 sps:$4 sm:$0xff]  }
  0x59   :  { %1389 = vmatprep.subr.bf16.mxu0 %v4446_v12  ;;  %1890 = vmatprep.subr.bf16.mxu1 %v4446_v12  ;;  %v4095_v12 = vld [vmem:[%s6055_s1 + $0xb4] ss:$8 sps:$4 sm:$0xff]  }
  0x5a   :  { %510 = vmatmul.mubr.bf16.gmra.mrb[12].mxu0 %v4051_v46  ;;  %939 = vmatmul.mubr.bf16.gmra.mrb[12].mxu1 %v4052_v47  ;;  %v4125_v46 = vld [vmem:[%s6055_s1 + $0x104] ss:$8 sps:$4 sm:$0xff]  }
  0x5b   :  { %519 = vmatprep.mubr.bf16.mxu0 %v4053_v48  ;;  %948 = vmatprep.mubr.bf16.mxu1 %v4055_v49  ;;  %v4127_v47 = vld [vmem:[%s6055_s1 + $0x224] ss:$8 sps:$4 sm:$0xff]   ;;  %v2177_v49 = vld [vmem:[%s6056_s2 + $0x70] sm:$0xff] }
  0x5c   :  { %1390 = vmatpush1.bf16.msra.mxu0 %v4456_v14  ;;  %1891 = vmatpush1.bf16.msra.mxu1 %v4456_v14  ;;  %v4099_v14 = vld [vmem:[%s6055_s1 + $0xb0] ss:$8 sps:$4 sm:$0xff]   ;;  %v2176_v48 = vld [vmem:[%s6056_s2 + $0x68] sm:$0xff] }
  0x5d   :  { %1391 = vmatprep.subr.bf16.mxu0 %v4466_v16  ;;  %1892 = vmatprep.subr.bf16.mxu1 %v4466_v16  ;;  %v4101_v16 = vld [vmem:[%s6055_s1 + $0xc4] ss:$8 sps:$4 sm:$0xff]  }
  0x60   :  { %1392 = vmatpush1.bf16.msra.mxu0 %v4473_v17  ;;  %1893 = vmatpush1.bf16.msra.mxu1 %v4473_v17  ;;  %v4103_v17 = vld [vmem:[%s6055_s1 + $0x1e4] ss:$8 sps:$4 sm:$0xff]  }
  0x61   :  { %1393 = vmatprep.subr.bf16.mxu0 %v4480_v18  ;;  %1894 = vmatprep.subr.bf16.mxu1 %v4480_v18  ;;  %v2163_v18 = vld [vmem:[%s6056_s2] sm:$0xff] }
  0x62   :  { %520 = vmatmul.mubr.bf16.gmra.mrb[16].mxu0 %v4057_v50  ;;  %949 = vmatmul.mubr.bf16.gmra.mrb[16].mxu1 %v4058_v51  ;;  %v2178_v50 = vld [vmem:[%s6056_s2 + $0x78] sm:$0xff]  ;;  %v2179_v51 = vld [vmem:[%s6056_s2 + $0x80] sm:$0xff] }
  0x63   :  { %529 = vmatprep.mubr.bf16.mxu0 %v4059_v52  ;;  %958 = vmatprep.mubr.bf16.mxu1 %v4061_v53  ;;  %v4129_v52 = vld [vmem:[%s6055_s1 + $0x100] ss:$8 sps:$4 sm:$0xff]  }
  0x64   :  { %1394 = vmatpush1.bf16.msra.mxu0 %v4487_v19  ;;  %1895 = vmatpush1.bf16.msra.mxu1 %v4487_v19  ;;  %v6066_v19 = vmov 0   ;;  %v4130_v53 = vld [vmem:[%s6055_s1 + $0x220] ss:$8 sps:$4 sm:$0xff]  }
  0x65   :  { %1395 = vmatprep.subr.bf16.mxu0 %v4494_v20  ;;  %1896 = vmatprep.subr.bf16.mxu1 %v4494_v20  ;;  %v4105_v20 = vld [vmem:[%s6055_s1 + $0xc0] ss:$8 sps:$4 sm:$0xff]  }
  0x66   :  { %3909 = vset.pattern.permute.xlu0 %v6066_v19  ;;  %3910 = vset.pattern.permute.xlu1 %v6066_v19  ;;  %v4229_v19 = vld [vmem:[%s6055_s1 + $0x454] ss:$8 sps:$4 sm:$0xff]  }
  0x67   :  { %2201 = vperm.xlu0 %3909, %v2163_v18   ;;  %v2194_v18 = vld [vmem:[%s6056_s2 + $0xf8] sm:$0xff] }
  0x68   :  { %1396 = vmatpush1.bf16.msra.mxu0 %v4501_v21  ;;  %1897 = vmatpush1.bf16.msra.mxu1 %v4501_v21  ;;  %v4106_v21 = vld [vmem:[%s6055_s1 + $0x1e0] ss:$8 sps:$4 sm:$0xff]  }
  0x69   :  { %1397 = vmatprep.subr.bf16.mxu0 %v4508_v22  ;;  %1898 = vmatprep.subr.bf16.mxu1 %v4508_v22  ;;  %v4107_v22 = vld [vmem:[%s6055_s1 + $0xd4] ss:$8 sps:$4 sm:$0xff]  }
  0x6a   :  { %530 = vmatmul.mubr.bf16.gmra.mrb[20].mxu0 %v4063_v54  ;;  %959 = vmatmul.mubr.bf16.gmra.mrb[20].mxu1 %v4064_v55  ;;  %v4131_v54 = vld [vmem:[%s6055_s1 + $0x114] ss:$8 sps:$4 sm:$0xff]  }
  0x6b   :  { %539 = vmatprep.mubr.bf16.mxu0 %v4065_v56  ;;  %968 = vmatprep.mubr.bf16.mxu1 %v4067_v57  ;;  %v4133_v55 = vld [vmem:[%s6055_s1 + $0x234] ss:$8 sps:$4 sm:$0xff]   ;;  %v2180_v56 = vld [vmem:[%s6056_s2 + $0x88] sm:$0xff] }
  0x6c   :  { %1398 = vmatpush1.bf16.msra.mxu0 %v4515_v23  ;;  %1899 = vmatpush1.bf16.msra.mxu1 %v4515_v23  ;;  %v4109_v23 = vld [vmem:[%s6055_s1 + $0x1f4] ss:$8 sps:$4 sm:$0xff]  }
  0x6d   :  { %1399 = vmatprep.subr.bf16.mxu0 %v4522_v24  ;;  %1900 = vmatprep.subr.bf16.mxu1 %v4522_v24  ;;  %v2165_v24 = vld [vmem:[%s6056_s2 + $0x10] sm:$0xff] }
  0x6e   :  { %2211 = vperm.xlu1 %3910, %v2165_v24   ;;  %v2181_v57 = vld [vmem:[%s6056_s2 + $0x90] sm:$0xff] }
  0x6f   :  { %v4157_v24 = vld [vmem:[%s6055_s1 + $0x394] ss:$8 sps:$4 sm:$0xff]  }
  0x70   :  { %1400 = vmatpush1.bf16.msra.mxu0 %v4529_v25  ;;  %1901 = vmatpush1.bf16.msra.mxu1 %v4529_v25  ;;  %v2164_v25 = vld [vmem:[%s6056_s2 + $0x8] sm:$0xff] }
  0x71   :  { %1401 = vmatprep.subr.bf16.mxu0 %v4536_v26  ;;  %1902 = vmatprep.subr.bf16.mxu1 %v4536_v26  ;;  %v2166_v26 = vld [vmem:[%s6056_s2 + $0x18] sm:$0xff] }
  0x72   :  { %540 = vmatmul.mubr.bf16.gmra.mrb[24].mxu0 %v4069_v58  ;;  %969 = vmatmul.mubr.bf16.gmra.mrb[24].mxu1 %v4070_v59  ;;  %v2182_v58 = vld [vmem:[%s6056_s2 + $0x98] sm:$0xff]  ;;  %v2183_v59 = vld [vmem:[%s6056_s2 + $0xa0] sm:$0xff] }
  0x73   :  { %549 = vmatprep.mubr.bf16.mxu0 %v4071_v60  ;;  %978 = vmatprep.mubr.bf16.mxu1 %v4073_v61  ;;  %v4135_v60 = vld [vmem:[%s6055_s1 + $0x110] ss:$8 sps:$4 sm:$0xff]  }
  0x74   :  { %1402 = vmatpush1.bf16.msra.mxu0 %v4543_v27  ;;  %1903 = vmatpush1.bf16.msra.mxu1 %v4543_v27  ;;  %v2167_v27 = vld [vmem:[%s6056_s2 + $0x20] sm:$0xff]  ;;  %v4136_v61 = vld [vmem:[%s6055_s1 + $0x230] ss:$8 sps:$4 sm:$0xff]  }
  0x75   :  { %1403 = vmatprep.subr.bf16.mxu0 %v4550_v28  ;;  %1904 = vmatprep.subr.bf16.mxu1 %v4550_v28  ;;  %v4111_v28 = vld [vmem:[%s6055_s1 + $0xd0] ss:$8 sps:$4 sm:$0xff]  }
  0x76   :  { %2206 = vperm.xlu0 %3909, %v2164_v25   ;;  %2216 = vperm.xlu1 %3910, %v2166_v26   ;;  %v2196_v25 = vld [vmem:[%s6056_s2 + $0x108] sm:$0xff]  ;;  %v2197_v26 = vld [vmem:[%s6056_s2 + $0x110] sm:$0xff] }
  0x78   :  { %1404 = vmatpush1.bf16.msra.mxu0 %v4557_v29  ;;  %1905 = vmatpush1.bf16.msra.mxu1 %v4557_v29  ;;  %v4112_v29 = vld [vmem:[%s6055_s1 + $0x1f0] ss:$8 sps:$4 sm:$0xff]  }
  0x79   :  { %1405 = vmatprep.subr.bf16.mxu0 %v4564_v30  ;;  %1906 = vmatprep.subr.bf16.mxu1 %v4564_v30  ;;  %v4113_v30 = vld [vmem:[%s6055_s1 + $0xe4] ss:$8 sps:$4 sm:$0xff]  }
  0x7a   :  { %550 = vmatmul.mubr.bf16.gmra.mrb[28].mxu0 %v4075_v62  ;;  %979 = vmatmul.mubr.bf16.gmra.mrb[28].mxu1 %v4076_v63  ;;  %v4139_v62 = vld [vmem:[%s6055_s1 + $0x244] ss:$8 sps:$4 sm:$0xff]  }
  0x7b   :  { %559 = vmatprep.mubr.bf16.mxu0 %v4077_v0  ;;  %988 = vmatprep.mubr.bf16.mxu1 %v4079_v1  ;;  %v4142_v63 = vld [vmem:[%s6055_s1 + $0x364] ss:$8 sps:$4 sm:$0xff]   ;;  %v2185_v1 = vld [vmem:[%s6056_s2 + $0xb0] sm:$0xff] }
  0x7c   :  { %1406 = vmatpush1.bf16.msra.mxu0 %v4571_v31  ;;  %1907 = vmatpush1.bf16.msra.mxu1 %v4571_v31  ;;  %v4115_v31 = vld [vmem:[%s6055_s1 + $0x204] ss:$8 sps:$4 sm:$0xff]  }
  0x7d   :  { %1407 = vmatprep.subr.bf16.mxu0 %v4578_v32  ;;  %1908 = vmatprep.subr.bf16.mxu1 %v4578_v32  ;;  %v2168_v32 = vld [vmem:[%s6056_s2 + $0x28] sm:$0xff] }
  0x7e   :  { %2221 = vperm.xlu0 %3909, %v2167_v27   ;;  %2226 = vperm.xlu1 %3910, %v2168_v32   ;;  %v2184_v0 = vld [vmem:[%s6056_s2 + $0xa8] sm:$0xff]  ;;  %v2198_v27 = vld [vmem:[%s6056_s2 + $0x118] sm:$0xff] }
  0x7f   :  { %v4163_v32 = vld [vmem:[%s6055_s1 + $0x3a4] ss:$8 sps:$4 sm:$0xff]  }
  0x80   :  { %1408 = vmatpush1.bf16.msra.mxu0 %v4585_v33  ;;  %1909 = vmatpush1.bf16.msra.mxu1 %v4585_v33  ;;  %v2169_v33 = vld [vmem:[%s6056_s2 + $0x30] sm:$0xff] }
  0x82   :  { %560 = vmatmul.mubr.bf16.gmra.mrb[32].mxu0 %v4081_v2  ;;  %989 = vmatmul.mubr.bf16.gmra.mrb[32].mxu1 %v4082_v3  ;;  %v2186_v2 = vld [vmem:[%s6056_s2 + $0xb8] sm:$0xff]  ;;  %v2187_v3 = vld [vmem:[%s6056_s2 + $0xc0] sm:$0xff] }
  0x83   :  { %569 = vmatprep.mubr.bf16.mxu0 %v4083_v4  ;;  %998 = vmatprep.mubr.bf16.mxu1 %v4085_v5  ;;  %v4137_v4 = vld [vmem:[%s6055_s1 + $0x240] ss:$8 sps:$4 sm:$0xff]  }
  0x84   :  { %2231 = vperm.xlu0 %3909, %v2169_v33   ;;  %2236 = vperm.xlu1 %3910, %v2170_v34   ;;  %v4140_v5 = vld [vmem:[%s6055_s1 + $0x360] ss:$8 sps:$4 sm:$0xff]  }
  0x85   :  { %v2807_v33 = vld [vmem:[%s6057_s4 + $0x8] sm:$0xff] }
  0x86   :  { %v4165_v34 = vld [vmem:[%s6055_s1 + $0x280] ss:$8 sps:$4 sm:$0xff]  }
  0x88   :  { %2241 = vperm.xlu0 %3909, %v2171_v35   ;;  %2246 = vperm.xlu1 %3910, %v2172_v40   ;;  %v4166_v35 = vld [vmem:[%s6055_s1 + $0x3a0] ss:$8 sps:$4 sm:$0xff]   ;;  %v4173_v40 = vld [vmem:[%s6055_s1 + $0x2a4] ss:$8 sps:$4 sm:$0xff]  }
  0x8a   :  { %570 = vmatmul.mubr.bf16.gmra.mrb[36].mxu0 %v4087_v6  ;;  %999 = vmatmul.mubr.bf16.gmra.mrb[36].mxu1 %v4088_v7  ;;  %v4143_v6 = vld [vmem:[%s6055_s1 + $0x254] ss:$8 sps:$4 sm:$0xff]  }
  0x8b   :  { %579 = vmatprep.mubr.bf16.mxu0 %v4089_v8  ;;  %1008 = vmatprep.mubr.bf16.mxu1 %v4091_v9  ;;  %v4145_v7 = vld [vmem:[%s6055_s1 + $0x374] ss:$8 sps:$4 sm:$0xff]   ;;  %v2188_v8 = vld [vmem:[%s6056_s2 + $0xc8] sm:$0xff] }
  0x8c   :  { %2251 = vperm.xlu0 %3909, %v2173_v41   ;;  %2256 = vperm.xlu1 %3910, %v2174_v42   ;;  %v2189_v9 = vld [vmem:[%s6056_s2 + $0xd0] sm:$0xff]  ;;  %v4175_v41 = vld [vmem:[%s6055_s1 + $0x3c4] ss:$8 sps:$4 sm:$0xff]   ;;  %v4177_v42 = vld [vmem:[%s6055_s1 + $0x2a0] ss:$8 sps:$4 sm:$0xff]  }
  0x90   :  { %2261 = vperm.xlu0 %3909, %v2175_v43   ;;  %2266 = vperm.xlu1 %3910, %v2176_v48   ;;  %v4178_v43 = vld [vmem:[%s6055_s1 + $0x3c0] ss:$8 sps:$4 sm:$0xff]   ;;  %v4185_v48 = vld [vmem:[%s6055_s1 + $0x2c4] ss:$8 sps:$4 sm:$0xff]  }
  0x92   :  { %580 = vmatmul.mubr.bf16.gmra.mrb[40].mxu0 %v4093_v10  ;;  %1009 = vmatmul.mubr.bf16.gmra.mrb[40].mxu1 %v4094_v11  ;;  %v2190_v10 = vld [vmem:[%s6056_s2 + $0xd8] sm:$0xff]  ;;  %v2191_v11 = vld [vmem:[%s6056_s2 + $0xe0] sm:$0xff] }
  0x93   :  { %589 = vmatprep.mubr.bf16.mxu0 %v4095_v12  ;;  %1018 = vmatprep.mubr.bf16.mxu1 %v4097_v13  ;;  %v4147_v12 = vld [vmem:[%s6055_s1 + $0x250] ss:$8 sps:$4 sm:$0xff]  }
  0x94   :  { %2271 = vperm.xlu0 %3909, %v2177_v49   ;;  %2276 = vperm.xlu1 %3910, %v2178_v50   ;;  %v4148_v13 = vld [vmem:[%s6055_s1 + $0x370] ss:$8 sps:$4 sm:$0xff]   ;;  %v4187_v49 = vld [vmem:[%s6055_s1 + $0x3e4] ss:$8 sps:$4 sm:$0xff]   ;;  %v4189_v50 = vld [vmem:[%s6055_s1 + $0x2c0] ss:$8 sps:$4 sm:$0xff]  }
  0x98   :  { %2281 = vperm.xlu0 %3909, %v2179_v51   ;;  %2286 = vperm.xlu1 %3910, %v2180_v56   ;;  %v4190_v51 = vld [vmem:[%s6055_s1 + $0x3e0] ss:$8 sps:$4 sm:$0xff]  }
  0x9a   :  { %590 = vmatmul.mubr.bf16.gmra.mrb[44].mxu0 %v4099_v14  ;;  %1019 = vmatmul.mubr.bf16.gmra.mrb[44].mxu1 %v4100_v15  ;;  %v4149_v14 = vld [vmem:[%s6055_s1 + $0x264] ss:$8 sps:$4 sm:$0xff]  }
  0x9b   :  { %599 = vmatprep.mubr.bf16.mxu0 %v4101_v16  ;;  %1028 = vmatprep.mubr.bf16.mxu1 %v4103_v17  ;;  %v4151_v15 = vld [vmem:[%s6055_s1 + $0x384] ss:$8 sps:$4 sm:$0xff]   ;;  %v2193_v17 = vld [vmem:[%s6056_s2 + $0xf0] sm:$0xff] }
  0x9c   :  { %2291 = vperm.xlu0 %3909, %v2181_v57   ;;  %2296 = vperm.xlu1 %3910, %v2182_v58   ;;  %v2192_v16 = vld [vmem:[%s6056_s2 + $0xe8] sm:$0xff] }
  0xa0   :  { %2301 = vperm.xlu0 %3909, %v2183_v59   ;;  %2306 = vperm.xlu1 %3910, %v2184_v0   ;;  %v4195_v59 = vld [vmem:[%s6055_s1 + $0x2d0] ss:$8 sps:$4 sm:$0xff]   ;;  %v4197_v0 = vld [vmem:[%s6055_s1 + $0x2e4] ss:$8 sps:$4 sm:$0xff]  }
  0xa2   :  { %600 = vmatmul.mubr.bf16.gmra.mrb[48].mxu0 %v4105_v20  ;;  %1029 = vmatmul.mubr.bf16.gmra.mrb[48].mxu1 %v4106_v21  ;;  %v2195_v20 = vld [vmem:[%s6056_s2 + $0x100] sm:$0xff] }
  0xa3   :  { %609 = vmatprep.mubr.bf16.mxu0 %v4107_v22  ;;  %1038 = vmatprep.mubr.bf16.mxu1 %v4109_v23  ;;  %v4153_v21 = vld [vmem:[%s6055_s1 + $0x260] ss:$8 sps:$4 sm:$0xff]   ;;  %v4155_v23 = vld [vmem:[%s6055_s1 + $0x274] ss:$8 sps:$4 sm:$0xff]  }
  0xa4   :  { %2311 = vperm.xlu0 %3909, %v2185_v1   ;;  %2316 = vperm.xlu1 %3910, %v2186_v2   ;;  %v4154_v22 = vld [vmem:[%s6055_s1 + $0x380] ss:$8 sps:$4 sm:$0xff]   ;;  %v4199_v1 = vld [vmem:[%s6055_s1 + $0x404] ss:$8 sps:$4 sm:$0xff]  }
  0xa8   :  { %2321 = vperm.xlu0 %3909, %v2187_v3   ;;  %2326 = vperm.xlu1 %3910, %v2188_v8  }
  0xaa   :  { %610 = vmatmul.mubr.bf16.gmra.mrb[52].mxu0 %v4111_v28  ;;  %1039 = vmatmul.mubr.bf16.gmra.mrb[52].mxu1 %v4112_v29  ;;  %v2806_v28 = vld [vmem:[%s6057_s4] sm:$0xff]  ;;  %v4159_v29 = vld [vmem:[%s6055_s1 + $0x270] ss:$8 sps:$4 sm:$0xff]  }
  0xab   :  { %619 = vmatprep.mubr.bf16.mxu0 %v4113_v30  ;;  %1048 = vmatprep.mubr.bf16.mxu1 %v4115_v31  ;;  %v4160_v30 = vld [vmem:[%s6055_s1 + $0x390] ss:$8 sps:$4 sm:$0xff]   ;;  %v4161_v31 = vld [vmem:[%s6055_s1 + $0x284] ss:$8 sps:$4 sm:$0xff]  }
  0xac   :  { %2331 = vperm.xlu0 %3909, %v2189_v9   ;;  %2336 = vperm.xlu1 %3910, %v2190_v10  }
  0xb0   :  { %2341 = vperm.xlu0 %3909, %v2191_v11   ;;  %2346 = vperm.xlu1 %3910, %v2192_v16   ;;  %v4201_v11 = vld [vmem:[%s6055_s1 + $0x2e0] ss:$8 sps:$4 sm:$0xff]   ;;  %v4203_v16 = vld [vmem:[%s6055_s1 + $0x2f4] ss:$8 sps:$4 sm:$0xff]  }
  0xb2   :  { %620 = vmatmul.mubr.bf16.gmra.mrb[56].mxu0 %v4117_v36  ;;  %1049 = vmatmul.mubr.bf16.gmra.mrb[56].mxu1 %v4118_v37  ;;  %v4167_v36 = vld [vmem:[%s6055_s1 + $0x294] ss:$8 sps:$4 sm:$0xff]  }
  0xb3   :  { %629 = vmatprep.mubr.bf16.mxu0 %v4119_v38  ;;  %1058 = vmatprep.mubr.bf16.mxu1 %v4121_v39  ;;  %v4169_v37 = vld [vmem:[%s6055_s1 + $0x3b4] ss:$8 sps:$4 sm:$0xff]   ;;  %v4171_v38 = vld [vmem:[%s6055_s1 + $0x290] ss:$8 sps:$4 sm:$0xff]  }
  0xb4   :  { %2351 = vperm.xlu0 %3909, %v2193_v17   ;;  %2356 = vperm.xlu1 %3910, %v2194_v18   ;;  %v4172_v39 = vld [vmem:[%s6055_s1 + $0x3b0] ss:$8 sps:$4 sm:$0xff]   ;;  %v4205_v17 = vld [vmem:[%s6055_s1 + $0x414] ss:$8 sps:$4 sm:$0xff]  }
  0xb8   :  { %2361 = vperm.xlu0 %3909, %v2195_v20   ;;  %2366 = vperm.xlu1 %3910, %v2196_v25  }
  0xba   :  { %630 = vmatmul.mubr.bf16.gmra.mrb[60].mxu0 %v4123_v44  ;;  %1059 = vmatmul.mubr.bf16.gmra.mrb[60].mxu1 %v4124_v45  ;;  %v4179_v44 = vld [vmem:[%s6055_s1 + $0x2b4] ss:$8 sps:$4 sm:$0xff]  }
  0xbb   :  { %639 = vmatprep.mubr.bf16.mxu0 %v4125_v46  ;;  %1068 = vmatprep.mubr.bf16.mxu1 %v4127_v47  ;;  %v4181_v45 = vld [vmem:[%s6055_s1 + $0x3d4] ss:$8 sps:$4 sm:$0xff]   ;;  %v4183_v46 = vld [vmem:[%s6055_s1 + $0x2b0] ss:$8 sps:$4 sm:$0xff]  }
  0xbc   :  { %2371 = vperm.xlu0 %3909, %v2197_v26   ;;  %2376 = vperm.xlu1 %3910, %v2198_v27   ;;  %v4184_v47 = vld [vmem:[%s6055_s1 + $0x3d0] ss:$8 sps:$4 sm:$0xff]  }
  0xc0   :  { %2810 = vperm.xlu0 %3909, %v2806_v28   ;;  %2815 = vperm.xlu1 %3910, %v2807_v33   ;;  %v4207_v28 = vld [vmem:[%s6055_s1 + $0x2f0] ss:$8 sps:$4 sm:$0xff]   ;;  %v4209_v33 = vld [vmem:[%s6055_s1 + $0x304] ss:$8 sps:$4 sm:$0xff]  }
  0xc2   :  { %640 = vmatmul.mubr.bf16.gmra.mrb[64].mxu0 %v4129_v52  ;;  %1069 = vmatmul.mubr.bf16.gmra.mrb[64].mxu1 %v4130_v53  ;;  %v4191_v52 = vld [vmem:[%s6055_s1 + $0x2d4] ss:$8 sps:$4 sm:$0xff]  }
  0xc3   :  { %649 = vmatprep.mubr.bf16.mxu0 %v4131_v54  ;;  %1078 = vmatprep.mubr.bf16.mxu1 %v4133_v55  ;;  %v4193_v53 = vld [vmem:[%s6055_s1 + $0x3f4] ss:$8 sps:$4 sm:$0xff]  }
  0xca   :  { %650 = vmatmul.mubr.bf16.gmra.mrb[68].mxu0 %v4135_v60  ;;  %1079 = vmatmul.mubr.bf16.gmra.mrb[68].mxu1 %v4136_v61  ;;  %v4196_v60 = vld [vmem:[%s6055_s1 + $0x3f0] ss:$8 sps:$4 sm:$0xff]  }
  0xcb   :  { %1409 = vmatprep.mubr.bf16.mxu0 %v4139_v62  ;;  %1910 = vmatprep.mubr.bf16.mxu1 %v4142_v63 }
  0xd2   :  { %1410 = vmatmul.mubr.bf16.vlgmr.msra.gmra.mrb[72].mxu0 %v4137_v4  ;;  %1911 = vmatmul.mubr.bf16.vlgmr.msra.gmra.mrb[72].mxu1 %v4140_v5 }
  0xd3   :  { %1419 = vmatprep.mubr.bf16.mxu0 %v4143_v6  ;;  %1920 = vmatprep.mubr.bf16.mxu1 %v4145_v7 }
  0xda   :  { %1420 = vmatmul.mubr.bf16.gmra.mrb[76].mxu0 %v4147_v12  ;;  %1921 = vmatmul.mubr.bf16.gmra.mrb[76].mxu1 %v4148_v13  ;;  %v4202_v12 = vld [vmem:[%s6055_s1 + $0x400] ss:$8 sps:$4 sm:$0xff]   ;;  %v4231_v13 = vld [vmem:[%s6055_s1 + $0x330] ss:$8 sps:$4 sm:$0xff]  }
  0xdb   :  { %1429 = vmatprep.mubr.bf16.mxu0 %v4149_v14  ;;  %1930 = vmatprep.mubr.bf16.mxu1 %v4151_v15 }
  0xe2   :  { %1430 = vmatmul.mubr.bf16.gmra.mrb[80].mxu0 %v4153_v21  ;;  %1931 = vmatmul.mubr.bf16.gmra.mrb[80].mxu1 %v4154_v22  ;;  %v4233_v22 = vld [vmem:[%s6055_s1 + $0x344] ss:$8 sps:$4 sm:$0xff]  }
  0xe3   :  { %1439 = vmatprep.mubr.bf16.mxu0 %v4155_v23  ;;  %1940 = vmatprep.mubr.bf16.mxu1 %v4157_v24 }
  0xea   :  { %1440 = vmatmul.mubr.bf16.gmra.mrb[84].mxu0 %v4159_v29  ;;  %1941 = vmatmul.mubr.bf16.gmra.mrb[84].mxu1 %v4160_v30  ;;  %v4208_v29 = vld [vmem:[%s6055_s1 + $0x410] ss:$8 sps:$4 sm:$0xff]  }
  0xeb   :  { %1449 = vmatprep.mubr.bf16.mxu0 %v4161_v31  ;;  %1950 = vmatprep.mubr.bf16.mxu1 %v4163_v32 }
  0xf2   :  { %1450 = vmatmul.mubr.bf16.gmra.mrb[88].mxu0 %v4165_v34  ;;  %1951 = vmatmul.mubr.bf16.gmra.mrb[88].mxu1 %v4166_v35  ;;  %v4211_v34 = vld [vmem:[%s6055_s1 + $0x424] ss:$8 sps:$4 sm:$0xff]  }
  0xf3   :  { %1459 = vmatprep.mubr.bf16.mxu0 %v4167_v36  ;;  %1960 = vmatprep.mubr.bf16.mxu1 %v4169_v37 }
  0xfa   :  { %1460 = vmatmul.mubr.bf16.gmra.mrb[92].mxu0 %v4171_v38  ;;  %1961 = vmatmul.mubr.bf16.gmra.mrb[92].mxu1 %v4172_v39 }
  0xfb   :  { %1469 = vmatprep.mubr.bf16.mxu0 %v4173_v40  ;;  %1970 = vmatprep.mubr.bf16.mxu1 %v4175_v41 }
 0x102   :  { %1470 = vmatmul.mubr.bf16.gmra.mrb[96].mxu0 %v4177_v42  ;;  %1971 = vmatmul.mubr.bf16.gmra.mrb[96].mxu1 %v4178_v43 }
 0x103   :  { %1479 = vmatprep.mubr.bf16.mxu0 %v4179_v44  ;;  %1980 = vmatprep.mubr.bf16.mxu1 %v4181_v45  ;;  %v4213_v44 = vld [vmem:[%s6055_s1 + $0x300] ss:$8 sps:$4 sm:$0xff]  }
 0x104   :  { %v4214_v45 = vld [vmem:[%s6055_s1 + $0x420] ss:$8 sps:$4 sm:$0xff]  }
 0x10a   :  { %1480 = vmatmul.mubr.bf16.gmra.mrb[100].mxu0 %v4183_v46  ;;  %1981 = vmatmul.mubr.bf16.gmra.mrb[100].mxu1 %v4184_v47  ;;  %v4225_v46 = vld [vmem:[%s6055_s1 + $0x320] ss:$8 sps:$4 sm:$0xff]  }
 0x10b   :  { %1489 = vmatprep.mubr.bf16.mxu0 %v4185_v48  ;;  %1990 = vmatprep.mubr.bf16.mxu1 %v4187_v49  ;;  %v4215_v49 = vld [vmem:[%s6055_s1 + $0x314] ss:$8 sps:$4 sm:$0xff]  }
 0x112   :  { %1490 = vmatmul.mubr.bf16.gmra.mrb[104].mxu0 %v4189_v50  ;;  %1991 = vmatmul.mubr.bf16.gmra.mrb[104].mxu1 %v4190_v51  ;;  %v4217_v50 = vld [vmem:[%s6055_s1 + $0x434] ss:$8 sps:$4 sm:$0xff]  }
 0x113   :  { %1499 = vmatprep.mubr.bf16.mxu0 %v4191_v52  ;;  %2000 = vmatprep.mubr.bf16.mxu1 %v4193_v53 }
 0x115   :  { %v5095_v54 = vpop.f32.mrb[0].mxu0  ;;  %v5097_v55 = vpop.f32.mrb[0].mxu1 }
 0x116   :  { %v5101_v57 = vpop.f32.mrb[1].mxu0  ;;  %v5103_v58 = vpop.f32.mrb[1].mxu1 }
 0x117   :  { %v5113_v62 = vpop.f32.mrb[2].mxu0  ;;  %v5115_v63 = vpop.f32.mrb[2].mxu1 }
 0x118   :  { %v5125_v3 = vpop.f32.mrb[3].mxu0  ;;  %v5127_v4 = vpop.f32.mrb[3].mxu1 }
 0x11a   :  { %1500 = vmatmul.mubr.bf16.gmra.mrb[108].mxu0 %v4195_v59  ;;  %2001 = vmatmul.mubr.bf16.gmra.mrb[108].mxu1 %v4196_v60  ;;  %v4227_v59 = vld [vmem:[%s6055_s1 + $0x334] ss:$8 sps:$4 sm:$0xff]  }
 0x11b   :  { %1509 = vmatprep.mubr.bf16.mxu0 %v4197_v0  ;;  %2010 = vmatprep.mubr.bf16.mxu1 %v4199_v1 }
 0x11d   :  { %v5131_v6 = vpop.f32.mrb[4].mxu0  ;;  %v5133_v7 = vpop.f32.mrb[4].mxu1 }
 0x11e   :  { %v5137_v9 = vpop.f32.mrb[5].mxu0  ;;  %v5139_v10 = vpop.f32.mrb[5].mxu1 }
 0x11f   :  { %v5149_v14 = vpop.f32.mrb[6].mxu0  ;;  %v5151_v15 = vpop.f32.mrb[6].mxu1 }
 0x120   :  { %v5161_v20 = vpop.f32.mrb[7].mxu0  ;;  %v5163_v21 = vpop.f32.mrb[7].mxu1 }
 0x122   :  { %1510 = vmatmul.mubr.bf16.gmra.mrb[112].mxu0 %v4201_v11  ;;  %2011 = vmatmul.mubr.bf16.gmra.mrb[112].mxu1 %v4202_v12 }
 0x123   :  { %1519 = vmatprep.mubr.bf16.mxu0 %v4203_v16  ;;  %2020 = vmatprep.mubr.bf16.mxu1 %v4205_v17  ;;  %v4219_v16 = vld [vmem:[%s6055_s1 + $0x310] ss:$8 sps:$4 sm:$0xff]  }
 0x124   :  { %v4220_v17 = vld [vmem:[%s6055_s1 + $0x430] ss:$8 sps:$4 sm:$0xff]  }
 0x125   :  { %v5167_v23 = vpop.f32.mrb[8].mxu0  ;;  %v5169_v24 = vpop.f32.mrb[8].mxu1 }
 0x126   :  { %v5173_v26 = vpop.f32.mrb[9].mxu0  ;;  %v5175_v27 = vpop.f32.mrb[9].mxu1 }
 0x127   :  { %v5185_v31 = vpop.f32.mrb[10].mxu0  ;;  %v5187_v32 = vpop.f32.mrb[10].mxu1 }
 0x128   :  { %v5197_v36 = vpop.f32.mrb[11].mxu0  ;;  %v5199_v37 = vpop.f32.mrb[11].mxu1 }
 0x12a   :  { %1520 = vmatmul.mubr.bf16.gmra.mrb[116].mxu0 %v4207_v28  ;;  %2021 = vmatmul.mubr.bf16.gmra.mrb[116].mxu1 %v4208_v29 }
 0x12b   :  { %1529 = vmatprep.mubr.bf16.mxu0 %v4209_v33  ;;  %2030 = vmatprep.mubr.bf16.mxu1 %v4211_v34  ;;  %v4221_v34 = vld [vmem:[%s6055_s1 + $0x324] ss:$8 sps:$4 sm:$0xff]  }
 0x12d   :  { %v5203_v39 = vpop.f32.mrb[12].mxu0  ;;  %v5205_v40 = vpop.f32.mrb[12].mxu1 }
 0x12e   :  { %v5209_v42 = vpop.f32.mrb[13].mxu0  ;;  %v5211_v43 = vpop.f32.mrb[13].mxu1 }
 0x12f   :  { %v5221_v47 = vpop.f32.mrb[14].mxu0  ;;  %v5223_v48 = vpop.f32.mrb[14].mxu1 }
 0x130   :  { %v5233_v52 = vpop.f32.mrb[15].mxu0  ;;  %v5235_v53 = vpop.f32.mrb[15].mxu1 }
 0x132   :  { %1530 = vmatmul.mubr.bf16.gmra.mrb[120].mxu0 %v4213_v44  ;;  %2031 = vmatmul.mubr.bf16.gmra.mrb[120].mxu1 %v4214_v45  ;;  %v4223_v44 = vld [vmem:[%s6055_s1 + $0x444] ss:$8 sps:$4 sm:$0xff]  }
 0x133   :  { %1539 = vmatprep.mubr.bf16.mxu0 %v4215_v49  ;;  %2040 = vmatprep.mubr.bf16.mxu1 %v4217_v50 }
 0x135   :  { %v5239_v60 = vpop.f32.mrb[16].mxu0  ;;  %v5241_v0 = vpop.f32.mrb[16].mxu1 }
 0x136   :  { %v5245_v11 = vpop.f32.mrb[17].mxu0  ;;  %v5247_v12 = vpop.f32.mrb[17].mxu1 }
 0x137   :  { %v5257_v29 = vpop.f32.mrb[18].mxu0  ;;  %v5259_v33 = vpop.f32.mrb[18].mxu1 }
 0x138   :  { %v5269_v49 = vpop.f32.mrb[19].mxu0  ;;  %v5271_v50 = vpop.f32.mrb[19].mxu1 }
 0x13a   :  { %1540 = vmatmul.mubr.bf16.gmra.mrb[124].mxu0 %v4219_v16  ;;  %2041 = vmatmul.mubr.bf16.gmra.mrb[124].mxu1 %v4220_v17  ;;  %v4226_v16 = vld [vmem:[%s6055_s1 + $0x440] ss:$8 sps:$4 sm:$0xff]   ;;  %v4236_v17 = vld [vmem:[%s6055_s1 + $0x464] ss:$8 sps:$4 sm:$0xff]  }
 0x13b   :  { %1549 = vmatprep.mubr.bf16.mxu0 %v4221_v34  ;;  %2050 = vmatprep.mubr.bf16.mxu1 %v4223_v44 }
 0x13d   :  { %v5275_v28 = vpop.f32.mrb[20].mxu0  ;;  %v5277_v1 = vpop.f32.mrb[20].mxu1 }
 0x13e   :  { %v5281_v51 = vpop.f32.mrb[21].mxu0  ;;  %v5283_v45 = vpop.f32.mrb[21].mxu1 }
 0x13f   :  { %v5293_v34 = vpop.f32.mrb[22].mxu0  ;;  %v5295_v44 = vpop.f32.mrb[22].mxu1 }
 0x140   :  { %6167 = vst [vmem:[#allocation2_spill] sm:$0xff] %v5295_v44  ;;  %v5305_v38 = vpop.f32.mrb[23].mxu0  ;;  %v5307_v35 = vpop.f32.mrb[23].mxu1 }
 0x141   :  { %6168 = vst [vmem:[#allocation3_spill] sm:$0xff] %v5305_v38  ;;  %6169 = vst [vmem:[#allocation4_spill] sm:$0xff] %v5307_v35 }
 0x142   :  { %1550 = vmatmul.mubr.bf16.gmra.mrb[128].mxu0 %v4225_v46  ;;  %2051 = vmatmul.mubr.bf16.gmra.mrb[128].mxu1 %v4226_v16  ;;  %v4232_v46 = vld [vmem:[%s6055_s1 + $0x450] ss:$8 sps:$4 sm:$0xff]  }
 0x143   :  { %1559 = vmatprep.mubr.bf16.mxu0 %v4227_v59  ;;  %2060 = vmatprep.mubr.bf16.mxu1 %v4229_v19  ;;  %v4242_v19 = vld [vmem:[%s6055_s1 + $0x474] ss:$8 sps:$4 sm:$0xff]  }
 0x145   :  { %v5311_v30 = vpop.f32.mrb[24].mxu0  ;;  %v5313_v25 = vpop.f32.mrb[24].mxu1 }
 0x146   :  { %6170 = vst [vmem:[#allocation5_spill] sm:$0xff] %v5311_v30  ;;  %6171 = vst [vmem:[#allocation6_spill] sm:$0xff] %v5313_v25  ;;  %v5317_v18 = vpop.f32.mrb[25].mxu0  ;;  %v5319_v41 = vpop.f32.mrb[25].mxu1  ;;  %v6268_v30 = vmax.f32 %v5113_v62, %v5115_v63 }
 0x147   :  { %6172 = vst [vmem:[#allocation7_spill] sm:$0xff] %v5317_v18  ;;  %6173 = vst [vmem:[#allocation8_spill] sm:$0xff] %v5319_v41  ;;  %v5329_v59 = vpop.f32.mrb[26].mxu0  ;;  %v5331_v16 = vpop.f32.mrb[26].mxu1  ;;  %v4239_v41 = vld [vmem:[%s6055_s1 + $0x354] ss:$8 sps:$4 sm:$0xff]  }
 0x148   :  { %6174 = vst [vmem:[#allocation9_spill] sm:$0xff] %v5329_v59  ;;  %6175 = vst [vmem:[#allocation10_spill] sm:$0xff] %v5331_v16  ;;  %v5341_v5 = vpop.f32.mrb[27].mxu0  ;;  %v5343_v2 = vpop.f32.mrb[27].mxu1  ;;  %v4235_v16 = vld [vmem:[%s6055_s1 + $0x340] ss:$8 sps:$4 sm:$0xff]  }
 0x149   :  { %6176 = vst [vmem:[#allocation11_spill] sm:$0xff] %v5341_v5  ;;  %6177 = vst [vmem:[#allocation12_spill] sm:$0xff] %v5343_v2 }
 0x14a   :  { %1560 = vmatmul.mubr.bf16.gmra.mrb[132].mxu0 %v4231_v13  ;;  %2061 = vmatmul.mubr.bf16.gmra.mrb[132].mxu1 %v4232_v46  ;;  %v4238_v13 = vld [vmem:[%s6055_s1 + $0x460] ss:$8 sps:$4 sm:$0xff]  }
 0x14b   :  { %1569 = vmatprep.mubr.bf16.mxu0 %v4233_v22  ;;  %2070 = vmatprep.mubr.bf16.mxu1 %v4236_v17 }
 0x14d   :  { %v5347_v61 = vpop.f32.mrb[28].mxu0  ;;  %v5349_v56 = vpop.f32.mrb[28].mxu1 }
 0x14e   :  { %6178 = vst [vmem:[#allocation13_spill] sm:$0xff] %v5347_v61  ;;  %6179 = vst [vmem:[#allocation14_spill] sm:$0xff] %v5349_v56  ;;  %v5353_v18 = vpop.f32.mrb[29].mxu0  ;;  %v5355_v8 = vpop.f32.mrb[29].mxu1 }
 0x14f   :  { %6180 = vst [vmem:[#allocation15_spill] sm:$0xff] %v5353_v18  ;;  %6181 = vst [vmem:[#allocation16_spill] sm:$0xff] %v5355_v8  ;;  %v5365_v17 = vpop.f32.mrb[30].mxu0  ;;  %v5367_v46 = vpop.f32.mrb[30].mxu1 }
 0x150   :  { %6182 = vst [vmem:[#allocation17_spill] sm:$0xff] %v5365_v17  ;;  %6183 = vst [vmem:[#allocation18_spill] sm:$0xff] %v5367_v46  ;;  %v5377_v61 = vpop.f32.mrb[31].mxu0  ;;  %v5379_v2 = vpop.f32.mrb[31].mxu1  ;;  %v4241_v46 = vld [vmem:[%s6055_s1 + $0x350] ss:$8 sps:$4 sm:$0xff]   ;;  %v6267_v17 = vmax.f32 %v5101_v57, %v5103_v58 }
 0x151   :  { %6184 = vst [vmem:[#allocation19_spill] sm:$0xff] %v5377_v61  ;;  %6185 = vst [vmem:[#allocation20_spill] sm:$0xff] %v5379_v2 }
 0x152   :  { %1570 = vmatmul.mubr.bf16.gmra.mrb[136].mxu0 %v4235_v16  ;;  %2071 = vmatmul.mubr.bf16.gmra.mrb[136].mxu1 %v4238_v13 }
 0x153   :  { %1579 = vmatprep.mubr.bf16.mxu0 %v4239_v41  ;;  %2080 = vmatprep.mubr.bf16.mxu1 %v4242_v19  ;;  %v4244_v41 = vld [vmem:[%s6055_s1 + $0x470] ss:$8 sps:$4 sm:$0xff]   ;;  %v6266_v19 = vmax.f32 %v5095_v54, %v5097_v55  ;;  %v6269_v54 = vmax.f32 %v5125_v3, %v5127_v4  ;;  %v6270_v3 = vmax.f32 %v5131_v6, %v5133_v7 }
 0x155   :  { %v5383_v8 = vpop.f32.mrb[32].mxu0  ;;  %v5385_v18 = vpop.f32.mrb[32].mxu1 }
 0x156   :  { %6186 = vst [vmem:[#allocation21_spill] sm:$0xff] %v5383_v8  ;;  %6187 = vst [vmem:[#allocation22_spill] sm:$0xff] %v5385_v18  ;;  %v5389_v59 = vpop.f32.mrb[33].mxu0  ;;  %v5391_v56 = vpop.f32.mrb[33].mxu1 }
 0x157   :  { %6188 = vst [vmem:[#allocation23_spill] sm:$0xff] %v5389_v59  ;;  %6189 = vst [vmem:[#allocation24_spill] sm:$0xff] %v5391_v56  ;;  %v5401_v16 = vpop.f32.mrb[34].mxu0  ;;  %v5403_v13 = vpop.f32.mrb[34].mxu1 }
 0x158   :  { %6190 = vst [vmem:[#allocation25_spill] sm:$0xff] %v5401_v16  ;;  %6191 = vst [vmem:[#allocation26_spill] sm:$0xff] %v5403_v13  ;;  %v5407_v22 = vpop.f32.mrb[35].mxu0  ;;  %v5409_v18 = vpop.f32.mrb[35].mxu1 }
 0x159   :  { %6192 = vst [vmem:[#allocation27_spill] sm:$0xff] %v5407_v22  ;;  %6193 = vst [vmem:[#allocation28_spill] sm:$0xff] %v5409_v18 }
 0x15a   :  { %1580 = vmatmul.mubr.bf16.gmra.mrb[140].mxu0 %v4241_v46  ;;  %2081 = vmatmul.mubr.bf16.gmra.mrb[140].mxu1 %v4244_v41 }
 0x15d   :  { %v5413_v2 = vpop.f32.mrb[36].mxu0  ;;  %v5415_v61 = vpop.f32.mrb[36].mxu1 }
 0x15e   :  { %6194 = vst [vmem:[#allocation29_spill] sm:$0xff] %v5413_v2  ;;  %6195 = vst [vmem:[#allocation30_spill] sm:$0xff] %v5415_v61  ;;  %v5419_v56 = vpop.f32.mrb[37].mxu0  ;;  %v5421_v59 = vpop.f32.mrb[37].mxu1 }
 0x15f   :  { %6196 = vst [vmem:[#allocation31_spill] sm:$0xff] %v5419_v56  ;;  %6197 = vst [vmem:[#allocation32_spill] sm:$0xff] %v5421_v59  ;;  %v5425_v13 = vpop.f32.mrb[38].mxu0  ;;  %v5427_v16 = vpop.f32.mrb[38].mxu1 }
 0x160   :  { %6198 = vst [vmem:[#allocation33_spill] sm:$0xff] %v5425_v13  ;;  %6199 = vst [vmem:[#allocation34_spill] sm:$0xff] %v5427_v16  ;;  %v5431_v41 = vpop.f32.mrb[39].mxu0  ;;  %v5433_v8 = vpop.f32.mrb[39].mxu1 }
 0x161   :  { %6200 = vst [vmem:[#allocation35_spill] sm:$0xff] %v5431_v41  ;;  %6201 = vst [vmem:[#allocation36_spill] sm:$0xff] %v5433_v8 }
 0x165   :  { %v5437_v61 = vpop.f32.mrb[40].mxu0  ;;  %v5439_v2 = vpop.f32.mrb[40].mxu1 }
 0x166   :  { %6202 = vst [vmem:[#allocation37_spill] sm:$0xff] %v5437_v61  ;;  %6203 = vst [vmem:[#allocation38_spill] sm:$0xff] %v5439_v2  ;;  %v5443_v59 = vpop.f32.mrb[41].mxu0  ;;  %v5445_v56 = vpop.f32.mrb[41].mxu1 }
 0x167   :  { %6204 = vst [vmem:[#allocation39_spill] sm:$0xff] %v5443_v59  ;;  %6205 = vst [vmem:[#allocation40_spill] sm:$0xff] %v5445_v56  ;;  %v5449_v16 = vpop.f32.mrb[42].mxu0  ;;  %v5451_v13 = vpop.f32.mrb[42].mxu1 }
 0x168   :  { %6206 = vst [vmem:[#allocation41_spill] sm:$0xff] %v5449_v16  ;;  %6207 = vst [vmem:[#allocation42_spill] sm:$0xff] %v5451_v13  ;;  %v5455_v8 = vpop.f32.mrb[43].mxu0  ;;  %v5457_v41 = vpop.f32.mrb[43].mxu1 }
 0x169   :  { %6208 = vst [vmem:[#allocation43_spill] sm:$0xff] %v5455_v8  ;;  %6209 = vst [vmem:[#allocation44_spill] sm:$0xff] %v5457_v41 }
 0x16d   :  { %v5461_v2 = vpop.f32.mrb[44].mxu0  ;;  %v5463_v61 = vpop.f32.mrb[44].mxu1 }
 0x16e   :  { %6210 = vst [vmem:[#allocation45_spill] sm:$0xff] %v5461_v2  ;;  %6211 = vst [vmem:[#allocation46_spill] sm:$0xff] %v5463_v61  ;;  %v5467_v56 = vpop.f32.mrb[45].mxu0  ;;  %v5469_v59 = vpop.f32.mrb[45].mxu1 }
 0x16f   :  { %6212 = vst [vmem:[#allocation47_spill] sm:$0xff] %v5467_v56  ;;  %6213 = vst [vmem:[#allocation48_spill] sm:$0xff] %v5469_v59  ;;  %v5473_v13 = vpop.f32.mrb[46].mxu0  ;;  %v5475_v16 = vpop.f32.mrb[46].mxu1 }
 0x170   :  { %6214 = vst [vmem:[#allocation49_spill] sm:$0xff] %v5473_v13  ;;  %6215 = vst [vmem:[#allocation50_spill] sm:$0xff] %v5475_v16  ;;  %v5479_v41 = vpop.f32.mrb[47].mxu0  ;;  %v5481_v8 = vpop.f32.mrb[47].mxu1 }
 0x171   :  { %6216 = vst [vmem:[#allocation51_spill] sm:$0xff] %v5479_v41  ;;  %6217 = vst [vmem:[#allocation52_spill] sm:$0xff] %v5481_v8 }
 0x175   :  { %v5485_v61 = vpop.f32.mrb[48].mxu0  ;;  %v5487_v2 = vpop.f32.mrb[48].mxu1 }
 0x176   :  { %6218 = vst [vmem:[#allocation53_spill] sm:$0xff] %v5485_v61  ;;  %6219 = vst [vmem:[#allocation54_spill] sm:$0xff] %v5487_v2  ;;  %v5491_v59 = vpop.f32.mrb[49].mxu0  ;;  %v5493_v56 = vpop.f32.mrb[49].mxu1 }
 0x177   :  { %6220 = vst [vmem:[#allocation55_spill] sm:$0xff] %v5491_v59  ;;  %6221 = vst [vmem:[#allocation56_spill] sm:$0xff] %v5493_v56  ;;  %v5497_v16 = vpop.f32.mrb[50].mxu0  ;;  %v5499_v13 = vpop.f32.mrb[50].mxu1 }
 0x178   :  { %6222 = vst [vmem:[#allocation57_spill] sm:$0xff] %v5497_v16  ;;  %6223 = vst [vmem:[#allocation58_spill] sm:$0xff] %v5499_v13  ;;  %v5503_v8 = vpop.f32.mrb[51].mxu0  ;;  %v5505_v41 = vpop.f32.mrb[51].mxu1 }
 0x179   :  { %6224 = vst [vmem:[#allocation59_spill] sm:$0xff] %v5503_v8  ;;  %6225 = vst [vmem:[#allocation60_spill] sm:$0xff] %v5505_v41 }
 0x17d   :  { %v5509_v2 = vpop.f32.mrb[52].mxu0  ;;  %v5511_v61 = vpop.f32.mrb[52].mxu1 }
 0x17e   :  { %6226 = vst [vmem:[#allocation61_spill] sm:$0xff] %v5509_v2  ;;  %6227 = vst [vmem:[#allocation62_spill] sm:$0xff] %v5511_v61  ;;  %v5515_v56 = vpop.f32.mrb[53].mxu0  ;;  %v5517_v59 = vpop.f32.mrb[53].mxu1 }
 0x17f   :  { %6228 = vst [vmem:[#allocation63_spill] sm:$0xff] %v5515_v56  ;;  %6229 = vst [vmem:[#allocation64_spill] sm:$0xff] %v5517_v59  ;;  %v5521_v13 = vpop.f32.mrb[54].mxu0  ;;  %v5523_v16 = vpop.f32.mrb[54].mxu1 }
 0x180   :  { %6230 = vst [vmem:[#allocation65_spill] sm:$0xff] %v5521_v13  ;;  %6231 = vst [vmem:[#allocation66_spill] sm:$0xff] %v5523_v16  ;;  %v5527_v41 = vpop.f32.mrb[55].mxu0  ;;  %v5529_v8 = vpop.f32.mrb[55].mxu1 }
 0x181   :  { %6232 = vst [vmem:[#allocation67_spill] sm:$0xff] %v5527_v41  ;;  %6233 = vst [vmem:[#allocation68_spill] sm:$0xff] %v5529_v8 }
 0x185   :  { %v5533_v61 = vpop.f32.mrb[56].mxu0  ;;  %v5535_v2 = vpop.f32.mrb[56].mxu1 }
 0x186   :  { %6234 = vst [vmem:[#allocation69_spill] sm:$0xff] %v5533_v61  ;;  %6235 = vst [vmem:[#allocation70_spill] sm:$0xff] %v5535_v2  ;;  %v5539_v59 = vpop.f32.mrb[57].mxu0  ;;  %v5541_v56 = vpop.f32.mrb[57].mxu1 }
 0x187   :  { %6236 = vst [vmem:[#allocation71_spill] sm:$0xff] %v5539_v59  ;;  %6237 = vst [vmem:[#allocation72_spill] sm:$0xff] %v5541_v56  ;;  %v5545_v16 = vpop.f32.mrb[58].mxu0  ;;  %v5547_v13 = vpop.f32.mrb[58].mxu1 }
 0x188   :  { %6238 = vst [vmem:[#allocation73_spill] sm:$0xff] %v5545_v16  ;;  %6239 = vst [vmem:[#allocation74_spill] sm:$0xff] %v5547_v13  ;;  %v5551_v8 = vpop.f32.mrb[59].mxu0  ;;  %v5553_v41 = vpop.f32.mrb[59].mxu1 }
 0x189   :  { %6240 = vst [vmem:[#allocation75_spill] sm:$0xff] %v5551_v8  ;;  %6241 = vst [vmem:[#allocation76_spill] sm:$0xff] %v5553_v41 }
 0x18d   :  { %v5557_v2 = vpop.f32.mrb[60].mxu0  ;;  %v5559_v61 = vpop.f32.mrb[60].mxu1 }
 0x18e   :  { %6242 = vst [vmem:[#allocation77_spill] sm:$0xff] %v5557_v2  ;;  %6243 = vst [vmem:[#allocation78_spill] sm:$0xff] %v5559_v61  ;;  %v5563_v56 = vpop.f32.mrb[61].mxu0  ;;  %v5565_v59 = vpop.f32.mrb[61].mxu1 }
 0x18f   :  { %6244 = vst [vmem:[#allocation79_spill] sm:$0xff] %v5563_v56  ;;  %6245 = vst [vmem:[#allocation80_spill] sm:$0xff] %v5565_v59  ;;  %v5569_v13 = vpop.f32.mrb[62].mxu0  ;;  %v5571_v16 = vpop.f32.mrb[62].mxu1 }
 0x190   :  { %6246 = vst [vmem:[#allocation81_spill] sm:$0xff] %v5569_v13  ;;  %6247 = vst [vmem:[#allocation82_spill] sm:$0xff] %v5571_v16  ;;  %v5575_v41 = vpop.f32.mrb[63].mxu0  ;;  %v5577_v8 = vpop.f32.mrb[63].mxu1 }
 0x191   :  { %6248 = vst [vmem:[#allocation83_spill] sm:$0xff] %v5575_v41  ;;  %6249 = vst [vmem:[#allocation84_spill] sm:$0xff] %v5577_v8 }
 0x195   :  { %v5581_v61 = vpop.f32.mrb[64].mxu0  ;;  %v5583_v2 = vpop.f32.mrb[64].mxu1 }
 0x196   :  { %6250 = vst [vmem:[#allocation85_spill] sm:$0xff] %v5581_v61  ;;  %6251 = vst [vmem:[#allocation86_spill] sm:$0xff] %v5583_v2  ;;  %v5587_v59 = vpop.f32.mrb[65].mxu0  ;;  %v5589_v56 = vpop.f32.mrb[65].mxu1 }
 0x197   :  { %6252 = vst [vmem:[#allocation87_spill] sm:$0xff] %v5587_v59  ;;  %6253 = vst [vmem:[#allocation88_spill] sm:$0xff] %v5589_v56  ;;  %v5593_v16 = vpop.f32.mrb[66].mxu0  ;;  %v5595_v13 = vpop.f32.mrb[66].mxu1 }
 0x198   :  { %6254 = vst [vmem:[#allocation89_spill] sm:$0xff] %v5593_v16  ;;  %6255 = vst [vmem:[#allocation90_spill] sm:$0xff] %v5595_v13  ;;  %v5599_v8 = vpop.f32.mrb[67].mxu0  ;;  %v5601_v41 = vpop.f32.mrb[67].mxu1 }
 0x199   :  { %6256 = vst [vmem:[#allocation91_spill] sm:$0xff] %v5599_v8  ;;  %6257 = vst [vmem:[#allocation92_spill] sm:$0xff] %v5601_v41 }
 0x19d   :  { %v5605_v2 = vpop.f32.mrb[68].mxu0  ;;  %v5607_v61 = vpop.f32.mrb[68].mxu1 }
 0x19e   :  { %6258 = vst [vmem:[#allocation93_spill] sm:$0xff] %v5605_v2  ;;  %6259 = vst [vmem:[#allocation94_spill] sm:$0xff] %v5607_v61  ;;  %v5611_v56 = vpop.f32.mrb[69].mxu0  ;;  %v5613_v59 = vpop.f32.mrb[69].mxu1 }
 0x19f   :  { %6260 = vst [vmem:[#allocation95_spill] sm:$0xff] %v5611_v56  ;;  %6261 = vst [vmem:[#allocation96_spill] sm:$0xff] %v5613_v59  ;;  %v5617_v13 = vpop.f32.mrb[70].mxu0  ;;  %v5619_v16 = vpop.f32.mrb[70].mxu1 }
 0x1a0   :  { %6262 = vst [vmem:[#allocation97_spill] sm:$0xff] %v5617_v13  ;;  %6263 = vst [vmem:[#allocation98_spill] sm:$0xff] %v5619_v16  ;;  %v5623_v41 = vpop.f32.mrb[71].mxu0  ;;  %v5625_v8 = vpop.f32.mrb[71].mxu1 }
 0x1a1   :  { %6264 = vst [vmem:[#allocation99_spill] sm:$0xff] %v5623_v41  ;;  %6265 = vst [vmem:[#allocation100_spill] sm:$0xff] %v5625_v8  ;;  %v2202_v61 = vpop.permute.xlu0 %2201 }
 0x1a5   :  { %v1411_v2 = vpop.f32.mrb[72].mxu0  ;;  %v1912_v18 = vpop.f32.mrb[72].mxu1 }
 0x1a6   :  { %v1590_v59 = vmax.f32 %v6266_v19, %v1411_v2  ;;  %v1413_v56 = vpop.f32.mrb[73].mxu0  ;;  %v1914_v22 = vpop.f32.mrb[73].mxu1 }
 0x1a7   :  { %v1591_v5 = vmax.f32 %v6267_v17, %v1413_v56  ;;  %v1415_v16 = vpop.f32.mrb[74].mxu0  ;;  %v1916_v13 = vpop.f32.mrb[74].mxu1 }
 0x1a8   :  { %v2091_v25 = vmax.f32 %v1590_v59, %v1912_v18  ;;  %v1592_v46 = vmax.f32 %v6268_v30, %v1415_v16  ;;  %v1417_v8 = vpop.f32.mrb[75].mxu0  ;;  %v1918_v41 = vpop.f32.mrb[75].mxu1  ;;  %v4247_v18 = vld [vmem:[%s6058_s3 + $0x4] ss:$12 sps:$4 sm:$0xff]  }
 0x1a9   :  { %v2092_v35 = vmax.f32 %v1591_v5, %v1914_v22  ;;  %v1593_v55 = vmax.f32 %v6269_v54, %v1417_v8  ;;  %v2207_v38 = vpop.permute.xlu0 %2206  ;;  %v2212_v56 = vpop.permute.xlu1 %2211  ;;  %2680 = vmatprep.mubr.bf16.mxu0 %v4247_v18  ;;  %v6271_v22 = vmax.f32 %v5137_v9, %v5139_v10 }
 0x1aa   :  { %v2379_v2 = vadd.f32 %v2202_v61, %v2091_v25  ;;  %v2093_v19 = vmax.f32 %v1592_v46, %v1916_v13 }
 0x1ab   :  { %v2380_v44 = vadd.f32 %v2202_v61, %v2092_v35  ;;  %v2094_v57 = vmax.f32 %v1593_v55, %v1918_v41  ;;  %v6272_v41 = vmax.f32 %v5149_v14, %v5151_v15 }
 0x1ac   :  { %v2381_v58 = vadd.f32 %v2207_v38, %v2093_v19  ;;  %v2451_v62 = vmax.f32 %v2379_v2, 0.0  ;;  %v6273_v2 = vmax.f32 %v5161_v20, %v5163_v21 }
 0x1ad   :  { %v2382_v63 = vadd.f32 %v2207_v38, %v2094_v57  ;;  %v1421_v30 = vpop.f32.mrb[76].mxu0  ;;  %v1922_v59 = vpop.f32.mrb[76].mxu1  ;;  %v2452_v61 = vmax.f32 %v2380_v44, 0.0 }
 0x1ae   :  { %v2453_v5 = vmax.f32 %v2381_v58, 0.0  ;;  %v1594_v4 = vmax.f32 %v6270_v3, %v1421_v30  ;;  %v1423_v8 = vpop.f32.mrb[77].mxu0  ;;  %v1924_v25 = vpop.f32.mrb[77].mxu1 }
 0x1af   :  { %v2454_v35 = vmax.f32 %v2382_v63, 0.0  ;;  %v1595_v17 = vmax.f32 %v6271_v22, %v1423_v8  ;;  %v1425_v16 = vpop.f32.mrb[78].mxu0  ;;  %v1926_v13 = vpop.f32.mrb[78].mxu1 }
 0x1b0   :  { %v2523_v46 = vpack.c.bf16 %v2453_v5, %v2451_v62  ;;  %v2095_v38 = vmax.f32 %v1594_v4, %v1922_v59  ;;  %v1596_v54 = vmax.f32 %v6272_v41, %v1425_v16  ;;  %v1427_v55 = vpop.f32.mrb[79].mxu0  ;;  %v1928_v6 = vpop.f32.mrb[79].mxu1  ;;  %v6274_v5 = vmax.f32 %v5167_v23, %v5169_v24 }
 0x1b1   :  { %v2096_v7 = vmax.f32 %v1595_v17, %v1924_v25  ;;  %v1597_v44 = vmax.f32 %v6273_v2, %v1427_v55  ;;  %v2524_v19 = vpack.c.bf16 %v2454_v35, %v2452_v61  ;;  %v2217_v9 = vpop.permute.xlu1 %2216  ;;  %v6276_v16 = vmax.f32 %v5185_v31, %v5187_v32  ;;  %v2222_v23 = vpop.permute.xlu0 %2221 }
 0x1b2   :  { %v2383_v57 = vadd.f32 %v2212_v56, %v2095_v38  ;;  %v2097_v58 = vmax.f32 %v1596_v54, %v1926_v13  ;;  %v6277_v41 = vmax.f32 %v5197_v36, %v5199_v37 }
 0x1b3   :  { %v2384_v10 = vadd.f32 %v2212_v56, %v2096_v7  ;;  %v2098_v18 = vmax.f32 %v1597_v44, %v1928_v6  ;;  %2648 = vmatprep.subr.bf16.mxu0 %v2524_v19  ;;  %v6275_v56 = vmax.f32 %v5173_v26, %v5175_v27 }
 0x1b4   :  { %v2385_v62 = vadd.f32 %v2217_v9, %v2097_v58  ;;  %2649 = vmatpush1.bf16.msra.mxu0 %v2523_v46  ;;  %v2455_v15 = vmax.f32 %v2383_v57, 0.0 }
 0x1b5   :  { %v2386_v63 = vadd.f32 %v2217_v9, %v2098_v18  ;;  %v1431_v30 = vpop.f32.mrb[80].mxu0  ;;  %v1932_v14 = vpop.f32.mrb[80].mxu1  ;;  %v2456_v4 = vmax.f32 %v2384_v10, 0.0  ;;  %v6278_v9 = vmax.f32 %v5203_v39, %v5205_v40 }
 0x1b6   :  { %v2457_v59 = vmax.f32 %v2385_v62, 0.0  ;;  %v1598_v3 = vmax.f32 %v6274_v5, %v1431_v30  ;;  %v1433_v20 = vpop.f32.mrb[81].mxu0  ;;  %v1934_v21 = vpop.f32.mrb[81].mxu1 }
 0x1b7   :  { %v2458_v8 = vmax.f32 %v2386_v63, 0.0  ;;  %v1599_v25 = vmax.f32 %v6275_v56, %v1433_v20  ;;  %v1435_v61 = vpop.f32.mrb[82].mxu0  ;;  %v1936_v35 = vpop.f32.mrb[82].mxu1  ;;  %v6279_v63 = vmax.f32 %v5209_v42, %v5211_v43 }
 0x1b8   :  { %v2525_v22 = vpack.c.bf16 %v2457_v59, %v2455_v15  ;;  %v2099_v17 = vmax.f32 %v1598_v3, %v1932_v14  ;;  %v1600_v13 = vmax.f32 %v6276_v16, %v1435_v61  ;;  %v1437_v46 = vpop.f32.mrb[83].mxu0  ;;  %v1938_v38 = vpop.f32.mrb[83].mxu1  ;;  %v6280_v3 = vmax.f32 %v5221_v47, %v5223_v48 }
 0x1b9   :  { %v2100_v24 = vmax.f32 %v1599_v25, %v1934_v21  ;;  %v1601_v54 = vmax.f32 %v6277_v41, %v1437_v46  ;;  %v2526_v55 = vpack.c.bf16 %v2458_v8, %v2456_v4  ;;  %v2227_v27 = vpop.permute.xlu1 %2226  ;;  %v2232_v39 = vpop.permute.xlu0 %2231  ;;  %v6281_v8 = vmax.f32 %v5233_v52, %v5235_v53 }
 0x1ba   :  { %v2387_v6 = vadd.f32 %v2222_v23, %v2099_v17  ;;  %v2101_v26 = vmax.f32 %v1600_v13, %v1936_v35 }
 0x1bb   :  { %v2388_v7 = vadd.f32 %v2222_v23, %v2100_v24  ;;  %v2102_v2 = vmax.f32 %v1601_v54, %v1938_v38  ;;  %2650 = vmatprep.subr.bf16.mxu0 %v2526_v55  ;;  %v6282_v38 = vmax.f32 %v5239_v60, %v5241_v0  ;;  %v6283_v54 = vmax.f32 %v5245_v11, %v5247_v12 }
 0x1bc   :  { %v2389_v44 = vadd.f32 %v2227_v27, %v2101_v26  ;;  %2651 = vmatpush1.bf16.msra.mxu0 %v2525_v22  ;;  %v2459_v57 = vmax.f32 %v2387_v6, 0.0 }
 0x1bd   :  { %v2390_v19 = vadd.f32 %v2227_v27, %v2102_v2  ;;  %v1441_v31 = vpop.f32.mrb[84].mxu0  ;;  %v1942_v32 = vpop.f32.mrb[84].mxu1  ;;  %v2460_v18 = vmax.f32 %v2388_v7, 0.0  ;;  %v6284_v2 = vmax.f32 %v5257_v29, %v5259_v33 }
 0x1be   :  { %v2461_v58 = vmax.f32 %v2389_v44, 0.0  ;;  %v1602_v10 = vmax.f32 %v6278_v9, %v1441_v31  ;;  %v1443_v36 = vpop.f32.mrb[85].mxu0  ;;  %v1944_v37 = vpop.f32.mrb[85].mxu1 }
 0x1bf   :  { %v2462_v62 = vmax.f32 %v2390_v19, 0.0  ;;  %v1603_v30 = vmax.f32 %v6279_v63, %v1443_v36  ;;  %v1445_v14 = vpop.f32.mrb[86].mxu0  ;;  %v1946_v15 = vpop.f32.mrb[86].mxu1 }
 0x1c0   :  { %v2527_v59 = vpack.c.bf16 %v2461_v58, %v2459_v57  ;;  %v2103_v5 = vmax.f32 %v1602_v10, %v1942_v32  ;;  %v1604_v20 = vmax.f32 %v6280_v3, %v1445_v14  ;;  %v1447_v21 = vpop.f32.mrb[87].mxu0  ;;  %v1948_v4 = vpop.f32.mrb[87].mxu1  ;;  %v6285_v32 = vmax.f32 %v5269_v49, %v5271_v50 }
 0x1c1   :  { %v2104_v40 = vmax.f32 %v1603_v30, %v1944_v37  ;;  %v1605_v56 = vmax.f32 %v6281_v8, %v1447_v21  ;;  %v2528_v25 = vpack.c.bf16 %v2462_v62, %v2460_v18  ;;  %v2237_v43 = vpop.permute.xlu1 %2236  ;;  %v2242_v60 = vpop.permute.xlu0 %2241  ;;  %v6286_v30 = vmax.f32 %v5275_v28, %v5277_v1 }
 0x1c2   :  { %v2391_v61 = vadd.f32 %v2232_v39, %v2103_v5  ;;  %v2105_v42 = vmax.f32 %v1604_v20, %v1946_v15  ;;  %v6287_v5 = vmax.f32 %v5281_v51, %v5283_v45 }
 0x1c3   :  { %v2392_v35 = vadd.f32 %v2232_v39, %v2104_v40  ;;  %v2106_v22 = vmax.f32 %v1605_v56, %v1948_v4  ;;  %2652 = vmatprep.subr.bf16.mxu0 %v2528_v25  ;;  %v6288_v40 = vld [vmem:[#allocation2_spill] sm:$0xff] }
 0x1c4   :  { %v2393_v17 = vadd.f32 %v2237_v43, %v2105_v42  ;;  %2653 = vmatpush1.bf16.msra.mxu0 %v2527_v59  ;;  %v2463_v13 = vmax.f32 %v2391_v61, 0.0  ;;  %v6289_v8 = vmax.f32 %v5293_v34, %v6288_v40  ;;  %v6290_v42 = vld [vmem:[#allocation3_spill] sm:$0xff]  ;;  %v6306_v40 = vld [vmem:[#allocation14_spill] sm:$0xff] }
 0x1c5   :  { %v2394_v16 = vadd.f32 %v2237_v43, %v2106_v22  ;;  %v1451_v47 = vpop.f32.mrb[88].mxu0  ;;  %v1952_v48 = vpop.f32.mrb[88].mxu1  ;;  %v2464_v24 = vmax.f32 %v2392_v35, 0.0  ;;  %v6291_v43 = vld [vmem:[#allocation4_spill] sm:$0xff] }
 0x1c6   :  { %v2465_v46 = vmax.f32 %v2393_v17, 0.0  ;;  %v1606_v23 = vmax.f32 %v6282_v38, %v1451_v47  ;;  %v1453_v52 = vpop.f32.mrb[89].mxu0  ;;  %v1954_v53 = vpop.f32.mrb[89].mxu1  ;;  %v6292_v35 = vmax.f32 %v6290_v42, %v6291_v43  ;;  %v6308_v42 = vld [vmem:[#allocation15_spill] sm:$0xff]  ;;  %v6309_v43 = vld [vmem:[#allocation16_spill] sm:$0xff] }
 0x1c7   :  { %v2466_v41 = vmax.f32 %v2394_v16, 0.0  ;;  %v1607_v55 = vmax.f32 %v6283_v54, %v1453_v52  ;;  %v1455_v6 = vpop.f32.mrb[90].mxu0  ;;  %v1956_v26 = vpop.f32.mrb[90].mxu1 }
 0x1c8   :  { %v2529_v27 = vpack.c.bf16 %v2465_v46, %v2463_v13  ;;  %v2107_v7 = vmax.f32 %v1606_v23, %v1952_v48  ;;  %v1608_v44 = vmax.f32 %v6284_v2, %v1455_v6  ;;  %v1457_v19 = vpop.f32.mrb[91].mxu0  ;;  %v1958_v31 = vpop.f32.mrb[91].mxu1  ;;  %v6297_v2 = vld [vmem:[#allocation8_spill] sm:$0xff] }
 0x1c9   :  { %v2108_v0 = vmax.f32 %v1607_v55, %v1954_v53  ;;  %v1609_v57 = vmax.f32 %v6285_v32, %v1457_v19  ;;  %v2530_v58 = vpack.c.bf16 %v2466_v41, %v2464_v24  ;;  %v2247_v12 = vpop.permute.xlu1 %2246  ;;  %v2252_v1 = vpop.permute.xlu0 %2251  ;;  %v6293_v53 = vld [vmem:[#allocation5_spill] sm:$0xff]  ;;  %v6294_v24 = vld [vmem:[#allocation6_spill] sm:$0xff] }
 0x1ca   :  { %v2395_v9 = vadd.f32 %v2242_v60, %v2107_v7  ;;  %v2109_v11 = vmax.f32 %v1608_v44, %v1956_v26  ;;  %v6295_v41 = vmax.f32 %v6293_v53, %v6294_v24  ;;  %v6296_v7 = vld [vmem:[#allocation7_spill] sm:$0xff]  ;;  %v6315_v24 = vld [vmem:[#allocation20_spill] sm:$0xff] }
 0x1cb   :  { %v2396_v10 = vadd.f32 %v2242_v60, %v2108_v0  ;;  %v2110_v36 = vmax.f32 %v1609_v57, %v1958_v31  ;;  %2654 = vmatprep.subr.bf16.mxu0 %v2530_v58  ;;  %v6298_v44 = vmax.f32 %v6296_v7, %v6297_v2  ;;  %v6299_v57 = vld [vmem:[#allocation9_spill] sm:$0xff]  ;;  %v6300_v58 = vld [vmem:[#allocation10_spill] sm:$0xff]  ;;  %v6314_v53 = vld [vmem:[#allocation19_spill] sm:$0xff] }
 0x1cc   :  { %v2397_v37 = vadd.f32 %v2247_v12, %v2109_v11  ;;  %2655 = vmatpush1.bf16.msra.mxu0 %v2529_v27  ;;  %v2467_v62 = vmax.f32 %v2395_v9, 0.0  ;;  %v6301_v9 = vmax.f32 %v6299_v57, %v6300_v58  ;;  %v6317_v57 = vld [vmem:[#allocation21_spill] sm:$0xff]  ;;  %v6318_v58 = vld [vmem:[#allocation22_spill] sm:$0xff] }
 0x1cd   :  { %v2398_v18 = vadd.f32 %v2247_v12, %v2110_v36  ;;  %v1461_v29 = vpop.f32.mrb[92].mxu0  ;;  %v1962_v33 = vpop.f32.mrb[92].mxu1  ;;  %v2468_v15 = vmax.f32 %v2396_v10, 0.0 }
 0x1ce   :  { %v2469_v63 = vmax.f32 %v2397_v37, 0.0  ;;  %v1610_v14 = vmax.f32 %v6286_v30, %v1461_v29  ;;  %v1463_v49 = vpop.f32.mrb[93].mxu0  ;;  %v1964_v50 = vpop.f32.mrb[93].mxu1  ;;  %v6303_v29 = vld [vmem:[#allocation12_spill] sm:$0xff] }
 0x1cf   :  { %v2470_v59 = vmax.f32 %v2398_v18, 0.0  ;;  %v1611_v3 = vmax.f32 %v6287_v5, %v1463_v49  ;;  %v1465_v20 = vpop.f32.mrb[94].mxu0  ;;  %v1966_v21 = vpop.f32.mrb[94].mxu1  ;;  %v6302_v18 = vld [vmem:[#allocation11_spill] sm:$0xff] }
 0x1d0   :  { %v2531_v4 = vpack.c.bf16 %v2469_v63, %v2467_v62  ;;  %v2111_v39 = vmax.f32 %v1610_v14, %v1962_v33  ;;  %v1612_v56 = vmax.f32 %v6289_v8, %v1465_v20  ;;  %v1467_v25 = vpop.f32.mrb[95].mxu0  ;;  %v1968_v61 = vpop.f32.mrb[95].mxu1  ;;  %v6304_v33 = vmax.f32 %v6302_v18, %v6303_v29  ;;  %v6320_v18 = vld [vmem:[#allocation23_spill] sm:$0xff]  ;;  %v6321_v29 = vld [vmem:[#allocation24_spill] sm:$0xff] }
 0x1d1   :  { %v2112_v28 = vmax.f32 %v1611_v3, %v1964_v50  ;;  %v1613_v22 = vmax.f32 %v6292_v35, %v1467_v25  ;;  %v2532_v17 = vpack.c.bf16 %v2470_v59, %v2468_v15  ;;  %v2257_v45 = vpop.permute.xlu1 %2256  ;;  %v2262_v36 = vpop.permute.xlu0 %2261  ;;  %v6310_v35 = vmax.f32 %v6308_v42, %v6309_v43 }
 0x1d2   :  { %v2399_v16 = vadd.f32 %v2252_v1, %v2111_v39  ;;  %v2113_v51 = vmax.f32 %v1612_v56, %v1966_v21  ;;  %v6305_v39 = vld [vmem:[#allocation13_spill] sm:$0xff] }
 0x1d3   :  { %v2400_v47 = vadd.f32 %v2252_v1, %v2112_v28  ;;  %v2114_v48 = vmax.f32 %v1613_v22, %v1968_v61  ;;  %2656 = vmatprep.subr.bf16.mxu0 %v2532_v17  ;;  %v6307_v8 = vmax.f32 %v6305_v39, %v6306_v40  ;;  %v6326_v39 = vld [vmem:[#allocation27_spill] sm:$0xff]  ;;  %v6327_v40 = vld [vmem:[#allocation28_spill] sm:$0xff] }
 0x1d4   :  { %v2401_v13 = vadd.f32 %v2257_v45, %v2113_v51  ;;  %2657 = vmatpush1.bf16.msra.mxu0 %v2531_v4  ;;  %v2471_v23 = vmax.f32 %v2399_v16, 0.0 }
 0x1d5   :  { %v2402_v46 = vadd.f32 %v2257_v45, %v2114_v48  ;;  %v1471_v34 = vpop.f32.mrb[96].mxu0  ;;  %v1972_v38 = vpop.f32.mrb[96].mxu1  ;;  %v2472_v26 = vmax.f32 %v2400_v47, 0.0  ;;  %v6311_v47 = vld [vmem:[#allocation17_spill] sm:$0xff]  ;;  %v6312_v48 = vld [vmem:[#allocation18_spill] sm:$0xff] }
 0x1d6   :  { %v2473_v52 = vmax.f32 %v2401_v13, 0.0  ;;  %v1614_v54 = vmax.f32 %v6295_v41, %v1471_v34  ;;  %v1473_v55 = vpop.f32.mrb[97].mxu0  ;;  %v1974_v6 = vpop.f32.mrb[97].mxu1  ;;  %v6313_v13 = vmax.f32 %v6311_v47, %v6312_v48  ;;  %v6316_v41 = vmax.f32 %v6314_v53, %v6315_v24  ;;  %v6329_v47 = vld [vmem:[#allocation29_spill] sm:$0xff]  ;;  %v6330_v48 = vld [vmem:[#allocation30_spill] sm:$0xff]  ;;  %v6332_v53 = vld [vmem:[#allocation31_spill] sm:$0xff] }
 0x1d7   :  { %v2474_v27 = vmax.f32 %v2402_v46, 0.0  ;;  %v1615_v19 = vmax.f32 %v6298_v44, %v1473_v55  ;;  %v1475_v31 = vpop.f32.mrb[98].mxu0  ;;  %v1976_v60 = vpop.f32.mrb[98].mxu1  ;;  %v6333_v24 = vld [vmem:[#allocation32_spill] sm:$0xff] }
 0x1d8   :  { %v2533_v0 = vpack.c.bf16 %v2473_v52, %v2471_v23  ;;  %v2115_v32 = vmax.f32 %v1614_v54, %v1972_v38  ;;  %v1616_v11 = vmax.f32 %v6301_v9, %v1475_v31  ;;  %v1477_v12 = vpop.f32.mrb[99].mxu0  ;;  %v1978_v10 = vpop.f32.mrb[99].mxu1  ;;  %v6319_v9 = vmax.f32 %v6317_v57, %v6318_v58  ;;  %v6338_v57 = vld [vmem:[#allocation35_spill] sm:$0xff]  ;;  %v6339_v58 = vld [vmem:[#allocation36_spill] sm:$0xff] }
 0x1d9   :  { %v2116_v37 = vmax.f32 %v1615_v19, %v1974_v6  ;;  %v1617_v62 = vmax.f32 %v6304_v33, %v1477_v12  ;;  %v2534_v63 = vpack.c.bf16 %v2474_v27, %v2472_v26  ;;  %v2267_v49 = vpop.permute.xlu1 %2266  ;;  %v2272_v23 = vpop.permute.xlu0 %2271  ;;  %v6322_v33 = vmax.f32 %v6320_v18, %v6321_v29 }
 0x1da   :  { %v2403_v30 = vadd.f32 %v2262_v36, %v2115_v32  ;;  %v2117_v14 = vmax.f32 %v1616_v11, %v1976_v60 }
 0x1db   :  { %v2404_v50 = vadd.f32 %v2262_v36, %v2116_v37  ;;  %v2118_v15 = vmax.f32 %v1617_v62, %v1978_v10  ;;  %2658 = vmatprep.subr.bf16.mxu0 %v2534_v63 }
 0x1dc   :  { %v2405_v59 = vadd.f32 %v2267_v49, %v2117_v14  ;;  %2659 = vmatpush1.bf16.msra.mxu0 %v2533_v0  ;;  %v2475_v21 = vmax.f32 %v2403_v30, 0.0 }
 0x1dd   :  { %v2406_v5 = vadd.f32 %v2267_v49, %v2118_v15  ;;  %v1481_v3 = vpop.f32.mrb[100].mxu0  ;;  %v1982_v20 = vpop.f32.mrb[100].mxu1  ;;  %v2476_v1 = vmax.f32 %v2404_v50, 0.0  ;;  %v6323_v50 = vld [vmem:[#allocation25_spill] sm:$0xff]  ;;  %v6324_v15 = vld [vmem:[#allocation26_spill] sm:$0xff] }
 0x1de   :  { %v2477_v4 = vmax.f32 %v2405_v59, 0.0  ;;  %v1618_v56 = vmax.f32 %v6307_v8, %v1481_v3  ;;  %v1483_v25 = vpop.f32.mrb[101].mxu0  ;;  %v1984_v61 = vpop.f32.mrb[101].mxu1  ;;  %v6325_v59 = vmax.f32 %v6323_v50, %v6324_v15  ;;  %v6328_v8 = vmax.f32 %v6326_v39, %v6327_v40  ;;  %v6341_v50 = vld [vmem:[#allocation37_spill] sm:$0xff]  ;;  %v6342_v15 = vld [vmem:[#allocation38_spill] sm:$0xff]  ;;  %v6344_v39 = vld [vmem:[#allocation39_spill] sm:$0xff] }
 0x1df   :  { %v2478_v28 = vmax.f32 %v2406_v5, 0.0  ;;  %v1619_v22 = vmax.f32 %v6310_v35, %v1483_v25  ;;  %v1485_v17 = vpop.f32.mrb[102].mxu0  ;;  %v1986_v16 = vpop.f32.mrb[102].mxu1  ;;  %v6345_v40 = vld [vmem:[#allocation40_spill] sm:$0xff] }
 0x1e0   :  { %v2535_v51 = vpack.c.bf16 %v2477_v4, %v2475_v21  ;;  %v2119_v45 = vmax.f32 %v1618_v56, %v1982_v20  ;;  %v1620_v46 = vmax.f32 %v6313_v13, %v1485_v17  ;;  %v1487_v34 = vpop.f32.mrb[103].mxu0  ;;  %v1988_v38 = vpop.f32.mrb[103].mxu1  ;;  %v6331_v13 = vmax.f32 %v6329_v47, %v6330_v48  ;;  %v6350_v47 = vld [vmem:[#allocation43_spill] sm:$0xff]  ;;  %v6351_v48 = vld [vmem:[#allocation44_spill] sm:$0xff] }
 0x1e1   :  { %v2120_v52 = vmax.f32 %v1619_v22, %v1984_v61  ;;  %v1621_v54 = vmax.f32 %v6316_v41, %v1487_v34  ;;  %v2536_v55 = vpack.c.bf16 %v2478_v28, %v2476_v1  ;;  %v2277_v27 = vpop.permute.xlu1 %2276  ;;  %v2282_v21 = vpop.permute.xlu0 %2281  ;;  %v6334_v41 = vmax.f32 %v6332_v53, %v6333_v24 }
 0x1e2   :  { %v2407_v6 = vadd.f32 %v2272_v23, %v2119_v45  ;;  %v2121_v26 = vmax.f32 %v1620_v46, %v1986_v16 }
 0x1e3   :  { %v2408_v7 = vadd.f32 %v2272_v23, %v2120_v52  ;;  %v2122_v2 = vmax.f32 %v1621_v54, %v1988_v38  ;;  %2660 = vmatprep.subr.bf16.mxu0 %v2536_v55 }
 0x1e4   :  { %v2409_v44 = vadd.f32 %v2277_v27, %v2121_v26  ;;  %2661 = vmatpush1.bf16.msra.mxu0 %v2535_v51  ;;  %v2479_v0 = vmax.f32 %v2407_v6, 0.0 }
 0x1e5   :  { %v2410_v19 = vadd.f32 %v2277_v27, %v2122_v2  ;;  %v1491_v31 = vpop.f32.mrb[104].mxu0  ;;  %v1992_v60 = vpop.f32.mrb[104].mxu1  ;;  %v2480_v36 = vmax.f32 %v2408_v7, 0.0  ;;  %v6335_v7 = vld [vmem:[#allocation33_spill] sm:$0xff]  ;;  %v6336_v2 = vld [vmem:[#allocation34_spill] sm:$0xff] }
 0x1e6   :  { %v2481_v32 = vmax.f32 %v2409_v44, 0.0  ;;  %v1622_v11 = vmax.f32 %v6319_v9, %v1491_v31  ;;  %v1493_v12 = vpop.f32.mrb[105].mxu0  ;;  %v1994_v10 = vpop.f32.mrb[105].mxu1  ;;  %v6337_v44 = vmax.f32 %v6335_v7, %v6336_v2  ;;  %v6340_v9 = vmax.f32 %v6338_v57, %v6339_v58  ;;  %v6353_v7 = vld [vmem:[#allocation45_spill] sm:$0xff]  ;;  %v6354_v2 = vld [vmem:[#allocation46_spill] sm:$0xff]  ;;  %v6356_v57 = vld [vmem:[#allocation47_spill] sm:$0xff] }
 0x1e7   :  { %v2482_v37 = vmax.f32 %v2410_v19, 0.0  ;;  %v1623_v62 = vmax.f32 %v6322_v33, %v1493_v12  ;;  %v1495_v63 = vpop.f32.mrb[106].mxu0  ;;  %v1996_v30 = vpop.f32.mrb[106].mxu1  ;;  %v6357_v58 = vld [vmem:[#allocation48_spill] sm:$0xff] }
 0x1e8   :  { %v2537_v14 = vpack.c.bf16 %v2481_v32, %v2479_v0  ;;  %v2123_v49 = vmax.f32 %v1622_v11, %v1992_v60  ;;  %v1624_v5 = vmax.f32 %v6325_v59, %v1495_v63  ;;  %v1497_v3 = vpop.f32.mrb[107].mxu0  ;;  %v1998_v20 = vpop.f32.mrb[107].mxu1  ;;  %v6343_v59 = vmax.f32 %v6341_v50, %v6342_v15  ;;  %v6362_v50 = vld [vmem:[#allocation51_spill] sm:$0xff]  ;;  %v6363_v15 = vld [vmem:[#allocation52_spill] sm:$0xff] }
 0x1e9   :  { %v2124_v4 = vmax.f32 %v1623_v62, %v1994_v10  ;;  %v1625_v56 = vmax.f32 %v6328_v8, %v1497_v3  ;;  %v2538_v25 = vpack.c.bf16 %v2482_v37, %v2480_v36  ;;  %v2287_v28 = vpop.permute.xlu1 %2286  ;;  %v2292_v0 = vpop.permute.xlu0 %2291  ;;  %v6346_v8 = vmax.f32 %v6344_v39, %v6345_v40 }
 0x1ea   :  { %v2411_v61 = vadd.f32 %v2282_v21, %v2123_v49  ;;  %v2125_v1 = vmax.f32 %v1624_v5, %v1996_v30 }
 0x1eb   :  { %v2412_v42 = vadd.f32 %v2282_v21, %v2124_v4  ;;  %v2126_v43 = vmax.f32 %v1625_v56, %v1998_v20  ;;  %2662 = vmatprep.subr.bf16.mxu0 %v2538_v25 }
 0x1ec   :  { %v2413_v35 = vadd.f32 %v2287_v28, %v2125_v1  ;;  %2663 = vmatpush1.bf16.msra.mxu0 %v2537_v14  ;;  %v2483_v51 = vmax.f32 %v2411_v61, 0.0 }
 0x1ed   :  { %v2414_v22 = vadd.f32 %v2287_v28, %v2126_v43  ;;  %v1501_v17 = vpop.f32.mrb[108].mxu0  ;;  %v2002_v16 = vpop.f32.mrb[108].mxu1  ;;  %v2484_v23 = vmax.f32 %v2412_v42, 0.0  ;;  %v6347_v42 = vld [vmem:[#allocation41_spill] sm:$0xff]  ;;  %v6348_v43 = vld [vmem:[#allocation42_spill] sm:$0xff] }
 0x1ee   :  { %v2485_v45 = vmax.f32 %v2413_v35, 0.0  ;;  %v1626_v46 = vmax.f32 %v6331_v13, %v1501_v17  ;;  %v1503_v34 = vpop.f32.mrb[109].mxu0  ;;  %v2004_v38 = vpop.f32.mrb[109].mxu1  ;;  %v6349_v35 = vmax.f32 %v6347_v42, %v6348_v43  ;;  %v6352_v13 = vmax.f32 %v6350_v47, %v6351_v48  ;;  %v6365_v42 = vld [vmem:[#allocation53_spill] sm:$0xff]  ;;  %v6366_v43 = vld [vmem:[#allocation54_spill] sm:$0xff]  ;;  %v6368_v47 = vld [vmem:[#allocation55_spill] sm:$0xff] }
 0x1ef   :  { %v2486_v52 = vmax.f32 %v2414_v22, 0.0  ;;  %v1627_v54 = vmax.f32 %v6334_v41, %v1503_v34  ;;  %v1505_v55 = vpop.f32.mrb[110].mxu0  ;;  %v2006_v6 = vpop.f32.mrb[110].mxu1  ;;  %v6369_v48 = vld [vmem:[#allocation56_spill] sm:$0xff] }
 0x1f0   :  { %v2539_v26 = vpack.c.bf16 %v2485_v45, %v2483_v51  ;;  %v2127_v27 = vmax.f32 %v1626_v46, %v2002_v16  ;;  %v1628_v19 = vmax.f32 %v6337_v44, %v1505_v55  ;;  %v1507_v31 = vpop.f32.mrb[111].mxu0  ;;  %v2008_v60 = vpop.f32.mrb[111].mxu1  ;;  %v6355_v44 = vmax.f32 %v6353_v7, %v6354_v2  ;;  %v6374_v7 = vld [vmem:[#allocation59_spill] sm:$0xff]  ;;  %v6375_v2 = vld [vmem:[#allocation60_spill] sm:$0xff] }
 0x1f1   :  { %v2128_v32 = vmax.f32 %v1627_v54, %v2004_v38  ;;  %v1629_v11 = vmax.f32 %v6340_v9, %v1507_v31  ;;  %v2540_v12 = vpack.c.bf16 %v2486_v52, %v2484_v23  ;;  %v2297_v37 = vpop.permute.xlu1 %2296  ;;  %v2302_v51 = vpop.permute.xlu0 %2301  ;;  %v6358_v9 = vmax.f32 %v6356_v57, %v6357_v58 }
 0x1f2   :  { %v2415_v10 = vadd.f32 %v2292_v0, %v2127_v27  ;;  %v2129_v36 = vmax.f32 %v1628_v19, %v2006_v6 }
 0x1f3   :  { %v2416_v18 = vadd.f32 %v2292_v0, %v2128_v32  ;;  %v2130_v29 = vmax.f32 %v1629_v11, %v2008_v60  ;;  %2664 = vmatprep.subr.bf16.mxu0 %v2540_v12 }
 0x1f4   :  { %v2417_v33 = vadd.f32 %v2297_v37, %v2129_v36  ;;  %2665 = vmatpush1.bf16.msra.mxu0 %v2539_v26  ;;  %v2487_v14 = vmax.f32 %v2415_v10, 0.0 }
 0x1f5   :  { %v2418_v62 = vadd.f32 %v2297_v37, %v2130_v29  ;;  %v1511_v63 = vpop.f32.mrb[112].mxu0  ;;  %v2012_v30 = vpop.f32.mrb[112].mxu1  ;;  %v2488_v21 = vmax.f32 %v2416_v18, 0.0  ;;  %v6359_v18 = vld [vmem:[#allocation49_spill] sm:$0xff]  ;;  %v6360_v29 = vld [vmem:[#allocation50_spill] sm:$0xff] }
 0x1f6   :  { %v2489_v49 = vmax.f32 %v2417_v33, 0.0  ;;  %v1630_v5 = vmax.f32 %v6343_v59, %v1511_v63  ;;  %v1513_v3 = vpop.f32.mrb[113].mxu0  ;;  %v2014_v20 = vpop.f32.mrb[113].mxu1  ;;  %v6361_v33 = vmax.f32 %v6359_v18, %v6360_v29  ;;  %v6364_v59 = vmax.f32 %v6362_v50, %v6363_v15  ;;  %v6377_v18 = vld [vmem:[#allocation61_spill] sm:$0xff]  ;;  %v6378_v29 = vld [vmem:[#allocation62_spill] sm:$0xff]  ;;  %v6380_v50 = vld [vmem:[#allocation63_spill] sm:$0xff] }
 0x1f7   :  { %v2490_v4 = vmax.f32 %v2418_v62, 0.0  ;;  %v1631_v56 = vmax.f32 %v6346_v8, %v1513_v3  ;;  %v1515_v25 = vpop.f32.mrb[114].mxu0  ;;  %v2016_v61 = vpop.f32.mrb[114].mxu1  ;;  %v6381_v15 = vld [vmem:[#allocation64_spill] sm:$0xff] }
 0x1f8   :  { %v2541_v1 = vpack.c.bf16 %v2489_v49, %v2487_v14  ;;  %v2131_v28 = vmax.f32 %v1630_v5, %v2012_v30  ;;  %v1632_v22 = vmax.f32 %v6349_v35, %v1515_v25  ;;  %v1517_v17 = vpop.f32.mrb[115].mxu0  ;;  %v2018_v16 = vpop.f32.mrb[115].mxu1  ;;  %v6367_v35 = vmax.f32 %v6365_v42, %v6366_v43  ;;  %v6386_v42 = vld [vmem:[#allocation67_spill] sm:$0xff]  ;;  %v6387_v43 = vld [vmem:[#allocation68_spill] sm:$0xff] }
 0x1f9   :  { %v2132_v45 = vmax.f32 %v1631_v56, %v2014_v20  ;;  %v1633_v46 = vmax.f32 %v6352_v13, %v1517_v17  ;;  %v2542_v34 = vpack.c.bf16 %v2490_v4, %v2488_v21  ;;  %v2307_v52 = vpop.permute.xlu1 %2306  ;;  %v2312_v14 = vpop.permute.xlu0 %2311  ;;  %v6370_v13 = vmax.f32 %v6368_v47, %v6369_v48 }
 0x1fa   :  { %v2419_v38 = vadd.f32 %v2302_v51, %v2131_v28  ;;  %v2133_v23 = vmax.f32 %v1632_v22, %v2016_v61 }
 0x1fb   :  { %v2420_v53 = vadd.f32 %v2302_v51, %v2132_v45  ;;  %v2134_v24 = vmax.f32 %v1633_v46, %v2018_v16  ;;  %2666 = vmatprep.subr.bf16.mxu0 %v2542_v34 }
 0x1fc   :  { %v2421_v41 = vadd.f32 %v2307_v52, %v2133_v23  ;;  %2667 = vmatpush1.bf16.msra.mxu0 %v2541_v1  ;;  %v2491_v26 = vmax.f32 %v2419_v38, 0.0 }
 0x1fd   :  { %v2422_v54 = vadd.f32 %v2307_v52, %v2134_v24  ;;  %v1521_v55 = vpop.f32.mrb[116].mxu0  ;;  %v2022_v6 = vpop.f32.mrb[116].mxu1  ;;  %v2492_v0 = vmax.f32 %v2420_v53, 0.0  ;;  %v6371_v53 = vld [vmem:[#allocation57_spill] sm:$0xff]  ;;  %v6372_v24 = vld [vmem:[#allocation58_spill] sm:$0xff] }
 0x1fe   :  { %v2493_v27 = vmax.f32 %v2421_v41, 0.0  ;;  %v1634_v19 = vmax.f32 %v6355_v44, %v1521_v55  ;;  %v1523_v31 = vpop.f32.mrb[117].mxu0  ;;  %v2024_v60 = vpop.f32.mrb[117].mxu1  ;;  %v6373_v41 = vmax.f32 %v6371_v53, %v6372_v24  ;;  %v6376_v44 = vmax.f32 %v6374_v7, %v6375_v2  ;;  %v6389_v53 = vld [vmem:[#allocation69_spill] sm:$0xff]  ;;  %v6390_v24 = vld [vmem:[#allocation70_spill] sm:$0xff]  ;;  %v6392_v7 = vld [vmem:[#allocation71_spill] sm:$0xff] }
 0x1ff   :  { %v2494_v32 = vmax.f32 %v2422_v54, 0.0  ;;  %v1635_v11 = vmax.f32 %v6358_v9, %v1523_v31  ;;  %v1525_v12 = vpop.f32.mrb[118].mxu0  ;;  %v2026_v10 = vpop.f32.mrb[118].mxu1  ;;  %v6393_v2 = vld [vmem:[#allocation72_spill] sm:$0xff] }
 0x200   :  { %v2543_v36 = vpack.c.bf16 %v2493_v27, %v2491_v26  ;;  %v2135_v37 = vmax.f32 %v1634_v19, %v2022_v6  ;;  %v1636_v62 = vmax.f32 %v6361_v33, %v1525_v12  ;;  %v1527_v63 = vpop.f32.mrb[119].mxu0  ;;  %v2028_v30 = vpop.f32.mrb[119].mxu1  ;;  %v6379_v33 = vmax.f32 %v6377_v18, %v6378_v29  ;;  %v6398_v18 = vld [vmem:[#allocation75_spill] sm:$0xff]  ;;  %v6399_v29 = vld [vmem:[#allocation76_spill] sm:$0xff] }
 0x201   :  { %v2136_v49 = vmax.f32 %v1635_v11, %v2024_v60  ;;  %v1637_v5 = vmax.f32 %v6364_v59, %v1527_v63  ;;  %v2544_v3 = vpack.c.bf16 %v2494_v32, %v2492_v0  ;;  %v2317_v4 = vpop.permute.xlu1 %2316  ;;  %v2322_v26 = vpop.permute.xlu0 %2321  ;;  %v6382_v59 = vmax.f32 %v6380_v50, %v6381_v15 }
 0x202   :  { %v2423_v20 = vadd.f32 %v2312_v14, %v2135_v37  ;;  %v2137_v21 = vmax.f32 %v1636_v62, %v2026_v10 }
 0x203   :  { %v2424_v39 = vadd.f32 %v2312_v14, %v2136_v49  ;;  %v2138_v40 = vmax.f32 %v1637_v5, %v2028_v30  ;;  %2668 = vmatprep.subr.bf16.mxu0 %v2544_v3 }
 0x204   :  { %v2425_v8 = vadd.f32 %v2317_v4, %v2137_v21  ;;  %2669 = vmatpush1.bf16.msra.mxu0 %v2543_v36  ;;  %v2495_v1 = vmax.f32 %v2423_v20, 0.0 }
 0x205   :  { %v2426_v56 = vadd.f32 %v2317_v4, %v2138_v40  ;;  %v1531_v25 = vpop.f32.mrb[120].mxu0  ;;  %v2032_v61 = vpop.f32.mrb[120].mxu1  ;;  %v2496_v51 = vmax.f32 %v2424_v39, 0.0  ;;  %v6383_v39 = vld [vmem:[#allocation65_spill] sm:$0xff]  ;;  %v6384_v40 = vld [vmem:[#allocation66_spill] sm:$0xff] }
 0x206   :  { %v2497_v28 = vmax.f32 %v2425_v8, 0.0  ;;  %v1638_v22 = vmax.f32 %v6367_v35, %v1531_v25  ;;  %v1533_v17 = vpop.f32.mrb[121].mxu0  ;;  %v2034_v16 = vpop.f32.mrb[121].mxu1  ;;  %v6385_v8 = vmax.f32 %v6383_v39, %v6384_v40  ;;  %v6388_v35 = vmax.f32 %v6386_v42, %v6387_v43  ;;  %v6401_v39 = vld [vmem:[#allocation77_spill] sm:$0xff]  ;;  %v6402_v40 = vld [vmem:[#allocation78_spill] sm:$0xff]  ;;  %v6404_v42 = vld [vmem:[#allocation79_spill] sm:$0xff] }
 0x207   :  { %v2498_v45 = vmax.f32 %v2426_v56, 0.0  ;;  %v1639_v46 = vmax.f32 %v6370_v13, %v1533_v17  ;;  %v1535_v34 = vpop.f32.mrb[122].mxu0  ;;  %v2036_v38 = vpop.f32.mrb[122].mxu1  ;;  %v6405_v43 = vld [vmem:[#allocation80_spill] sm:$0xff] }
 0x208   :  { %v2545_v23 = vpack.c.bf16 %v2497_v28, %v2495_v1  ;;  %v2139_v52 = vmax.f32 %v1638_v22, %v2032_v61  ;;  %v1640_v54 = vmax.f32 %v6373_v41, %v1535_v34  ;;  %v1537_v55 = vpop.f32.mrb[123].mxu0  ;;  %v2038_v6 = vpop.f32.mrb[123].mxu1  ;;  %v6391_v41 = vmax.f32 %v6389_v53, %v6390_v24  ;;  %v6410_v53 = vld [vmem:[#allocation83_spill] sm:$0xff]  ;;  %v6411_v24 = vld [vmem:[#allocation84_spill] sm:$0xff] }
 0x209   :  { %v2140_v27 = vmax.f32 %v1639_v46, %v2034_v16  ;;  %v1641_v19 = vmax.f32 %v6376_v44, %v1537_v55  ;;  %v2546_v31 = vpack.c.bf16 %v2498_v45, %v2496_v51  ;;  %v2327_v32 = vpop.permute.xlu1 %2326  ;;  %v2332_v1 = vpop.permute.xlu0 %2331  ;;  %v6394_v44 = vmax.f32 %v6392_v7, %v6393_v2 }
 0x20a   :  { %v2427_v60 = vadd.f32 %v2322_v26, %v2139_v52  ;;  %v2141_v0 = vmax.f32 %v1640_v54, %v2036_v38 }
 0x20b   :  { %v2428_v57 = vadd.f32 %v2322_v26, %v2140_v27  ;;  %v2142_v58 = vmax.f32 %v1641_v19, %v2038_v6  ;;  %2670 = vmatprep.subr.bf16.mxu0 %v2546_v31 }
 0x20c   :  { %v2429_v9 = vadd.f32 %v2327_v32, %v2141_v0  ;;  %2671 = vmatpush1.bf16.msra.mxu0 %v2545_v23  ;;  %v2499_v36 = vmax.f32 %v2427_v60, 0.0 }
 0x20d   :  { %v2430_v11 = vadd.f32 %v2327_v32, %v2142_v58  ;;  %v1541_v12 = vpop.f32.mrb[124].mxu0  ;;  %v2042_v10 = vpop.f32.mrb[124].mxu1  ;;  %v2500_v14 = vmax.f32 %v2428_v57, 0.0  ;;  %v6395_v57 = vld [vmem:[#allocation73_spill] sm:$0xff]  ;;  %v6396_v58 = vld [vmem:[#allocation74_spill] sm:$0xff] }
 0x20e   :  { %v2501_v37 = vmax.f32 %v2429_v9, 0.0  ;;  %v1642_v62 = vmax.f32 %v6379_v33, %v1541_v12  ;;  %v1543_v63 = vpop.f32.mrb[125].mxu0  ;;  %v2044_v30 = vpop.f32.mrb[125].mxu1  ;;  %v6397_v9 = vmax.f32 %v6395_v57, %v6396_v58  ;;  %v6400_v33 = vmax.f32 %v6398_v18, %v6399_v29  ;;  %v6413_v57 = vld [vmem:[#allocation85_spill] sm:$0xff]  ;;  %v6414_v58 = vld [vmem:[#allocation86_spill] sm:$0xff]  ;;  %v6416_v18 = vld [vmem:[#allocation87_spill] sm:$0xff] }
 0x20f   :  { %v2502_v49 = vmax.f32 %v2430_v11, 0.0  ;;  %v1643_v5 = vmax.f32 %v6382_v59, %v1543_v63  ;;  %v1545_v3 = vpop.f32.mrb[126].mxu0  ;;  %v2046_v20 = vpop.f32.mrb[126].mxu1  ;;  %v6417_v29 = vld [vmem:[#allocation88_spill] sm:$0xff] }
 0x210   :  { %v2547_v21 = vpack.c.bf16 %v2501_v37, %v2499_v36  ;;  %v2143_v4 = vmax.f32 %v1642_v62, %v2042_v10  ;;  %v1644_v56 = vmax.f32 %v6385_v8, %v1545_v3  ;;  %v1547_v25 = vpop.f32.mrb[127].mxu0  ;;  %v2048_v61 = vpop.f32.mrb[127].mxu1  ;;  %v6403_v8 = vmax.f32 %v6401_v39, %v6402_v40  ;;  %v6423_v39 = vld [vmem:[#allocation92_spill] sm:$0xff] }
 0x211   :  { %v2144_v28 = vmax.f32 %v1643_v5, %v2044_v30  ;;  %v1645_v22 = vmax.f32 %v6388_v35, %v1547_v25  ;;  %v2548_v17 = vpack.c.bf16 %v2502_v49, %v2500_v14  ;;  %v2337_v45 = vpop.permute.xlu1 %2336  ;;  %v2342_v36 = vpop.permute.xlu0 %2341  ;;  %v6406_v35 = vmax.f32 %v6404_v42, %v6405_v43 }
 0x212   :  { %v2431_v16 = vadd.f32 %v2332_v1, %v2143_v4  ;;  %v2145_v51 = vmax.f32 %v1644_v56, %v2046_v20 }
 0x213   :  { %v2432_v47 = vadd.f32 %v2332_v1, %v2144_v28  ;;  %v2146_v48 = vmax.f32 %v1645_v22, %v2048_v61  ;;  %2672 = vmatprep.subr.bf16.mxu0 %v2548_v17 }
 0x214   :  { %v2433_v13 = vadd.f32 %v2337_v45, %v2145_v51  ;;  %2673 = vmatpush1.bf16.msra.mxu0 %v2547_v21  ;;  %v2503_v23 = vmax.f32 %v2431_v16, 0.0 }
 0x215   :  { %v2434_v46 = vadd.f32 %v2337_v45, %v2146_v48  ;;  %v1551_v34 = vpop.f32.mrb[128].mxu0  ;;  %v2052_v38 = vpop.f32.mrb[128].mxu1  ;;  %v2504_v26 = vmax.f32 %v2432_v47, 0.0  ;;  %v6407_v47 = vld [vmem:[#allocation81_spill] sm:$0xff]  ;;  %v6408_v48 = vld [vmem:[#allocation82_spill] sm:$0xff] }
 0x216   :  { %v2505_v52 = vmax.f32 %v2433_v13, 0.0  ;;  %v1646_v54 = vmax.f32 %v6391_v41, %v1551_v34  ;;  %v1553_v55 = vpop.f32.mrb[129].mxu0  ;;  %v2054_v6 = vpop.f32.mrb[129].mxu1  ;;  %v6409_v13 = vmax.f32 %v6407_v47, %v6408_v48  ;;  %v6412_v41 = vmax.f32 %v6410_v53, %v6411_v24 }
 0x217   :  { %v2506_v27 = vmax.f32 %v2434_v46, 0.0  ;;  %v1647_v19 = vmax.f32 %v6394_v44, %v1553_v55  ;;  %v1555_v31 = vpop.f32.mrb[130].mxu0  ;;  %v2056_v60 = vpop.f32.mrb[130].mxu1 }
 0x218   :  { %v2549_v0 = vpack.c.bf16 %v2505_v52, %v2503_v23  ;;  %v2147_v32 = vmax.f32 %v1646_v54, %v2052_v38  ;;  %v1648_v11 = vmax.f32 %v6397_v9, %v1555_v31  ;;  %v1557_v12 = vpop.f32.mrb[131].mxu0  ;;  %v2058_v10 = vpop.f32.mrb[131].mxu1  ;;  %v6415_v9 = vmax.f32 %v6413_v57, %v6414_v58  ;;  %v6434_v58 = vld [vmem:[#allocation99_spill] sm:$0xff] }
 0x219   :  { %v2148_v37 = vmax.f32 %v1647_v19, %v2054_v6  ;;  %v1649_v62 = vmax.f32 %v6400_v33, %v1557_v12  ;;  %v2550_v63 = vpack.c.bf16 %v2506_v27, %v2504_v26  ;;  %v2347_v49 = vpop.permute.xlu1 %2346  ;;  %v2352_v23 = vpop.permute.xlu0 %2351  ;;  %v6418_v33 = vmax.f32 %v6416_v18, %v6417_v29 }
 0x21a   :  { %v2435_v30 = vadd.f32 %v2342_v36, %v2147_v32  ;;  %v2149_v14 = vmax.f32 %v1648_v11, %v2056_v60 }
 0x21b   :  { %v2436_v50 = vadd.f32 %v2342_v36, %v2148_v37  ;;  %v2150_v15 = vmax.f32 %v1649_v62, %v2058_v10  ;;  %2674 = vmatprep.subr.bf16.mxu0 %v2550_v63 }
 0x21c   :  { %v2437_v59 = vadd.f32 %v2347_v49, %v2149_v14  ;;  %2675 = vmatpush1.bf16.msra.mxu0 %v2549_v0  ;;  %v2507_v21 = vmax.f32 %v2435_v30, 0.0 }
 0x21d   :  { %v2438_v5 = vadd.f32 %v2347_v49, %v2150_v15  ;;  %v1561_v3 = vpop.f32.mrb[132].mxu0  ;;  %v2062_v20 = vpop.f32.mrb[132].mxu1  ;;  %v2508_v1 = vmax.f32 %v2436_v50, 0.0  ;;  %v6419_v49 = vld [vmem:[#allocation89_spill] sm:$0xff]  ;;  %v6420_v50 = vld [vmem:[#allocation90_spill] sm:$0xff] }
 0x21e   :  { %v2509_v4 = vmax.f32 %v2437_v59, 0.0  ;;  %v1650_v56 = vmax.f32 %v6403_v8, %v1561_v3  ;;  %v1563_v25 = vpop.f32.mrb[133].mxu0  ;;  %v2064_v61 = vpop.f32.mrb[133].mxu1  ;;  %v6421_v15 = vmax.f32 %v6419_v49, %v6420_v50 }
 0x21f   :  { %v2510_v28 = vmax.f32 %v2438_v5, 0.0  ;;  %v1651_v22 = vmax.f32 %v6406_v35, %v1563_v25  ;;  %v1565_v17 = vpop.f32.mrb[134].mxu0  ;;  %v2066_v16 = vpop.f32.mrb[134].mxu1  ;;  %v4245_v35 = vld [vmem:[%s6058_s3] ss:$12 sps:$4 sm:$0xff]  }
 0x220   :  { %v2551_v51 = vpack.c.bf16 %v2509_v4, %v2507_v21  ;;  %v2151_v45 = vmax.f32 %v1650_v56, %v2062_v20  ;;  %v1652_v46 = vmax.f32 %v6409_v13, %v1565_v17  ;;  %v1567_v34 = vpop.f32.mrb[135].mxu0  ;;  %v2068_v38 = vpop.f32.mrb[135].mxu1  ;;  %v6422_v4 = vld [vmem:[#allocation91_spill] sm:$0xff]  ;;  %v6425_v13 = vld [vmem:[#allocation93_spill] sm:$0xff] }
 0x221   :  { %v2152_v52 = vmax.f32 %v1651_v22, %v2064_v61  ;;  %v1653_v54 = vmax.f32 %v6412_v41, %v1567_v34  ;;  %v2552_v55 = vpack.c.bf16 %v2510_v28, %v2508_v1  ;;  %v2357_v27 = vpop.permute.xlu1 %2356  ;;  %v2362_v21 = vpop.permute.xlu0 %2361  ;;  %v6424_v40 = vmax.f32 %v6422_v4, %v6423_v39  ;;  %v4248_v17 = vld [vmem:[%s6058_s3 + $0x1c] ss:$12 sps:$4 sm:$0xff]   ;;  %v4254_v4 = vld [vmem:[%s6058_s3 + $0x4c] ss:$12 sps:$4 sm:$0xff]  }
 0x222   :  { %v2439_v6 = vadd.f32 %v2352_v23, %v2151_v45  ;;  %v2153_v26 = vmax.f32 %v1652_v46, %v2066_v16  ;;  %v6426_v46 = vld [vmem:[#allocation94_spill] sm:$0xff]  ;;  %v6428_v41 = vld [vmem:[#allocation95_spill] sm:$0xff] }
 0x223   :  { %v2440_v7 = vadd.f32 %v2352_v23, %v2152_v52  ;;  %v2154_v2 = vmax.f32 %v1653_v54, %v2068_v38  ;;  %2676 = vmatprep.subr.bf16.mxu0 %v2552_v55  ;;  %v6427_v34 = vmax.f32 %v6425_v13, %v6426_v46  ;;  %v6429_v54 = vld [vmem:[#allocation96_spill] sm:$0xff] }
 0x224   :  { %v2441_v44 = vadd.f32 %v2357_v27, %v2153_v26  ;;  %2677 = vmatpush1.bf16.msra.mxu0 %v2551_v51  ;;  %v2511_v0 = vmax.f32 %v2439_v6, 0.0  ;;  %v6430_v55 = vmax.f32 %v6428_v41, %v6429_v54  ;;  %v4256_v39 = vld [vmem:[%s6058_s3 + $0x48] ss:$12 sps:$4 sm:$0xff]  }
 0x225   :  { %v2442_v19 = vadd.f32 %v2357_v27, %v2154_v2  ;;  %v1571_v31 = vpop.f32.mrb[136].mxu0  ;;  %v2072_v60 = vpop.f32.mrb[136].mxu1  ;;  %v2512_v36 = vmax.f32 %v2440_v7, 0.0  ;;  %v6431_v2 = vld [vmem:[#allocation97_spill] sm:$0xff] }
 0x226   :  { %v2513_v32 = vmax.f32 %v2441_v44, 0.0  ;;  %v1654_v11 = vmax.f32 %v6415_v9, %v1571_v31  ;;  %v1573_v12 = vpop.f32.mrb[137].mxu0  ;;  %v2074_v10 = vpop.f32.mrb[137].mxu1  ;;  %v6432_v44 = vld [vmem:[#allocation98_spill] sm:$0xff]  ;;  %v6435_v9 = vld [vmem:[#allocation100_spill] sm:$0xff] }
 0x227   :  { %v2514_v37 = vmax.f32 %v2442_v19, 0.0  ;;  %v1655_v62 = vmax.f32 %v6418_v33, %v1573_v12  ;;  %v1575_v63 = vpop.f32.mrb[138].mxu0  ;;  %v2076_v30 = vpop.f32.mrb[138].mxu1  ;;  %v6433_v19 = vmax.f32 %v6431_v2, %v6432_v44 }
 0x228   :  { %v2553_v14 = vpack.c.bf16 %v2513_v32, %v2511_v0  ;;  %v1656_v59 = vmax.f32 %v6421_v15, %v1575_v63  ;;  %v2155_v5 = vmax.f32 %v1654_v11, %v2072_v60  ;;  %v1577_v3 = vpop.f32.mrb[139].mxu0  ;;  %v2078_v20 = vpop.f32.mrb[139].mxu1  ;;  %v6436_v11 = vmax.f32 %v6434_v58, %v6435_v9  ;;  %v4250_v63 = vld [vmem:[%s6058_s3 + $0x18] ss:$12 sps:$4 sm:$0xff]  }
 0x229   :  { %v1657_v8 = vmax.f32 %v6424_v40, %v1577_v3  ;;  %v2156_v56 = vmax.f32 %v1655_v62, %v2074_v10  ;;  %v2554_v25 = vpack.c.bf16 %v2514_v37, %v2512_v36  ;;  %v2367_v28 = vpop.permute.xlu1 %2366  ;;  %v2372_v57 = vpop.permute.xlu0 %2371  ;;  %v6437_v40 = vmov 0  }
 0x22a   :  { %v2443_v61 = vadd.f32 %v2362_v21, %v2155_v5  ;;  %v2157_v1 = vmax.f32 %v1656_v59, %v2076_v30 }
 0x22b   :  { %v2444_v42 = vadd.f32 %v2362_v21, %v2156_v56  ;;  %v2158_v43 = vmax.f32 %v1657_v8, %v2078_v20  ;;  %2678 = vmatprep.subr.bf16.mxu0 %v2554_v25  ;;  %v4253_v21 = vld [vmem:[%s6058_s3 + $0x30] ss:$12 sps:$4 sm:$0xff]   ;;  %v4257_v8 = vld [vmem:[%s6058_s3 + $0x8] ss:$12 sps:$4 sm:$0xff]   ;;  %v4258_v56 = vld [vmem:[%s6058_s3 + $0x20] ss:$12 sps:$4 sm:$0xff]  }
 0x22c   :  { %v2445_v22 = vadd.f32 %v2367_v28, %v2157_v1  ;;  %2679 = vmatpush1.bf16.msra.mxu0 %v2553_v14  ;;  %v2515_v47 = vmax.f32 %v2443_v61, 0.0  ;;  %v4251_v14 = vld [vmem:[%s6058_s3 + $0x34] ss:$12 sps:$4 sm:$0xff]   ;;  %v4259_v25 = vld [vmem:[%s6058_s3 + $0x38] ss:$12 sps:$4 sm:$0xff]  }
 0x22d   :  { %v2446_v16 = vadd.f32 %v2367_v28, %v2158_v43  ;;  %v1581_v51 = vpop.f32.mrb[140].mxu0  ;;  %v2082_v45 = vpop.f32.mrb[140].mxu1  ;;  %v2516_v53 = vmax.f32 %v2444_v42, 0.0  ;;  %v4260_v61 = vld [vmem:[%s6058_s3 + $0x50] ss:$12 sps:$4 sm:$0xff]   ;;  %s4292_s3 = smov 112  }
 0x22e   :  { %v2517_v48 = vmax.f32 %v2445_v22, 0.0  ;;  %v1658_v38 = vmax.f32 %v6427_v34, %v1581_v51  ;;  %v1583_v23 = vpop.f32.mrb[141].mxu0  ;;  %v2084_v52 = vpop.f32.mrb[141].mxu1 }
 0x22f   :  { %v2518_v24 = vmax.f32 %v2446_v16, 0.0  ;;  %v1659_v6 = vmax.f32 %v6430_v55, %v1583_v23  ;;  %v1585_v26 = vpop.f32.mrb[142].mxu0  ;;  %2681 = vmatmul.mubr.bf16.vlgmr.msra.gmra.mrb[144].mxu0 %v4245_v35  ;;  %v2086_v27 = vpop.f32.mrb[142].mxu1 }
 0x230   :  { %v2555_v7 = vpack.c.bf16 %v2517_v48, %v2515_v47  ;;  %v1660_v31 = vmax.f32 %v6433_v19, %v1585_v26  ;;  %v2159_v60 = vmax.f32 %v1658_v38, %v2082_v45  ;;  %v1587_v0 = vpop.f32.mrb[143].mxu0  ;;  %v2088_v32 = vpop.f32.mrb[143].mxu1  ;;  %2690 = vmatprep.mubr.bf16.mxu0 %v4248_v17 }
 0x231   :  { %v1661_v12 = vmax.f32 %v6436_v11, %v1587_v0  ;;  %v2160_v10 = vmax.f32 %v1659_v6, %v2084_v52  ;;  %v2556_v36 = vpack.c.bf16 %v2518_v24, %v2516_v53  ;;  %v2377_v29 = vpop.permute.xlu1 %2376  ;;  %v2811_v26 = vpop.permute.xlu0 %2810 }
 0x232   :  { %v2447_v37 = vadd.f32 %v2372_v57, %v2159_v60  ;;  %v2161_v18 = vmax.f32 %v1660_v31, %v2086_v27 }
 0x233   :  { %v2448_v33 = vadd.f32 %v2372_v57, %v2160_v10  ;;  %v2162_v62 = vmax.f32 %v1661_v12, %v2088_v32  ;;  %2721 = vmatprep.subr.bf16.mxu0 %v2556_v36 }
 0x234   :  { %v2449_v30 = vadd.f32 %v2377_v29, %v2161_v18  ;;  %2722 = vmatpush1.bf16.msra.mxu0 %v2555_v7  ;;  %v2519_v50 = vmax.f32 %v2447_v37, 0.0  ;;  %v4263_v18 = vld [vmem:[%s6059_s5 + $0x4] ss:$8 sps:$4 sm:$0xff]  }
 0x235   :  { %v2450_v49 = vadd.f32 %v2377_v29, %v2162_v62  ;;  %v2520_v59 = vmax.f32 %v2448_v33, 0.0  ;;  %v2816_v19 = vpop.permute.xlu1 %2815  ;;  %3144 = vmatprep.mubr.bf16.mxu1 %v4263_v18  ;;  %v2946_v29 = vld [vmem:[%s6060_s6 + $0x8] sm:$0xff]  ;;  %v2945_v33 = vld [vmem:[%s6060_s6] sm:$0xff]  ;;  %v2948_v62 = vld [vmem:[%s6060_s6 + $0x18] sm:$0xff] }
 0x236   :  { %v2521_v15 = vmax.f32 %v2449_v30, 0.0  ;;  %v2950_v30 = vld [vmem:[%s6060_s6 + $0x28] sm:$0xff] }
 0x237   :  { %v2522_v5 = vmax.f32 %v2450_v49, 0.0  ;;  %2691 = vmatmul.mubr.bf16.gmra.mrb[148].mxu0 %v4250_v63  ;;  %v2947_v63 = vld [vmem:[%s6060_s6 + $0x10] sm:$0xff]  ;;  %v2952_v49 = vld [vmem:[%s6060_s6 + $0x38] sm:$0xff] }
 0x238   :  { %v2557_v3 = vpack.c.bf16 %v2521_v15, %v2519_v50  ;;  %2700 = vmatprep.mubr.bf16.mxu0 %v4251_v14  ;;  %v2949_v14 = vld [vmem:[%s6060_s6 + $0x20] sm:$0xff]  ;;  %v2951_v50 = vld [vmem:[%s6060_s6 + $0x30] sm:$0xff]  ;;  %v2954_v15 = vld [vmem:[%s6060_s6 + $0x48] sm:$0xff] }
 0x239   :  { %v2558_v20 = vpack.c.bf16 %v2522_v5, %v2520_v59  ;;  %v2953_v59 = vld [vmem:[%s6060_s6 + $0x40] sm:$0xff]  ;;  %v2956_v5 = vld [vmem:[%s6060_s6 + $0x58] sm:$0xff] }
 0x23b   :  { %2723 = vmatprep.subr.bf16.mxu0 %v2558_v20  ;;  %v2958_v20 = vld [vmem:[%s6060_s6 + $0x68] sm:$0xff] }
 0x23c   :  { %2724 = vmatpush1.bf16.msra.mxu0 %v2557_v3  ;;  %v2955_v3 = vld [vmem:[%s6060_s6 + $0x50] sm:$0xff] }
 0x23f   :  { %2701 = vmatmul.mubr.bf16.gmra.mrb[152].mxu0 %v4253_v21  ;;  %v2957_v21 = vld [vmem:[%s6060_s6 + $0x60] sm:$0xff] }
 0x240   :  { %2710 = vmatprep.mubr.bf16.mxu0 %v4254_v4  ;;  %v3242_v4 = vld [vmem:[%s6061_s8] sm:$0xff] }
 0x247   :  { %2711 = vmatmul.mubr.bf16.gmra.mrb[156].mxu0 %v4256_v39  ;;  %v2959_v39 = vld [vmem:[%s6060_s6 + $0x70] sm:$0xff] }
 0x248   :  { %2753 = vmatprep.mubr.bf16.mxu0 %v6437_v40 }
 0x24f   :  { %3719 = vmatmul.mubr.msk.bf16.vlgmr.msra.gmra.mrb[144].mxu0 %vm2635_vm0, %v4257_v8  ;;  %v3243_v8 = vld [vmem:[%s6061_s8 + $0x8] sm:$0xff] }
 0x250   :  { %2763 = vmatprep.mubr.bf16.mxu0 %v6437_v40 }
 0x257   :  { %3720 = vmatmul.mubr.msk.bf16.gmra.mrb[148].mxu0 %vm2635_vm0, %v4258_v56  ;;  %v3246_v56 = vld [vmem:[%s6061_s8 + $0x20] sm:$0xff] }
 0x258   :  { %2773 = vmatprep.mubr.bf16.mxu0 %v6437_v40 }
 0x25f   :  { %3721 = vmatmul.mubr.msk.bf16.gmra.mrb[152].mxu0 %vm2635_vm0, %v4259_v25  ;;  %v3245_v25 = vld [vmem:[%s6061_s8 + $0x18] sm:$0xff] }
 0x260   :  { %2783 = vmatprep.mubr.bf16.mxu0 %v6437_v40  ;;  %v3244_v40 = vld [vmem:[%s6061_s8 + $0x10] sm:$0xff] }
 0x267   :  { %3722 = vmatmul.mubr.msk.bf16.gmra.mrb[156].mxu0 %vm2635_vm0, %v4260_v61  ;;  %v3248_v61 = vld [vmem:[%s6061_s8 + $0x30] sm:$0xff] }
 0x322   :  { %v2755_v1 = vpop.f32.mrb[144].mxu0 }
 0x323   :  { %v2757_v28 = vpop.f32.mrb[145].mxu0 }
 0x324   :  { %v2759_v42 = vpop.f32.mrb[146].mxu0 }
 0x325   :  { %v2761_v43 = vpop.f32.mrb[147].mxu0 }
 0x32a   :  { %v2765_v35 = vpop.f32.mrb[148].mxu0 }
 0x32b   :  { %v2794_v22 = vmax.f32 %v2755_v1, %v2765_v35  ;;  %v2767_v17 = vpop.f32.mrb[149].mxu0  ;;  %v3247_v1 = vld [vmem:[%s6061_s8 + $0x28] sm:$0xff] }
 0x32c   :  { %v2795_v16 = vmax.f32 %v2757_v28, %v2767_v17  ;;  %v2769_v51 = vpop.f32.mrb[150].mxu0  ;;  %v3250_v28 = vld [vmem:[%s6061_s8 + $0x40] sm:$0xff]  ;;  %v3251_v35 = vld [vmem:[%s6061_s8 + $0x48] sm:$0xff] }
 0x32d   :  { %v2796_v45 = vmax.f32 %v2759_v42, %v2769_v51  ;;  %v2771_v47 = vpop.f32.mrb[151].mxu0  ;;  %v3249_v42 = vld [vmem:[%s6061_s8 + $0x38] sm:$0xff]  ;;  %v3458_v17 = vld [vmem:[%s6062_s10] sm:$0xff] }
 0x32e   :  { %v2797_v48 = vmax.f32 %v2761_v43, %v2771_v47  ;;  %v3252_v43 = vld [vmem:[%s6061_s8 + $0x50] sm:$0xf] }
 0x332   :  { %v2775_v13 = vpop.f32.mrb[152].mxu0 }
 0x333   :  { %v2777_v46 = vpop.f32.mrb[153].mxu0 }
 0x334   :  { %v2779_v34 = vpop.f32.mrb[154].mxu0 }
 0x335   :  { %v2781_v38 = vpop.f32.mrb[155].mxu0 }
 0x33a   :  { %v2785_v23 = vpop.f32.mrb[156].mxu0 }
 0x33b   :  { %v2798_v52 = vmax.f32 %v2775_v13, %v2785_v23  ;;  %v2787_v53 = vpop.f32.mrb[157].mxu0 }
 0x33c   :  { %v2799_v24 = vmax.f32 %v2777_v46, %v2787_v53  ;;  %v2789_v41 = vpop.f32.mrb[158].mxu0 }
 0x33d   :  { %v2802_v54 = vmax.f32 %v2794_v22, %v2798_v52  ;;  %v2800_v55 = vmax.f32 %v2779_v34, %v2789_v41  ;;  %v2791_v6 = vpop.f32.mrb[159].mxu0  ;;  %v3459_v22 = vld [vmem:[%s6062_s10 + $0x8] sm:$0xff] }
 0x33e   :  { %v2803_v27 = vmax.f32 %v2795_v16, %v2799_v24  ;;  %v2801_v7 = vmax.f32 %v2781_v38, %v2791_v6 }
 0x33f   :  { %v2818_v2 = vadd.f32 %v2811_v26, %v2802_v54  ;;  %v2804_v44 = vmax.f32 %v2796_v45, %v2800_v55 }
 0x340   :  { %v2819_v31 = vadd.f32 %v2811_v26, %v2803_v27  ;;  %v2805_v60 = vmax.f32 %v2797_v48, %v2801_v7 }
 0x341   :  { %v2820_v0 = vadd.f32 %v2816_v19, %v2804_v44  ;;  %v2822_v57 = vmax.f32 %v2818_v2, 0.0 }
 0x342   :  { %v2821_v32 = vadd.f32 %v2816_v19, %v2805_v60  ;;  %v2823_v9 = vmax.f32 %v2819_v31, 0.0 }
 0x343   :  { %v2824_v58 = vmax.f32 %v2820_v0, 0.0 }
 0x344   :  { %v2825_v11 = vmax.f32 %v2821_v32, 0.0 }
 0x345   :  { %v3911_v12 = vpack.i.bf16 %v2824_v58, %v2822_v57  ;;  %v2914_v10 = vpack.c.bf16 %v2824_v58, %v2822_v57 }
 0x346   :  { %v3941_v36 = vpack.i.bf16 %v2825_v11, %v2823_v9  ;;  %v2922_v37 = vpack.c.bf16 %v2825_v11, %v2823_v9 }
 0x347   :  { %3912 = vrot.lane.b32.xlu1 %v3911_v12, %s4292_s3 }
 0x348   :  { %3942 = vrot.lane.b32.xlu0 %v3941_v36, %s4292_s3  ;;  %3753 = vmatprep.subr.bf16.mxu1 %v2922_v37 }
 0x349   :  { %3754 = vmatpush3.bf16.msra.mxu1 %v2914_v10 }
 0x34b   :  { %3917 = vrot.lane.b32.xlu1 %v3911_v12, %s4293_s17 }
 0x34c   :  { %3947 = vrot.lane.b32.xlu0 %v3941_v36, %s4293_s17 }
 0x34f   :  { %3922 = vrot.lane.b32.xlu1 %v3911_v12, %s4294_s18 }
 0x350   :  { %3952 = vrot.lane.b32.xlu0 %v3941_v36, %s4294_s18 }
 0x353   :  { %3927 = vrot.lane.b32.xlu1 %v3911_v12, %s4295_s19 }
 0x354   :  { %3957 = vrot.lane.b32.xlu0 %v3941_v36, %s4295_s19 }
 0x357   :  { %3932 = vrot.lane.b32.xlu1 %v3911_v12, %s4296_s20 }
 0x358   :  { %3962 = vrot.lane.b32.xlu0 %v3941_v36, %s4296_s20 }
 0x35b   :  { %3937 = vrot.lane.b32.xlu1 %v3911_v12, %s4297_s23 }
 0x35c   :  { %3967 = vrot.lane.b32.xlu0 %v3941_v36, %s4297_s23 }
 0x35f   :  { %3977 = vrot.lane.b32.xlu1 %v3911_v12, %s4298_s24 }
 0x360   :  { %3972 = vrot.lane.b32.xlu0 %v3941_v36, %s4298_s24 }
 0x363   :  { %2967 = vperm.xlu1 %3910, %v2946_v29  }
 0x364   :  { %2962 = vperm.xlu0 %3909, %v2945_v33  }
 0x367   :  { %2977 = vperm.xlu1 %3910, %v2948_v62  }
 0x368   :  { %2972 = vperm.xlu0 %3909, %v2947_v63  }
 0x36b   :  { %2987 = vperm.xlu1 %3910, %v2950_v30  }
 0x36c   :  { %2982 = vperm.xlu0 %3909, %v2949_v14  }
 0x36f   :  { %2997 = vperm.xlu1 %3910, %v2952_v49  }
 0x370   :  { %2992 = vperm.xlu0 %3909, %v2951_v50  }
 0x373   :  { %3007 = vperm.xlu1 %3910, %v2954_v15  }
 0x374   :  { %3002 = vperm.xlu0 %3909, %v2953_v59  }
 0x377   :  { %3017 = vperm.xlu1 %3910, %v2956_v5  }
 0x378   :  { %3012 = vperm.xlu0 %3909, %v2955_v3  }
 0x37b   :  { %3027 = vperm.xlu1 %3910, %v2958_v20  }
 0x37c   :  { %3022 = vperm.xlu0 %3909, %v2957_v21  }
 0x37f   :  { %3255 = vperm.xlu1 %3910, %v3242_v4  }
 0x380   :  { %3032 = vperm.xlu0 %3909, %v2959_v39  }
 0x383   :  { %3265 = vperm.xlu1 %3910, %v3244_v40  }
 0x384   :  { %3260 = vperm.xlu0 %3909, %v3243_v8  }
 0x387   :  { %3275 = vperm.xlu1 %3910, %v3246_v56  }
 0x388   :  { %3270 = vperm.xlu0 %3909, %v3245_v25  }
 0x38b   :  { %3285 = vperm.xlu1 %3910, %v3248_v61   ;;  %v4261_v61 = vld [vmem:[%s6059_s5] ss:$8 sps:$4 sm:$0xff]  }
 0x38c   :  { %3280 = vperm.xlu0 %3909, %v3247_v1   ;;  %v4264_v1 = vld [vmem:[%s6059_s5 + $0x14] ss:$8 sps:$4 sm:$0xff]  }
 0x38f   :  { %3295 = vperm.xlu1 %3910, %v3250_v28   ;;  %v4266_v28 = vld [vmem:[%s6059_s5 + $0x10] ss:$8 sps:$4 sm:$0xff]  }
 0x390   :  { %3290 = vperm.xlu0 %3909, %v3249_v42   ;;  %v4267_v42 = vld [vmem:[%s6059_s5 + $0x24] ss:$8 sps:$4 sm:$0xff]  }
 0x393   :  { %3305 = vperm.xlu1 %3910, %v3252_v43   ;;  %v4269_v43 = vld [vmem:[%s6059_s5 + $0x20] ss:$8 sps:$4 sm:$0xff]  }
 0x394   :  { %3300 = vperm.xlu0 %3909, %v3251_v35   ;;  %v4270_v35 = vld [vmem:[%s6059_s5 + $0x34] ss:$8 sps:$4 sm:$0xff]  }
 0x397   :  { %3467 = vperm.xlu1 %3910, %v3459_v22   ;;  %v4272_v22 = vld [vmem:[%s6059_s5 + $0x30] ss:$8 sps:$4 sm:$0xff]  }
 0x398   :  { %3462 = vperm.xlu0 %3909, %v3458_v17   ;;  %v4273_v17 = vld [vmem:[%s6059_s5 + $0x44] ss:$8 sps:$4 sm:$0xff]  }
 0x3b9   :  { %v3913_v16 = vpop.permute.xlu1 %3912 }
 0x3ba   :  { %v3915_v51 = vunpack.i.h.bf16 %v3913_v16  ;;  %v3914_v45 = vunpack.i.l.bf16 %v3913_v16  ;;  %v3943_v47 = vpop.permute.xlu0 %3942  ;;  %v4275_v16 = vld [vmem:[%s6059_s5 + $0x40] ss:$8 sps:$4 sm:$0xff]  }
 0x3bb   :  { %v3945_v48 = vunpack.i.h.bf16 %v3943_v47  ;;  %v3944_v13 = vunpack.i.l.bf16 %v3943_v47  ;;  %v4279_v47 = vld [vmem:[%s6059_s5 + $0x64] ss:$8 sps:$4 sm:$0xff]  }
 0x3bc   :  { %v2915_v38 = vpack.c.bf16 %v3915_v51, %v3914_v45  ;;  %v4276_v51 = vld [vmem:[%s6059_s5 + $0x54] ss:$8 sps:$4 sm:$0xff]   ;;  %v4278_v45 = vld [vmem:[%s6059_s5 + $0x50] ss:$8 sps:$4 sm:$0xff]  }
 0x3bd   :  { %v2923_v46 = vpack.c.bf16 %v3945_v48, %v3944_v13  ;;  %v3918_v34 = vpop.permute.xlu1 %3917  ;;  %v2944_v48 = vld [vmem:[%s6059_s5 + $0x70] sm:$0xff]  ;;  %v4281_v13 = vld [vmem:[%s6059_s5 + $0x60] ss:$8 sps:$4 sm:$0xff]  }
 0x3be   :  { %v3920_v23 = vunpack.i.h.bf16 %v3918_v34  ;;  %v3919_v52 = vunpack.i.l.bf16 %v3918_v34  ;;  %v3948_v53 = vpop.permute.xlu0 %3947  ;;  %v3737_v34 = vcombine.low %v2944_v48, %v2944_v48 }
 0x3bf   :  { %v3950_v24 = vunpack.i.h.bf16 %v3948_v53  ;;  %v3949_v41 = vunpack.i.l.bf16 %v3948_v53  ;;  %3755 = vmatprep.subr.bf16.mxu1 %v2923_v46  ;;  %v3738_v46 = vcombine.high %v2944_v48, %v2944_v48 }
 0x3c0   :  { %3756 = vmatpush3.bf16.msra.mxu1 %v2915_v38  ;;  %v2916_v6 = vpack.c.bf16 %v3920_v23, %v3919_v52  ;;  %v4284_v38 = vld [vmem:[%s6063_s7] sm:$0xff]  }
 0x3c1   :  { %v2924_v54 = vpack.c.bf16 %v3950_v24, %v3949_v41  ;;  %v3923_v55 = vpop.permute.xlu1 %3922  ;;  %3854 = vmatprep.mubr.msk.bf16.mxu0 %vm3336_vm1, %v4284_v38 }
 0x3c2   :  { %v3925_v26 = vunpack.i.h.bf16 %v3923_v55  ;;  %v3924_v27 = vunpack.i.l.bf16 %v3923_v55  ;;  %v3953_v7 = vpop.permute.xlu0 %3952 }
 0x3c3   :  { %v3955_v2 = vunpack.i.h.bf16 %v3953_v7  ;;  %v3954_v44 = vunpack.i.l.bf16 %v3953_v7  ;;  %3757 = vmatprep.subr.bf16.mxu1 %v2924_v54 }
 0x3c4   :  { %3758 = vmatpush3.bf16.msra.mxu1 %v2916_v6  ;;  %v2917_v60 = vpack.c.bf16 %v3925_v26, %v3924_v27 }
 0x3c5   :  { %v2925_v19 = vpack.c.bf16 %v3955_v2, %v3954_v44  ;;  %v3928_v31 = vpop.permute.xlu1 %3927 }
 0x3c6   :  { %v3930_v0 = vunpack.i.h.bf16 %v3928_v31  ;;  %v3929_v32 = vunpack.i.l.bf16 %v3928_v31  ;;  %v3958_v57 = vpop.permute.xlu0 %3957 }
 0x3c7   :  { %v3960_v58 = vunpack.i.h.bf16 %v3958_v57  ;;  %v3959_v9 = vunpack.i.l.bf16 %v3958_v57  ;;  %3759 = vmatprep.subr.bf16.mxu1 %v2925_v19 }
 0x3c8   :  { %3760 = vmatpush3.bf16.msra.mxu1 %v2917_v60  ;;  %v2918_v10 = vpack.c.bf16 %v3930_v0, %v3929_v32 }
 0x3c9   :  { %v2926_v11 = vpack.c.bf16 %v3960_v58, %v3959_v9  ;;  %v3933_v12 = vpop.permute.xlu1 %3932 }
 0x3ca   :  { %v3935_v36 = vunpack.i.h.bf16 %v3933_v12  ;;  %v3934_v37 = vunpack.i.l.bf16 %v3933_v12  ;;  %v3963_v18 = vpop.permute.xlu0 %3962 }
 0x3cb   :  { %v3965_v29 = vunpack.i.h.bf16 %v3963_v18  ;;  %v3964_v33 = vunpack.i.l.bf16 %v3963_v18  ;;  %3761 = vmatprep.subr.bf16.mxu1 %v2926_v11 }
 0x3cc   :  { %3762 = vmatpush3.bf16.msra.mxu1 %v2918_v10  ;;  %v2919_v30 = vpack.c.bf16 %v3935_v36, %v3934_v37 }
 0x3cd   :  { %v2927_v62 = vpack.c.bf16 %v3965_v29, %v3964_v33  ;;  %v3938_v63 = vpop.permute.xlu1 %3937 }
 0x3ce   :  { %v3940_v14 = vunpack.i.h.bf16 %v3938_v63  ;;  %v3939_v49 = vunpack.i.l.bf16 %v3938_v63  ;;  %v3968_v50 = vpop.permute.xlu0 %3967 }
 0x3cf   :  { %v3970_v15 = vunpack.i.h.bf16 %v3968_v50  ;;  %v3969_v59 = vunpack.i.l.bf16 %v3968_v50  ;;  %3763 = vmatprep.subr.bf16.mxu1 %v2927_v62 }
 0x3d0   :  { %3764 = vmatpush3.bf16.msra.mxu1 %v2919_v30  ;;  %v2920_v20 = vpack.c.bf16 %v3940_v14, %v3939_v49 }
 0x3d1   :  { %v2928_v5 = vpack.c.bf16 %v3970_v15, %v3969_v59  ;;  %v3978_v3 = vpop.permute.xlu1 %3977 }
 0x3d2   :  { %v3980_v21 = vunpack.i.h.bf16 %v3978_v3  ;;  %v3979_v4 = vunpack.i.l.bf16 %v3978_v3  ;;  %v3973_v39 = vpop.permute.xlu0 %3972 }
 0x3d3   :  { %v3975_v40 = vunpack.i.h.bf16 %v3973_v39  ;;  %v3974_v8 = vunpack.i.l.bf16 %v3973_v39  ;;  %3765 = vmatprep.subr.bf16.mxu1 %v2928_v5 }
 0x3d4   :  { %3766 = vmatpush3.bf16.msra.mxu1 %v2920_v20  ;;  %v2921_v25 = vpack.c.bf16 %v3980_v21, %v3979_v4 }
 0x3d5   :  { %v2929_v56 = vpack.c.bf16 %v3975_v40, %v3974_v8 }
 0x3d7   :  { %3767 = vmatprep.subr.bf16.mxu1 %v2929_v56 }
 0x3d8   :  { %3768 = vmatpush3.bf16.msra.mxu1 %v2921_v25 }
 0x3db   :  { %3145 = vmatmul.mubr.bf16.vlgmr.msra.gmra.mrb[144].mxu1 %v4261_v61 }
 0x3dc   :  { %3152 = vmatprep.mubr.bf16.mxu1 %v4264_v1 }
 0x3e2   :  { %v2968_v26 = vpop.permute.xlu1 %2967 }
 0x3e3   :  { %3153 = vmatmul.mubr.bf16.gmra.mrb[148].mxu1 %v4266_v28  ;;  %v2963_v41 = vpop.permute.xlu0 %2962 }
 0x3e4   :  { %3160 = vmatprep.mubr.bf16.mxu1 %v4267_v42 }
 0x3e6   :  { %v2978_v11 = vpop.permute.xlu1 %2977 }
 0x3e7   :  { %v2973_v32 = vpop.permute.xlu0 %2972 }
 0x3ea   :  { %v2988_v50 = vpop.permute.xlu1 %2987 }
 0x3eb   :  { %3161 = vmatmul.mubr.bf16.gmra.mrb[152].mxu1 %v4269_v43  ;;  %v2983_v63 = vpop.permute.xlu0 %2982 }
 0x3ec   :  { %3168 = vmatprep.mubr.bf16.mxu1 %v4270_v35 }
 0x3ee   :  { %v2998_v61 = vpop.permute.xlu1 %2997 }
 0x3ef   :  { %v2993_v40 = vpop.permute.xlu0 %2992 }
 0x3f3   :  { %3169 = vmatmul.mubr.bf16.gmra.mrb[156].mxu1 %v4272_v22 }
 0x3f4   :  { %3176 = vmatprep.mubr.bf16.mxu1 %v4273_v17 }
 0x3fb   :  { %3177 = vmatmul.mubr.bf16.gmra.mrb[160].mxu1 %v4275_v16 }
 0x3fc   :  { %3184 = vmatprep.mubr.bf16.mxu1 %v4276_v51  ;;  %v3003_v51 = vpop.permute.xlu0 %3002 }
 0x403   :  { %3185 = vmatmul.mubr.bf16.gmra.mrb[164].mxu1 %v4278_v45 }
 0x404   :  { %3192 = vmatprep.mubr.bf16.mxu1 %v4279_v47 }
 0x40b   :  { %3193 = vmatmul.mubr.bf16.gmra.mrb[168].mxu1 %v4281_v13  ;;  %v3008_v13 = vpop.permute.xlu1 %3007 }
 0x40c   :  { %3200 = vmatprep.mubr.bf16.mxu1 %v3738_v46 }
 0x413   :  { %3201 = vmatmul.mubr.bf16.gmra.mrb[172].mxu1 %v3737_v34 }
 0x4ae   :  { %v3769_v23 = vpop.f32.mrb[144].mxu1 }
 0x4af   :  { %v3770_v52 = vpop.f32.mrb[145].mxu1 }
 0x4b0   :  { %v3771_v53 = vadd.f32 %v3770_v52, %v3769_v23  ;;  %v3772_v24 = vpop.f32.mrb[146].mxu1 }
 0x4b1   :  { %v3773_v54 = vpop.f32.mrb[147].mxu1 }
 0x4b2   :  { %v3147_v55 = vadd.f32 %v3771_v53, %v2963_v41  ;;  %v3774_v6 = vadd.f32 %v3773_v54, %v3772_v24  ;;  %v3013_v54 = vpop.permute.xlu0 %3012 }
 0x4b4   :  { %v3150_v27 = vadd.f32 %v3774_v6, %v2968_v26  ;;  %v3208_v7 = vmax.f32 %v3147_v55, 0.0 }
 0x4b6   :  { %v3209_v2 = vmax.f32 %v3150_v27, 0.0  ;;  %v3775_v44 = vpop.f32.mrb[148].mxu1  ;;  %v3018_v27 = vpop.permute.xlu1 %3017 }
 0x4b7   :  { %v3776_v19 = vpop.f32.mrb[149].mxu1 }
 0x4b8   :  { %v3777_v31 = vadd.f32 %v3776_v19, %v3775_v44  ;;  %v3778_v60 = vpop.f32.mrb[150].mxu1  ;;  %v3223_v0 = vpack.c.bf16 %v3209_v2, %v3208_v7 }
 0x4b9   :  { %v3779_v57 = vpop.f32.mrb[151].mxu1 }
 0x4ba   :  { %v3155_v58 = vadd.f32 %v3777_v31, %v2973_v32  ;;  %v3780_v9 = vadd.f32 %v3779_v57, %v3778_v60  ;;  %3838 = vmatprep.subr.bf16.mxu0 %v3223_v0  ;;  %v3023_v57 = vpop.permute.xlu0 %3022 }
 0x4bb   :  { %3839 = vmatpush3.bf16.msra.mxu0 %v3223_v0 }
 0x4bc   :  { %v3158_v12 = vadd.f32 %v3780_v9, %v2978_v11  ;;  %v3210_v10 = vmax.f32 %v3155_v58, 0.0 }
 0x4be   :  { %v3211_v36 = vmax.f32 %v3158_v12, 0.0  ;;  %v3781_v37 = vpop.f32.mrb[152].mxu1  ;;  %v3028_v12 = vpop.permute.xlu1 %3027 }
 0x4bf   :  { %v3782_v18 = vpop.f32.mrb[153].mxu1 }
 0x4c0   :  { %v3783_v29 = vadd.f32 %v3782_v18, %v3781_v37  ;;  %v3784_v33 = vpop.f32.mrb[154].mxu1  ;;  %v3224_v62 = vpack.c.bf16 %v3211_v36, %v3210_v10 }
 0x4c1   :  { %v3785_v30 = vpop.f32.mrb[155].mxu1 }
 0x4c2   :  { %v3163_v14 = vadd.f32 %v3783_v29, %v2983_v63  ;;  %v3786_v49 = vadd.f32 %v3785_v30, %v3784_v33  ;;  %3840 = vmatprep.subr.bf16.mxu0 %v3224_v62  ;;  %v3033_v30 = vpop.permute.xlu0 %3032 }
 0x4c3   :  { %3841 = vmatpush3.bf16.msra.mxu0 %v3224_v62 }
 0x4c4   :  { %v3166_v15 = vadd.f32 %v3786_v49, %v2988_v50  ;;  %v3212_v59 = vmax.f32 %v3163_v14, 0.0 }
 0x4c6   :  { %v3213_v5 = vmax.f32 %v3166_v15, 0.0  ;;  %v3787_v3 = vpop.f32.mrb[156].mxu1 }
 0x4c7   :  { %v3788_v20 = vpop.f32.mrb[157].mxu1 }
 0x4c8   :  { %v3789_v21 = vadd.f32 %v3788_v20, %v3787_v3  ;;  %v3790_v4 = vpop.f32.mrb[158].mxu1  ;;  %v3225_v39 = vpack.c.bf16 %v3213_v5, %v3212_v59  ;;  %v4285_v5 = vld [vmem:[%s6063_s7 + $0x8] sm:$0xff]   ;;  %v4286_v3 = vld [vmem:[%s6063_s7 + $0x10] sm:$0xff]   ;;  %v4287_v20 = vld [vmem:[%s6063_s7 + $0x18] sm:$0xff]  }
 0x4c9   :  { %v3791_v8 = vpop.f32.mrb[159].mxu1 }
 0x4ca   :  { %v3171_v56 = vadd.f32 %v3789_v21, %v2993_v40  ;;  %v3792_v25 = vadd.f32 %v3791_v8, %v3790_v4  ;;  %3842 = vmatprep.subr.bf16.mxu0 %v3225_v39  ;;  %v4288_v21 = vld [vmem:[%s6063_s7 + $0x20] sm:$0xff]   ;;  %v4289_v4 = vld [vmem:[%s6063_s7 + $0x28] ss:$0 sps:$4 sm:$0x33]   ;;  %v3256_v40 = vpop.permute.xlu1 %3255 }
 0x4cb   :  { %3843 = vmatpush3.bf16.msra.mxu0 %v3225_v39  ;;  %v4299_v39 = vmov 0.0  }
 0x4cc   :  { %v3174_v1 = vadd.f32 %v3792_v25, %v2998_v61  ;;  %v3214_v28 = vmax.f32 %v3171_v56, 0.0  ;;  %3866 = vmatprep.subr.bf16.mxu1 %v4299_v39  ;;  %3878 = vmatprep.mubr.msk.bf16.mxu1 %vm4300_vm3, %v4299_v39  ;;  %v3261_v56 = vpop.permute.xlu0 %3260 }
 0x4ce   :  { %v3215_v42 = vmax.f32 %v3174_v1, 0.0  ;;  %v3793_v43 = vpop.f32.mrb[160].mxu1  ;;  %v3266_v8 = vpop.permute.xlu1 %3265 }
 0x4cf   :  { %v3794_v35 = vpop.f32.mrb[161].mxu1 }
 0x4d0   :  { %v3795_v22 = vadd.f32 %v3794_v35, %v3793_v43  ;;  %v3796_v17 = vpop.f32.mrb[162].mxu1  ;;  %v3226_v16 = vpack.c.bf16 %v3215_v42, %v3214_v28  ;;  %v3271_v61 = vpop.permute.xlu0 %3270 }
 0x4d1   :  { %v3797_v45 = vpop.f32.mrb[163].mxu1 }
 0x4d2   :  { %v3179_v47 = vadd.f32 %v3795_v22, %v3003_v51  ;;  %v3798_v48 = vadd.f32 %v3797_v45, %v3796_v17  ;;  %3844 = vmatprep.subr.bf16.mxu0 %v3226_v16  ;;  %v3276_v25 = vpop.permute.xlu1 %3275 }
 0x4d3   :  { %3845 = vmatpush3.bf16.msra.mxu0 %v3226_v16 }
 0x4d4   :  { %v3182_v46 = vadd.f32 %v3798_v48, %v3008_v13  ;;  %v3216_v34 = vmax.f32 %v3179_v47, 0.0  ;;  %v3281_v51 = vpop.permute.xlu0 %3280 }
 0x4d6   :  { %v3217_v38 = vmax.f32 %v3182_v46, 0.0  ;;  %v3799_v23 = vpop.f32.mrb[164].mxu1  ;;  %v3286_v22 = vpop.permute.xlu1 %3285 }
 0x4d7   :  { %v3800_v52 = vpop.f32.mrb[165].mxu1 }
 0x4d8   :  { %v3801_v53 = vadd.f32 %v3800_v52, %v3799_v23  ;;  %v3802_v24 = vpop.f32.mrb[166].mxu1  ;;  %v3227_v41 = vpack.c.bf16 %v3217_v38, %v3216_v34 }
 0x4d9   :  { %v3803_v55 = vpop.f32.mrb[167].mxu1 }
 0x4da   :  { %v3187_v6 = vadd.f32 %v3801_v53, %v3013_v54  ;;  %v3804_v26 = vadd.f32 %v3803_v55, %v3802_v24  ;;  %3846 = vmatprep.subr.bf16.mxu0 %v3227_v41  ;;  %v3296_v52 = vpop.permute.xlu1 %3295 }
 0x4db   :  { %3847 = vmatpush3.bf16.msra.mxu0 %v3227_v41  ;;  %v3291_v41 = vpop.permute.xlu0 %3290 }
 0x4dc   :  { %v3190_v7 = vadd.f32 %v3804_v26, %v3018_v27  ;;  %v3218_v2 = vmax.f32 %v3187_v6, 0.0 }
 0x4de   :  { %v3219_v44 = vmax.f32 %v3190_v7, 0.0  ;;  %v3805_v19 = vpop.f32.mrb[168].mxu1 }
 0x4df   :  { %v3806_v31 = vpop.f32.mrb[169].mxu1 }
 0x4e0   :  { %v3807_v60 = vadd.f32 %v3806_v31, %v3805_v19  ;;  %v3808_v0 = vpop.f32.mrb[170].mxu1  ;;  %v3228_v32 = vpack.c.bf16 %v3219_v44, %v3218_v2 }
 0x4e1   :  { %v3809_v58 = vpop.f32.mrb[171].mxu1 }
 0x4e2   :  { %v3195_v9 = vadd.f32 %v3807_v60, %v3023_v57  ;;  %v3810_v11 = vadd.f32 %v3809_v58, %v3808_v0  ;;  %3848 = vmatprep.subr.bf16.mxu0 %v3228_v32  ;;  %v3306_v60 = vpop.permute.xlu1 %3305 }
 0x4e3   :  { %3849 = vmatpush3.bf16.msra.mxu0 %v3228_v32 }
 0x4e4   :  { %v3198_v10 = vadd.f32 %v3810_v11, %v3028_v12  ;;  %v3220_v36 = vmax.f32 %v3195_v9, 0.0  ;;  %v3301_v12 = vpop.permute.xlu0 %3300 }
 0x4e6   :  { %v3221_v37 = vmax.f32 %v3198_v10, 0.0  ;;  %v3811_v18 = vpop.f32.mrb[172].mxu1 }
 0x4e7   :  { %v3812_v29 = vpop.f32.mrb[173].mxu1 }
 0x4e8   :  { %v3813_v33 = vadd.f32 %v3812_v29, %v3811_v18  ;;  %v3229_v62 = vpack.c.bf16 %v3221_v37, %v3220_v36  ;;  %v3814_v63 = vpop.f32.mrb[174].mxu1 }
 0x4e9   :  { %v3815_v14 = vpop.f32.mrb[175].mxu1 }
 0x4ea   :  { %v3203_v49 = vadd.f32 %v3813_v33, %v3033_v30  ;;  %3850 = vmatprep.subr.bf16.mxu0 %v3229_v62  ;;  %v4290_v30 = vld [vmem:[%s6064_s9] sm:$0xff]   ;;  %v3463_v14 = vpop.permute.xlu0 %3462 }
 0x4eb   :  { %3851 = vmatpush3.bf16.msra.mxu0 %v3229_v62 }
 0x4ec   :  { %v3222_v50 = vmax.f32 %v3203_v49, 0.0 }
 0x4ee   :  { %v3230_v15 = vpack.c.bf16 %v3222_v50, %v3222_v50 }
 0x4f0   :  { %3898 = vmatprep.subr.msk.bf16.mxu0 %vm3355_vm2, %v3230_v15  ;;  %v3357_v59 = vsel %vm3355_vm2, %v3230_v15, 0 }
 0x4f1   :  { %3853 = vmatpush3.bf16.msra.mxu0 %v3357_v59  ;;  %v3468_v59 = vpop.permute.xlu1 %3467 }
 0x4f4   :  { %3855 = vmatmul.mubr.msk.bf16.vlgmr.msra.gmra.mrb[160].mxu0 %vm3336_vm1, %v4285_v5 }
 0x4f5   :  { %3858 = vmatprep.mubr.msk.bf16.mxu0 %vm3336_vm1, %v4286_v3 }
 0x4fc   :  { %3859 = vmatmul.mubr.msk.bf16.gmra.mrb[164].mxu0 %vm3336_vm1, %v4287_v20 }
 0x4fd   :  { %3862 = vmatprep.mubr.msk.bf16.mxu0 %vm3336_vm1, %v4288_v21 }
 0x504   :  { %3863 = vmatmul.mubr.msk.bf16.gmra.mrb[168].mxu0 %vm3336_vm1, %v4289_v4 }
 0x5c7   :  { %v3856_v1 = vpop.f32.mrb[160].mxu0 }
 0x5c8   :  { %v3402_v28 = vadd.f32 %v3856_v1, %v3266_v8  ;;  %v3393_v42 = vpop.f32.mrb[161].mxu0 }
 0x5c9   :  { %v3394_v43 = vadd.f32 %v3393_v42, %v3256_v40  ;;  %v3857_v35 = vpop.f32.mrb[162].mxu0 }
 0x5ca   :  { %v3405_v17 = vadd.f32 %v3857_v35, %v3271_v61  ;;  %v3396_v16 = vpop.f32.mrb[163].mxu0  ;;  %v3441_v47 = vmax.f32 %v3402_v28, 0.0 }
 0x5cb   :  { %v3397_v45 = vadd.f32 %v3396_v16, %v3261_v56  ;;  %v3439_v13 = vmax.f32 %v3394_v43, 0.0 }
 0x5cc   :  { %v3442_v48 = vmax.f32 %v3405_v17, 0.0 }
 0x5cd   :  { %v3440_v46 = vmax.f32 %v3397_v45, 0.0 }
 0x5ce   :  { %v3451_v34 = vpack.c.bf16 %v3442_v48, %v3441_v47 }
 0x5cf   :  { %v3450_v38 = vpack.c.bf16 %v3440_v46, %v3439_v13  ;;  %v3860_v23 = vpop.f32.mrb[164].mxu0 }
 0x5d0   :  { %v3418_v53 = vadd.f32 %v3860_v23, %v3286_v22  ;;  %v3409_v24 = vpop.f32.mrb[165].mxu0 }
 0x5d1   :  { %v3410_v54 = vadd.f32 %v3409_v24, %v3276_v25  ;;  %v3861_v55 = vpop.f32.mrb[166].mxu0  ;;  %3867 = vmatpush3.bf16.msra.mxu1 %v3450_v38 }
 0x5d2   :  { %v3421_v6 = vadd.f32 %v3861_v55, %v3291_v41  ;;  %v3412_v26 = vpop.f32.mrb[167].mxu0  ;;  %3868 = vmatprep.subr.bf16.mxu1 %v4299_v39  ;;  %v3445_v7 = vmax.f32 %v3418_v53, 0.0 }
 0x5d3   :  { %v3413_v27 = vadd.f32 %v3412_v26, %v3281_v51  ;;  %v3443_v44 = vmax.f32 %v3410_v54, 0.0 }
 0x5d4   :  { %v3446_v2 = vmax.f32 %v3421_v6, 0.0 }
 0x5d5   :  { %v3444_v19 = vmax.f32 %v3413_v27, 0.0  ;;  %3869 = vmatpush3.bf16.msra.mxu1 %v3451_v34 }
 0x5d6   :  { %v3453_v31 = vpack.c.bf16 %v3446_v2, %v3445_v7  ;;  %3870 = vmatprep.subr.bf16.mxu1 %v4299_v39 }
 0x5d7   :  { %v3452_v0 = vpack.c.bf16 %v3444_v19, %v3443_v44  ;;  %v3864_v32 = vpop.f32.mrb[168].mxu0 }
 0x5d8   :  { %v3434_v57 = vadd.f32 %v3864_v32, %v3306_v60  ;;  %v3425_v58 = vpop.f32.mrb[169].mxu0 }
 0x5d9   :  { %v3426_v9 = vadd.f32 %v3425_v58, %v3296_v52  ;;  %v3865_v11 = vpop.f32.mrb[170].mxu0  ;;  %3871 = vmatpush3.bf16.msra.mxu1 %v3452_v0 }
 0x5da   :  { %v3428_v10 = vpop.f32.mrb[171].mxu0  ;;  %3872 = vmatprep.subr.bf16.mxu1 %v4299_v39  ;;  %v3449_v37 = vmax.f32 %v3434_v57, 0.0 }
 0x5db   :  { %v3429_v36 = vadd.f32 %v3428_v10, %v3301_v12  ;;  %v3447_v18 = vmax.f32 %v3426_v9, 0.0 }
 0x5dc   :  { %v3455_v62 = vpack.c.bf16 %v3449_v37, %v3449_v37 }
 0x5dd   :  { %v3448_v29 = vmax.f32 %v3429_v36, 0.0  ;;  %3873 = vmatpush3.bf16.msra.mxu1 %v3453_v31 }
 0x5de   :  { %3874 = vmatprep.subr.bf16.mxu1 %v4299_v39  ;;  %v3481_v63 = vsel %vm3479_vm4, %v3455_v62, 0 }
 0x5df   :  { %v3454_v33 = vpack.c.bf16 %v3448_v29, %v3447_v18 }
 0x5e1   :  { %3875 = vmatpush3.bf16.msra.mxu1 %v3454_v33 }
 0x5e2   :  { %3876 = vmatprep.subr.bf16.mxu1 %v4299_v39 }
 0x5e5   :  { %3877 = vmatpush3.bf16.msra.mxu1 %v3481_v63 }
 0x5e8   :  { %3879 = vmatmul.mubr.msk.bf16.vlgmr.msra.gmra.mrb[176].mxu1 %vm3475_vm5, %v4290_v30 }
 0x6bb   :  { %v3517_v49 = vpop.f32.mrb[176].mxu1 }
 0x6bc   :  { %v3518_v50 = vadd.f32 %v3517_v49, %v3463_v14  ;;  %v3880_v15 = vpop.f32.mrb[177].mxu1 }
 0x6bd   :  { %v3520_v5 = vpop.f32.mrb[178].mxu1 }
 0x6be   :  { %3525 = vst.msk [vmem:[%s6065_s11] sm:$0xff] %vm3524_vm6, %v3518_v50  ;;  %v3521_v3 = vadd.f32 %v3520_v5, %v3468_v59  ;;  %v3881_v20 = vpop.f32.mrb[179].mxu1 }
 0x6c0   :  { %3526 = vst.msk [vmem:[%s6065_s11 + $0x8] sm:$0xff] %vm3524_vm6, %v3521_v3 }

</bundles_post_ra>
